<compile_context>
chip_gen: v7x
topology: tpu7x:2x2x1
jax: 0.10.0
libtpu: 0.0.40
codegen_flags: <defaults>
</compile_context>

<pallas_src>
import functools

import jax
import jax.numpy as jnp
from jax.experimental import pallas as pl
from jax.experimental.pallas import tpu as pltpu

EPS = 1e-5          # torch.nn.LayerNorm default
NEG_INF = -1e30     # finite additive mask value (keeps exp/max path NaN-free)


def _layernorm(x, gamma, beta):
    mu = jnp.mean(x, axis=-1, keepdims=True)
    var = jnp.mean(jnp.square(x - mu), axis=-1, keepdims=True)
    return (x - mu) * jax.lax.rsqrt(var + EPS) * gamma + beta


def _gelu_tanh(x):
    # TODO(synk): F.gelu default is the exact erf form; tanh approximation is
    # used because erf has no guaranteed Mosaic lowering (max abs dev ~1e-3).
    c = 0.7978845608028654  # sqrt(2/pi)
    return 0.5 * x * (1.0 + jnp.tanh(c * (x + 0.044715 * x * x * x)))


def _masked_mha(x, gamma, beta, wqkv, wproj, bproj, bias, *, heads, d_model):
    """PreNorm + multi-head self-attention over one flattened (S, D) tile.

    The space/time group structure is encoded in the additive (S, S) `bias`
    (0 inside a group, -1e30 across groups), so one (S x S) matmul per head
    replaces many sub-MXU-granularity per-group matmuls and no activation
    reorder/transpose is ever needed.
    """
    head_dim = d_model // heads
    scale = head_dim ** -0.5

    xn = _layernorm(x, gamma, beta)                                   # PreNorm
    qkv = jnp.dot(xn, wqkv, preferred_element_type=jnp.float32)       # (S, 3D)
    q = qkv[:, :d_model] * scale
    k = qkv[:, d_model:2 * d_model]
    v = qkv[:, 2 * d_model:]

    acc = None
    for h in range(heads):                       # static, heads is small
        sl = slice(h * head_dim, (h + 1) * head_dim)
        # s[i, j] = q_h[i, :] . k_h[j, :]
        s = jax.lax.dot_general(q[:, sl], k[:, sl],
                                (((1,), (1,)), ((), ())),
                                preferred_element_type=jnp.float32)    # (S, S)
        s = s + bias
        s = s - jnp.max(s, axis=-1, keepdims=True)
        p = jnp.exp(s)
        p = p * pl.reciprocal(jnp.sum(p, axis=-1, keepdims=True), approx=True)
        oh = jnp.dot(p, v[:, sl], preferred_element_type=jnp.float32)  # (S, hd)
        # accumulate straight into the output projection: no lane concat needed
        ph = jnp.dot(oh, wproj[sl, :], preferred_element_type=jnp.float32)
        acc = ph if acc is None else acc + ph
    return acc + bproj


def encoder_kernel(x_ref, sbias_ref, tbias_ref,
                   gs_ref, bs_ref, wqkv_s_ref, wproj_s_ref, bproj_s_ref,
                   gt_ref, bt_ref, wqkv_t_ref, wproj_t_ref, bproj_t_ref,
                   wls_ref, wlt_ref, bl_ref,
                   gm_ref, bm_ref, w1_ref, b1_ref, w2_ref, b2_ref,
                   o_ref, *, heads, d_model):
    x = x_ref[...]                                   # (S, D)

    # --- space-attention branch: tokens of the same frame attend to each other
    xs = _masked_mha(x, gs_ref[...], bs_ref[...], wqkv_s_ref[...],
                     wproj_s_ref[...], bproj_s_ref[...], sbias_ref[...],
                     heads=heads, d_model=d_model)
    # --- time-attention branch: tokens of the same joint attend to each other.
    #     The PyTorch (t n)<->(n t) permute is folded into the mask, so no
    #     transpose of the activations is ever materialized.
    xt = _masked_mha(x, gt_ref[...], bt_ref[...], wqkv_t_ref[...],
                     wproj_t_ref[...], bproj_t_ref[...], tbias_ref[...],
                     heads=heads, d_model=d_model)

    # --- Linear(cat([xs, xt], dim=-1)) with the weight split along its input
    #     dim (avoids an in-kernel lane concat), then residual out_att += x.
    out_att = (jnp.dot(xs, wls_ref[...], preferred_element_type=jnp.float32)
               + jnp.dot(xt, wlt_ref[...], preferred_element_type=jnp.float32)
               + bl_ref[...] + x)

    # --- FeedForward: the reference overwrites `src` with LayerNorm(src), so
    #     the module returns LN(src) + FF(LN(src)); the encoder adds out_att.
    src = _layernorm(out_att, gm_ref[...], bm_ref[...])
    h = _gelu_tanh(jnp.dot(src, w1_ref[...],
                           preferred_element_type=jnp.float32) + b1_ref[...])
    src2 = jnp.dot(h, w2_ref[...], preferred_element_type=jnp.float32) + b2_ref[...]

    o_ref[...] = src + src2 + out_att


def _fused_encoder(x, sbias, tbias, p, *, heads):
    b, s, d = x.shape
    ff = p['w1'].shape[1]
    kernel = functools.partial(encoder_kernel, heads=heads, d_model=d)

    def full(shape):
        return pl.BlockSpec(shape, lambda i, _shape=shape: (0,) * len(_shape))

    tok_in = pl.BlockSpec((None, s, d), lambda i: (i, 0, 0))
    tok_out = pl.BlockSpec((None, s, d), lambda i: (i, 0, 0))

    return pl.pallas_call(
        kernel,
        out_shape=jax.ShapeDtypeStruct((b, s, d), jnp.float32),
        grid=(b,),
        in_specs=[
            tok_in,                                 # x
            full((s, s)), full((s, s)),             # space / time additive masks
            full((1, d)), full((1, d)),             # gamma_s, beta_s
            full((d, 3 * d)), full((d, d)), full((1, d)),   # wqkv_s, wproj_s, bproj_s
            full((1, d)), full((1, d)),             # gamma_t, beta_t
            full((d, 3 * d)), full((d, d)), full((1, d)),   # wqkv_t, wproj_t, bproj_t
            full((d, d)), full((d, d)), full((1, d)),       # wl_s, wl_t, bl
            full((1, d)), full((1, d)),             # gamma_m, beta_m
            full((d, ff)), full((1, ff)), full((ff, d)), full((1, d)),  # FFN
        ],
        out_specs=tok_out,
        compiler_params=pltpu.CompilerParams(
            dimension_semantics=("parallel",),      # batch -> both TCs on v7x
        ),
    )(x, sbias, tbias,
      p['gamma_s'], p['beta_s'], p['wqkv_s'], p['wproj_s'], p['bproj_s'],
      p['gamma_t'], p['beta_t'], p['wqkv_t'], p['wproj_t'], p['bproj_t'],
      p['wl_s'], p['wl_t'], p['bl'],
      p['gamma_m'], p['beta_m'], p['w1'], p['b1'], p['w2'], p['b2'])


@functools.partial(jax.jit, static_argnames=("num_space", "num_time", "heads"))
def transformer_encoder(x, params, *, num_space, num_time, heads):
    b, s, d = x.shape
    t, n = num_time, num_space
    assert s == t * n
    # Group-membership masks on the flat (t n)-ordered token axis:
    #   space: same frame  <=> i // n == j // n
    #   time : same joint  <=> i %  n == j %  n
    tok = jnp.arange(s, dtype=jnp.int32)
    tid = tok // n
    nid = tok % n
    sbias = jnp.where(tid[:, None] == tid[None, :], 0.0, NEG_INF).astype(jnp.float32)
    tbias = jnp.where(nid[:, None] == nid[None, :], 0.0, NEG_INF).astype(jnp.float32)
    return _fused_encoder(x, sbias, tbias, params, heads=heads)


def init_params(key, d_model, nhead, dim_feedforward):
    heads_half = int(nhead / 2.0)
    d = d_model
    ks = jax.random.split(key, 8)

    def w(k, shape):
        return (0.02 * jax.random.normal(k, shape)).astype(jnp.float32)

    ones = lambda m: jnp.ones((1, m), jnp.float32)
    zeros = lambda m: jnp.zeros((1, m), jnp.float32)

    params = dict(
        # PreNorm(space) + Attention(space)
        gamma_s=ones(d), beta_s=zeros(d),
        wqkv_s=w(ks[0], (d, 3 * d)), wproj_s=w(ks[1], (d, d)), bproj_s=zeros(d),
        # PreNorm(time) + Attention(time)
        gamma_t=ones(d), beta_t=zeros(d),
        wqkv_t=w(ks[2], (d, 3 * d)), wproj_t=w(ks[3], (d, d)), bproj_t=zeros(d),
        # Linear(2*d -> d), weight split along the input (concat) dim
        wl_s=w(ks[4], (d, d)), wl_t=w(ks[5], (d, d)), bl=zeros(d),
        # FeedForward
        gamma_m=ones(d), beta_m=zeros(d),
        w1=w(ks[6], (d, dim_feedforward)), b1=zeros(dim_feedforward),
        w2=w(ks[7], (dim_feedforward, d)), b2=zeros(d),
    )
    return params, heads_half


if __name__ == "__main__":
    batch = 2
    d_model = 32
    nhead = 4              # -> heads_half = 2, head_dim = 16
    num_space = 8
    num_time = 8
    dim_feedforward = 64
    seq = num_time * num_space

    key = jax.random.PRNGKey(0)
    kx, kp = jax.random.split(key)
    x = jax.random.normal(kx, (batch, seq, d_model), dtype=jnp.float32)
    params, heads_half = init_params(kp, d_model, nhead, dim_feedforward)

    out = transformer_encoder(x, params, num_space=num_space,
                              num_time=num_time, heads=heads_half)
    out = jax.block_until_ready(out)
    assert out.shape == (batch, seq, d_model)
    assert bool(jnp.all(jnp.isfinite(out)))
    print("KERNEL_OK")
</pallas_src>

<mosaic_0001>
module attributes {stable_mosaic.version = 11 : i64} {
  func.func @encoder_kernel(%arg0: i32, %arg1: memref<1x64x32xf32, #tpu.memory_space<vmem>>, %arg2: memref<64x64xf32, #tpu.memory_space<vmem>>, %arg3: memref<64x64xf32, #tpu.memory_space<vmem>>, %arg4: memref<1x32xf32, #tpu.memory_space<vmem>>, %arg5: memref<1x32xf32, #tpu.memory_space<vmem>>, %arg6: memref<32x96xf32, #tpu.memory_space<vmem>>, %arg7: memref<32x32xf32, #tpu.memory_space<vmem>>, %arg8: memref<1x32xf32, #tpu.memory_space<vmem>>, %arg9: memref<1x32xf32, #tpu.memory_space<vmem>>, %arg10: memref<1x32xf32, #tpu.memory_space<vmem>>, %arg11: memref<32x96xf32, #tpu.memory_space<vmem>>, %arg12: memref<32x32xf32, #tpu.memory_space<vmem>>, %arg13: memref<1x32xf32, #tpu.memory_space<vmem>>, %arg14: memref<32x32xf32, #tpu.memory_space<vmem>>, %arg15: memref<32x32xf32, #tpu.memory_space<vmem>>, %arg16: memref<1x32xf32, #tpu.memory_space<vmem>>, %arg17: memref<1x32xf32, #tpu.memory_space<vmem>>, %arg18: memref<1x32xf32, #tpu.memory_space<vmem>>, %arg19: memref<32x64xf32, #tpu.memory_space<vmem>>, %arg20: memref<1x64xf32, #tpu.memory_space<vmem>>, %arg21: memref<64x32xf32, #tpu.memory_space<vmem>>, %arg22: memref<1x32xf32, #tpu.memory_space<vmem>>, %arg23: memref<1x64x32xf32, #tpu.memory_space<vmem>>) attributes {dimension_semantics = [#tpu.dimension_semantics<parallel>], iteration_bounds = array<i64: 2>, scalar_prefetch = 0 : i64, scratch_operands = 0 : i64, tpu.core_type = #tpu.core_type<tc>, window_params = [{transform_indices = @transform_0, window_bounds = array<i64: 1, 64, 32>}, {pipeline_mode = #tpu.pipeline_mode<synchronous>, transform_indices = @transform_1, window_bounds = array<i64: 64, 64>}, {pipeline_mode = #tpu.pipeline_mode<synchronous>, transform_indices = @transform_2, window_bounds = array<i64: 64, 64>}, {pipeline_mode = #tpu.pipeline_mode<synchronous>, transform_indices = @transform_3, window_bounds = array<i64: 1, 32>}, {pipeline_mode = #tpu.pipeline_mode<synchronous>, transform_indices = @transform_4, window_bounds = array<i64: 1, 32>}, {pipeline_mode = #tpu.pipeline_mode<synchronous>, transform_indices = @transform_5, window_bounds = array<i64: 32, 96>}, {pipeline_mode = #tpu.pipeline_mode<synchronous>, transform_indices = @transform_6, window_bounds = array<i64: 32, 32>}, {pipeline_mode = #tpu.pipeline_mode<synchronous>, transform_indices = @transform_7, window_bounds = array<i64: 1, 32>}, {pipeline_mode = #tpu.pipeline_mode<synchronous>, transform_indices = @transform_8, window_bounds = array<i64: 1, 32>}, {pipeline_mode = #tpu.pipeline_mode<synchronous>, transform_indices = @transform_9, window_bounds = array<i64: 1, 32>}, {pipeline_mode = #tpu.pipeline_mode<synchronous>, transform_indices = @transform_10, window_bounds = array<i64: 32, 96>}, {pipeline_mode = #tpu.pipeline_mode<synchronous>, transform_indices = @transform_11, window_bounds = array<i64: 32, 32>}, {pipeline_mode = #tpu.pipeline_mode<synchronous>, transform_indices = @transform_12, window_bounds = array<i64: 1, 32>}, {pipeline_mode = #tpu.pipeline_mode<synchronous>, transform_indices = @transform_13, window_bounds = array<i64: 32, 32>}, {pipeline_mode = #tpu.pipeline_mode<synchronous>, transform_indices = @transform_14, window_bounds = array<i64: 32, 32>}, {pipeline_mode = #tpu.pipeline_mode<synchronous>, transform_indices = @transform_15, window_bounds = array<i64: 1, 32>}, {pipeline_mode = #tpu.pipeline_mode<synchronous>, transform_indices = @transform_16, window_bounds = array<i64: 1, 32>}, {pipeline_mode = #tpu.pipeline_mode<synchronous>, transform_indices = @transform_17, window_bounds = array<i64: 1, 32>}, {pipeline_mode = #tpu.pipeline_mode<synchronous>, transform_indices = @transform_18, window_bounds = array<i64: 32, 64>}, {pipeline_mode = #tpu.pipeline_mode<synchronous>, transform_indices = @transform_19, window_bounds = array<i64: 1, 64>}, {pipeline_mode = #tpu.pipeline_mode<synchronous>, transform_indices = @transform_20, window_bounds = array<i64: 64, 32>}, {pipeline_mode = #tpu.pipeline_mode<synchronous>, transform_indices = @transform_21, window_bounds = array<i64: 1, 32>}, {transform_indices = @transform_22, window_bounds = array<i64: 1, 64, 32>}]} {
    %c0 = arith.constant 0 : index
    %c0_0 = arith.constant 0 : index
    %c0_1 = arith.constant 0 : index
    %0 = vector.load %arg1[%c0, %c0_0, %c0_1] : memref<1x64x32xf32, #tpu.memory_space<vmem>>, vector<1x64x32xf32>
    %1 = vector.shape_cast %0 : vector<1x64x32xf32> to vector<64x32xf32>
    %c0_2 = arith.constant 0 : index
    %c0_3 = arith.constant 0 : index
    %2 = vector.load %arg4[%c0_2, %c0_3] : memref<1x32xf32, #tpu.memory_space<vmem>>, vector<1x32xf32>
    %c0_4 = arith.constant 0 : index
    %c0_5 = arith.constant 0 : index
    %3 = vector.load %arg5[%c0_4, %c0_5] : memref<1x32xf32, #tpu.memory_space<vmem>>, vector<1x32xf32>
    %c0_6 = arith.constant 0 : index
    %c0_7 = arith.constant 0 : index
    %4 = vector.load %arg6[%c0_6, %c0_7] : memref<32x96xf32, #tpu.memory_space<vmem>>, vector<32x96xf32>
    %c0_8 = arith.constant 0 : index
    %c0_9 = arith.constant 0 : index
    %5 = vector.load %arg7[%c0_8, %c0_9] : memref<32x32xf32, #tpu.memory_space<vmem>>, vector<32x32xf32>
    %c0_10 = arith.constant 0 : index
    %c0_11 = arith.constant 0 : index
    %6 = vector.load %arg8[%c0_10, %c0_11] : memref<1x32xf32, #tpu.memory_space<vmem>>, vector<1x32xf32>
    %c0_12 = arith.constant 0 : index
    %c0_13 = arith.constant 0 : index
    %7 = vector.load %arg2[%c0_12, %c0_13] : memref<64x64xf32, #tpu.memory_space<vmem>>, vector<64x64xf32>
    %cst = arith.constant dense<0.000000e+00> : vector<64xf32>
    %8 = vector.multi_reduction <add>, %1, %cst [1] : vector<64x32xf32> to vector<64xf32>
    %9 = vector.shape_cast %8 : vector<64xf32> to vector<64x1xf32>
    %cst_14 = arith.constant 3.200000e+01 : f32
    %10 = vector.broadcast %cst_14 : f32 to vector<64x1xf32>
    %11 = arith.divf %9, %10 : vector<64x1xf32>
    %12 = vector.broadcast %11 : vector<64x1xf32> to vector<64x32xf32>
    %13 = arith.subf %1, %12 : vector<64x32xf32>
    %14 = arith.mulf %13, %13 : vector<64x32xf32>
    %cst_15 = arith.constant dense<0.000000e+00> : vector<64xf32>
    %15 = vector.multi_reduction <add>, %14, %cst_15 [1] : vector<64x32xf32> to vector<64xf32>
    %16 = vector.shape_cast %15 : vector<64xf32> to vector<64x1xf32>
    %cst_16 = arith.constant 3.200000e+01 : f32
    %17 = vector.broadcast %cst_16 : f32 to vector<64x1xf32>
    %18 = arith.divf %16, %17 : vector<64x1xf32>
    %19 = vector.broadcast %11 : vector<64x1xf32> to vector<64x32xf32>
    %20 = arith.subf %1, %19 : vector<64x32xf32>
    %cst_17 = arith.constant 9.99999974E-6 : f32
    %21 = vector.broadcast %cst_17 : f32 to vector<64x1xf32>
    %22 = arith.addf %18, %21 : vector<64x1xf32>
    %23 = math.rsqrt %22 : vector<64x1xf32>
    %24 = vector.broadcast %23 : vector<64x1xf32> to vector<64x32xf32>
    %25 = arith.mulf %20, %24 : vector<64x32xf32>
    %26 = vector.broadcast %2 : vector<1x32xf32> to vector<64x32xf32>
    %27 = arith.mulf %25, %26 : vector<64x32xf32>
    %28 = vector.broadcast %3 : vector<1x32xf32> to vector<64x32xf32>
    %29 = arith.addf %27, %28 : vector<64x32xf32>
    %cst_18 = arith.constant dense<0.000000e+00> : vector<64x96xf32>
    %30 = tpu.matmul %29, %4, %cst_18 {dimension_numbers = #tpu.dot_dimension_numbers<[1], [0], [0], [1], [0, 0, 1, 1], [], []>} : vector<64x32xf32>, vector<32x96xf32>, vector<64x96xf32> -> vector<64x96xf32>
    %31 = vector.extract_strided_slice %30 {offsets = [0, 0], sizes = [64, 32], strides = [1, 1]} : vector<64x96xf32> to vector<64x32xf32>
    %cst_19 = arith.constant 2.500000e-01 : f32
    %32 = vector.broadcast %cst_19 : f32 to vector<64x32xf32>
    %33 = arith.mulf %31, %32 : vector<64x32xf32>
    %34 = vector.extract_strided_slice %30 {offsets = [0, 32], sizes = [64, 32], strides = [1, 1]} : vector<64x96xf32> to vector<64x32xf32>
    %35 = vector.extract_strided_slice %30 {offsets = [0, 64], sizes = [64, 32], strides = [1, 1]} : vector<64x96xf32> to vector<64x32xf32>
    %36 = vector.extract_strided_slice %33 {offsets = [0, 0], sizes = [64, 16], strides = [1, 1]} : vector<64x32xf32> to vector<64x16xf32>
    %37 = vector.extract_strided_slice %34 {offsets = [0, 0], sizes = [64, 16], strides = [1, 1]} : vector<64x32xf32> to vector<64x16xf32>
    %cst_20 = arith.constant dense<0.000000e+00> : vector<64x64xf32>
    %38 = tpu.matmul %36, %37, %cst_20 {dimension_numbers = #tpu.dot_dimension_numbers<[1], [1], [0], [0], [0, 0, 1, 0], [], []>} : vector<64x16xf32>, vector<64x16xf32>, vector<64x64xf32> -> vector<64x64xf32>
    %39 = arith.addf %38, %7 : vector<64x64xf32>
    %cst_21 = arith.constant dense<0xFF800000> : vector<64xf32>
    %40 = vector.multi_reduction <maximumf>, %39, %cst_21 [1] : vector<64x64xf32> to vector<64xf32>
    %41 = vector.shape_cast %40 : vector<64xf32> to vector<64x1xf32>
    %42 = vector.broadcast %41 : vector<64x1xf32> to vector<64x64xf32>
    %43 = arith.subf %39, %42 : vector<64x64xf32>
    %44 = math.exp %43 : vector<64x64xf32>
    %cst_22 = arith.constant dense<0.000000e+00> : vector<64xf32>
    %45 = vector.multi_reduction <add>, %44, %cst_22 [1] : vector<64x64xf32> to vector<64xf32>
    %46 = vector.shape_cast %45 : vector<64xf32> to vector<64x1xf32>
    %47 = tpu.reciprocal %46 {approx = true} : vector<64x1xf32> -> vector<64x1xf32>
    %48 = vector.broadcast %47 : vector<64x1xf32> to vector<64x64xf32>
    %49 = arith.mulf %44, %48 : vector<64x64xf32>
    %50 = vector.extract_strided_slice %35 {offsets = [0, 0], sizes = [64, 16], strides = [1, 1]} : vector<64x32xf32> to vector<64x16xf32>
    %cst_23 = arith.constant dense<0.000000e+00> : vector<64x16xf32>
    %51 = tpu.matmul %49, %50, %cst_23 {dimension_numbers = #tpu.dot_dimension_numbers<[1], [0], [0], [1], [0, 0, 1, 1], [], []>} : vector<64x64xf32>, vector<64x16xf32>, vector<64x16xf32> -> vector<64x16xf32>
    %52 = vector.extract_strided_slice %5 {offsets = [0, 0], sizes = [16, 32], strides = [1, 1]} : vector<32x32xf32> to vector<16x32xf32>
    %cst_24 = arith.constant dense<0.000000e+00> : vector<64x32xf32>
    %53 = tpu.matmul %51, %52, %cst_24 {dimension_numbers = #tpu.dot_dimension_numbers<[1], [0], [0], [1], [0, 0, 1, 1], [], []>} : vector<64x16xf32>, vector<16x32xf32>, vector<64x32xf32> -> vector<64x32xf32>
    %54 = vector.extract_strided_slice %33 {offsets = [0, 16], sizes = [64, 16], strides = [1, 1]} : vector<64x32xf32> to vector<64x16xf32>
    %55 = vector.extract_strided_slice %34 {offsets = [0, 16], sizes = [64, 16], strides = [1, 1]} : vector<64x32xf32> to vector<64x16xf32>
    %cst_25 = arith.constant dense<0.000000e+00> : vector<64x64xf32>
    %56 = tpu.matmul %54, %55, %cst_25 {dimension_numbers = #tpu.dot_dimension_numbers<[1], [1], [0], [0], [0, 0, 1, 0], [], []>} : vector<64x16xf32>, vector<64x16xf32>, vector<64x64xf32> -> vector<64x64xf32>
    %57 = arith.addf %56, %7 : vector<64x64xf32>
    %cst_26 = arith.constant dense<0xFF800000> : vector<64xf32>
    %58 = vector.multi_reduction <maximumf>, %57, %cst_26 [1] : vector<64x64xf32> to vector<64xf32>
    %59 = vector.shape_cast %58 : vector<64xf32> to vector<64x1xf32>
    %60 = vector.broadcast %59 : vector<64x1xf32> to vector<64x64xf32>
    %61 = arith.subf %57, %60 : vector<64x64xf32>
    %62 = math.exp %61 : vector<64x64xf32>
    %cst_27 = arith.constant dense<0.000000e+00> : vector<64xf32>
    %63 = vector.multi_reduction <add>, %62, %cst_27 [1] : vector<64x64xf32> to vector<64xf32>
    %64 = vector.shape_cast %63 : vector<64xf32> to vector<64x1xf32>
    %65 = tpu.reciprocal %64 {approx = true} : vector<64x1xf32> -> vector<64x1xf32>
    %66 = vector.broadcast %65 : vector<64x1xf32> to vector<64x64xf32>
    %67 = arith.mulf %62, %66 : vector<64x64xf32>
    %68 = vector.extract_strided_slice %35 {offsets = [0, 16], sizes = [64, 16], strides = [1, 1]} : vector<64x32xf32> to vector<64x16xf32>
    %cst_28 = arith.constant dense<0.000000e+00> : vector<64x16xf32>
    %69 = tpu.matmul %67, %68, %cst_28 {dimension_numbers = #tpu.dot_dimension_numbers<[1], [0], [0], [1], [0, 0, 1, 1], [], []>} : vector<64x64xf32>, vector<64x16xf32>, vector<64x16xf32> -> vector<64x16xf32>
    %70 = vector.extract_strided_slice %5 {offsets = [16, 0], sizes = [16, 32], strides = [1, 1]} : vector<32x32xf32> to vector<16x32xf32>
    %cst_29 = arith.constant dense<0.000000e+00> : vector<64x32xf32>
    %71 = tpu.matmul %69, %70, %cst_29 {dimension_numbers = #tpu.dot_dimension_numbers<[1], [0], [0], [1], [0, 0, 1, 1], [], []>} : vector<64x16xf32>, vector<16x32xf32>, vector<64x32xf32> -> vector<64x32xf32>
    %72 = arith.addf %53, %71 : vector<64x32xf32>
    %73 = vector.broadcast %6 : vector<1x32xf32> to vector<64x32xf32>
    %74 = arith.addf %72, %73 : vector<64x32xf32>
    %c0_30 = arith.constant 0 : index
    %c0_31 = arith.constant 0 : index
    %75 = vector.load %arg9[%c0_30, %c0_31] : memref<1x32xf32, #tpu.memory_space<vmem>>, vector<1x32xf32>
    %c0_32 = arith.constant 0 : index
    %c0_33 = arith.constant 0 : index
    %76 = vector.load %arg10[%c0_32, %c0_33] : memref<1x32xf32, #tpu.memory_space<vmem>>, vector<1x32xf32>
    %c0_34 = arith.constant 0 : index
    %c0_35 = arith.constant 0 : index
    %77 = vector.load %arg11[%c0_34, %c0_35] : memref<32x96xf32, #tpu.memory_space<vmem>>, vector<32x96xf32>
    %c0_36 = arith.constant 0 : index
    %c0_37 = arith.constant 0 : index
    %78 = vector.load %arg12[%c0_36, %c0_37] : memref<32x32xf32, #tpu.memory_space<vmem>>, vector<32x32xf32>
    %c0_38 = arith.constant 0 : index
    %c0_39 = arith.constant 0 : index
    %79 = vector.load %arg13[%c0_38, %c0_39] : memref<1x32xf32, #tpu.memory_space<vmem>>, vector<1x32xf32>
    %c0_40 = arith.constant 0 : index
    %c0_41 = arith.constant 0 : index
    %80 = vector.load %arg3[%c0_40, %c0_41] : memref<64x64xf32, #tpu.memory_space<vmem>>, vector<64x64xf32>
    %cst_42 = arith.constant dense<0.000000e+00> : vector<64xf32>
    %81 = vector.multi_reduction <add>, %1, %cst_42 [1] : vector<64x32xf32> to vector<64xf32>
    %82 = vector.shape_cast %81 : vector<64xf32> to vector<64x1xf32>
    %cst_43 = arith.constant 3.200000e+01 : f32
    %83 = vector.broadcast %cst_43 : f32 to vector<64x1xf32>
    %84 = arith.divf %82, %83 : vector<64x1xf32>
    %85 = vector.broadcast %84 : vector<64x1xf32> to vector<64x32xf32>
    %86 = arith.subf %1, %85 : vector<64x32xf32>
    %87 = arith.mulf %86, %86 : vector<64x32xf32>
    %cst_44 = arith.constant dense<0.000000e+00> : vector<64xf32>
    %88 = vector.multi_reduction <add>, %87, %cst_44 [1] : vector<64x32xf32> to vector<64xf32>
    %89 = vector.shape_cast %88 : vector<64xf32> to vector<64x1xf32>
    %cst_45 = arith.constant 3.200000e+01 : f32
    %90 = vector.broadcast %cst_45 : f32 to vector<64x1xf32>
    %91 = arith.divf %89, %90 : vector<64x1xf32>
    %92 = vector.broadcast %84 : vector<64x1xf32> to vector<64x32xf32>
    %93 = arith.subf %1, %92 : vector<64x32xf32>
    %cst_46 = arith.constant 9.99999974E-6 : f32
    %94 = vector.broadcast %cst_46 : f32 to vector<64x1xf32>
    %95 = arith.addf %91, %94 : vector<64x1xf32>
    %96 = math.rsqrt %95 : vector<64x1xf32>
    %97 = vector.broadcast %96 : vector<64x1xf32> to vector<64x32xf32>
    %98 = arith.mulf %93, %97 : vector<64x32xf32>
    %99 = vector.broadcast %75 : vector<1x32xf32> to vector<64x32xf32>
    %100 = arith.mulf %98, %99 : vector<64x32xf32>
    %101 = vector.broadcast %76 : vector<1x32xf32> to vector<64x32xf32>
    %102 = arith.addf %100, %101 : vector<64x32xf32>
    %cst_47 = arith.constant dense<0.000000e+00> : vector<64x96xf32>
    %103 = tpu.matmul %102, %77, %cst_47 {dimension_numbers = #tpu.dot_dimension_numbers<[1], [0], [0], [1], [0, 0, 1, 1], [], []>} : vector<64x32xf32>, vector<32x96xf32>, vector<64x96xf32> -> vector<64x96xf32>
    %104 = vector.extract_strided_slice %103 {offsets = [0, 0], sizes = [64, 32], strides = [1, 1]} : vector<64x96xf32> to vector<64x32xf32>
    %cst_48 = arith.constant 2.500000e-01 : f32
    %105 = vector.broadcast %cst_48 : f32 to vector<64x32xf32>
    %106 = arith.mulf %104, %105 : vector<64x32xf32>
    %107 = vector.extract_strided_slice %103 {offsets = [0, 32], sizes = [64, 32], strides = [1, 1]} : vector<64x96xf32> to vector<64x32xf32>
    %108 = vector.extract_strided_slice %103 {offsets = [0, 64], sizes = [64, 32], strides = [1, 1]} : vector<64x96xf32> to vector<64x32xf32>
    %109 = vector.extract_strided_slice %106 {offsets = [0, 0], sizes = [64, 16], strides = [1, 1]} : vector<64x32xf32> to vector<64x16xf32>
    %110 = vector.extract_strided_slice %107 {offsets = [0, 0], sizes = [64, 16], strides = [1, 1]} : vector<64x32xf32> to vector<64x16xf32>
    %cst_49 = arith.constant dense<0.000000e+00> : vector<64x64xf32>
    %111 = tpu.matmul %109, %110, %cst_49 {dimension_numbers = #tpu.dot_dimension_numbers<[1], [1], [0], [0], [0, 0, 1, 0], [], []>} : vector<64x16xf32>, vector<64x16xf32>, vector<64x64xf32> -> vector<64x64xf32>
    %112 = arith.addf %111, %80 : vector<64x64xf32>
    %cst_50 = arith.constant dense<0xFF800000> : vector<64xf32>
    %113 = vector.multi_reduction <maximumf>, %112, %cst_50 [1] : vector<64x64xf32> to vector<64xf32>
    %114 = vector.shape_cast %113 : vector<64xf32> to vector<64x1xf32>
    %115 = vector.broadcast %114 : vector<64x1xf32> to vector<64x64xf32>
    %116 = arith.subf %112, %115 : vector<64x64xf32>
    %117 = math.exp %116 : vector<64x64xf32>
    %cst_51 = arith.constant dense<0.000000e+00> : vector<64xf32>
    %118 = vector.multi_reduction <add>, %117, %cst_51 [1] : vector<64x64xf32> to vector<64xf32>
    %119 = vector.shape_cast %118 : vector<64xf32> to vector<64x1xf32>
    %120 = tpu.reciprocal %119 {approx = true} : vector<64x1xf32> -> vector<64x1xf32>
    %121 = vector.broadcast %120 : vector<64x1xf32> to vector<64x64xf32>
    %122 = arith.mulf %117, %121 : vector<64x64xf32>
    %123 = vector.extract_strided_slice %108 {offsets = [0, 0], sizes = [64, 16], strides = [1, 1]} : vector<64x32xf32> to vector<64x16xf32>
    %cst_52 = arith.constant dense<0.000000e+00> : vector<64x16xf32>
    %124 = tpu.matmul %122, %123, %cst_52 {dimension_numbers = #tpu.dot_dimension_numbers<[1], [0], [0], [1], [0, 0, 1, 1], [], []>} : vector<64x64xf32>, vector<64x16xf32>, vector<64x16xf32> -> vector<64x16xf32>
    %125 = vector.extract_strided_slice %78 {offsets = [0, 0], sizes = [16, 32], strides = [1, 1]} : vector<32x32xf32> to vector<16x32xf32>
    %cst_53 = arith.constant dense<0.000000e+00> : vector<64x32xf32>
    %126 = tpu.matmul %124, %125, %cst_53 {dimension_numbers = #tpu.dot_dimension_numbers<[1], [0], [0], [1], [0, 0, 1, 1], [], []>} : vector<64x16xf32>, vector<16x32xf32>, vector<64x32xf32> -> vector<64x32xf32>
    %127 = vector.extract_strided_slice %106 {offsets = [0, 16], sizes = [64, 16], strides = [1, 1]} : vector<64x32xf32> to vector<64x16xf32>
    %128 = vector.extract_strided_slice %107 {offsets = [0, 16], sizes = [64, 16], strides = [1, 1]} : vector<64x32xf32> to vector<64x16xf32>
    %cst_54 = arith.constant dense<0.000000e+00> : vector<64x64xf32>
    %129 = tpu.matmul %127, %128, %cst_54 {dimension_numbers = #tpu.dot_dimension_numbers<[1], [1], [0], [0], [0, 0, 1, 0], [], []>} : vector<64x16xf32>, vector<64x16xf32>, vector<64x64xf32> -> vector<64x64xf32>
    %130 = arith.addf %129, %80 : vector<64x64xf32>
    %cst_55 = arith.constant dense<0xFF800000> : vector<64xf32>
    %131 = vector.multi_reduction <maximumf>, %130, %cst_55 [1] : vector<64x64xf32> to vector<64xf32>
    %132 = vector.shape_cast %131 : vector<64xf32> to vector<64x1xf32>
    %133 = vector.broadcast %132 : vector<64x1xf32> to vector<64x64xf32>
    %134 = arith.subf %130, %133 : vector<64x64xf32>
    %135 = math.exp %134 : vector<64x64xf32>
    %cst_56 = arith.constant dense<0.000000e+00> : vector<64xf32>
    %136 = vector.multi_reduction <add>, %135, %cst_56 [1] : vector<64x64xf32> to vector<64xf32>
    %137 = vector.shape_cast %136 : vector<64xf32> to vector<64x1xf32>
    %138 = tpu.reciprocal %137 {approx = true} : vector<64x1xf32> -> vector<64x1xf32>
    %139 = vector.broadcast %138 : vector<64x1xf32> to vector<64x64xf32>
    %140 = arith.mulf %135, %139 : vector<64x64xf32>
    %141 = vector.extract_strided_slice %108 {offsets = [0, 16], sizes = [64, 16], strides = [1, 1]} : vector<64x32xf32> to vector<64x16xf32>
    %cst_57 = arith.constant dense<0.000000e+00> : vector<64x16xf32>
    %142 = tpu.matmul %140, %141, %cst_57 {dimension_numbers = #tpu.dot_dimension_numbers<[1], [0], [0], [1], [0, 0, 1, 1], [], []>} : vector<64x64xf32>, vector<64x16xf32>, vector<64x16xf32> -> vector<64x16xf32>
    %143 = vector.extract_strided_slice %78 {offsets = [16, 0], sizes = [16, 32], strides = [1, 1]} : vector<32x32xf32> to vector<16x32xf32>
    %cst_58 = arith.constant dense<0.000000e+00> : vector<64x32xf32>
    %144 = tpu.matmul %142, %143, %cst_58 {dimension_numbers = #tpu.dot_dimension_numbers<[1], [0], [0], [1], [0, 0, 1, 1], [], []>} : vector<64x16xf32>, vector<16x32xf32>, vector<64x32xf32> -> vector<64x32xf32>
    %145 = arith.addf %126, %144 : vector<64x32xf32>
    %146 = vector.broadcast %79 : vector<1x32xf32> to vector<64x32xf32>
    %147 = arith.addf %145, %146 : vector<64x32xf32>
    %c0_59 = arith.constant 0 : index
    %c0_60 = arith.constant 0 : index
    %148 = vector.load %arg14[%c0_59, %c0_60] : memref<32x32xf32, #tpu.memory_space<vmem>>, vector<32x32xf32>
    %cst_61 = arith.constant dense<0.000000e+00> : vector<64x32xf32>
    %149 = tpu.matmul %74, %148, %cst_61 {dimension_numbers = #tpu.dot_dimension_numbers<[1], [0], [0], [1], [0, 0, 1, 1], [], []>} : vector<64x32xf32>, vector<32x32xf32>, vector<64x32xf32> -> vector<64x32xf32>
    %c0_62 = arith.constant 0 : index
    %c0_63 = arith.constant 0 : index
    %150 = vector.load %arg15[%c0_62, %c0_63] : memref<32x32xf32, #tpu.memory_space<vmem>>, vector<32x32xf32>
    %cst_64 = arith.constant dense<0.000000e+00> : vector<64x32xf32>
    %151 = tpu.matmul %147, %150, %cst_64 {dimension_numbers = #tpu.dot_dimension_numbers<[1], [0], [0], [1], [0, 0, 1, 1], [], []>} : vector<64x32xf32>, vector<32x32xf32>, vector<64x32xf32> -> vector<64x32xf32>
    %152 = arith.addf %149, %151 : vector<64x32xf32>
    %c0_65 = arith.constant 0 : index
    %c0_66 = arith.constant 0 : index
    %153 = vector.load %arg16[%c0_65, %c0_66] : memref<1x32xf32, #tpu.memory_space<vmem>>, vector<1x32xf32>
    %154 = vector.broadcast %153 : vector<1x32xf32> to vector<64x32xf32>
    %155 = arith.addf %152, %154 : vector<64x32xf32>
    %156 = arith.addf %155, %1 : vector<64x32xf32>
    %c0_67 = arith.constant 0 : index
    %c0_68 = arith.constant 0 : index
    %157 = vector.load %arg17[%c0_67, %c0_68] : memref<1x32xf32, #tpu.memory_space<vmem>>, vector<1x32xf32>
    %c0_69 = arith.constant 0 : index
    %c0_70 = arith.constant 0 : index
    %158 = vector.load %arg18[%c0_69, %c0_70] : memref<1x32xf32, #tpu.memory_space<vmem>>, vector<1x32xf32>
    %cst_71 = arith.constant dense<0.000000e+00> : vector<64xf32>
    %159 = vector.multi_reduction <add>, %156, %cst_71 [1] : vector<64x32xf32> to vector<64xf32>
    %160 = vector.shape_cast %159 : vector<64xf32> to vector<64x1xf32>
    %cst_72 = arith.constant 3.200000e+01 : f32
    %161 = vector.broadcast %cst_72 : f32 to vector<64x1xf32>
    %162 = arith.divf %160, %161 : vector<64x1xf32>
    %163 = vector.broadcast %162 : vector<64x1xf32> to vector<64x32xf32>
    %164 = arith.subf %156, %163 : vector<64x32xf32>
    %165 = arith.mulf %164, %164 : vector<64x32xf32>
    %cst_73 = arith.constant dense<0.000000e+00> : vector<64xf32>
    %166 = vector.multi_reduction <add>, %165, %cst_73 [1] : vector<64x32xf32> to vector<64xf32>
    %167 = vector.shape_cast %166 : vector<64xf32> to vector<64x1xf32>
    %cst_74 = arith.constant 3.200000e+01 : f32
    %168 = vector.broadcast %cst_74 : f32 to vector<64x1xf32>
    %169 = arith.divf %167, %168 : vector<64x1xf32>
    %170 = vector.broadcast %162 : vector<64x1xf32> to vector<64x32xf32>
    %171 = arith.subf %156, %170 : vector<64x32xf32>
    %cst_75 = arith.constant 9.99999974E-6 : f32
    %172 = vector.broadcast %cst_75 : f32 to vector<64x1xf32>
    %173 = arith.addf %169, %172 : vector<64x1xf32>
    %174 = math.rsqrt %173 : vector<64x1xf32>
    %175 = vector.broadcast %174 : vector<64x1xf32> to vector<64x32xf32>
    %176 = arith.mulf %171, %175 : vector<64x32xf32>
    %177 = vector.broadcast %157 : vector<1x32xf32> to vector<64x32xf32>
    %178 = arith.mulf %176, %177 : vector<64x32xf32>
    %179 = vector.broadcast %158 : vector<1x32xf32> to vector<64x32xf32>
    %180 = arith.addf %178, %179 : vector<64x32xf32>
    %c0_76 = arith.constant 0 : index
    %c0_77 = arith.constant 0 : index
    %181 = vector.load %arg19[%c0_76, %c0_77] : memref<32x64xf32, #tpu.memory_space<vmem>>, vector<32x64xf32>
    %cst_78 = arith.constant dense<0.000000e+00> : vector<64x64xf32>
    %182 = tpu.matmul %180, %181, %cst_78 {dimension_numbers = #tpu.dot_dimension_numbers<[1], [0], [0], [1], [0, 0, 1, 1], [], []>} : vector<64x32xf32>, vector<32x64xf32>, vector<64x64xf32> -> vector<64x64xf32>
    %c0_79 = arith.constant 0 : index
    %c0_80 = arith.constant 0 : index
    %183 = vector.load %arg20[%c0_79, %c0_80] : memref<1x64xf32, #tpu.memory_space<vmem>>, vector<1x64xf32>
    %184 = vector.broadcast %183 : vector<1x64xf32> to vector<64x64xf32>
    %185 = arith.addf %182, %184 : vector<64x64xf32>
    %cst_81 = arith.constant 5.000000e-01 : f32
    %186 = vector.broadcast %cst_81 : f32 to vector<64x64xf32>
    %187 = arith.mulf %186, %185 : vector<64x64xf32>
    %cst_82 = arith.constant 4.471500e-02 : f32
    %188 = vector.broadcast %cst_82 : f32 to vector<64x64xf32>
    %189 = arith.mulf %188, %185 : vector<64x64xf32>
    %190 = arith.mulf %189, %185 : vector<64x64xf32>
    %191 = arith.mulf %190, %185 : vector<64x64xf32>
    %192 = arith.addf %185, %191 : vector<64x64xf32>
    %cst_83 = arith.constant 0.797884583 : f32
    %193 = vector.broadcast %cst_83 : f32 to vector<64x64xf32>
    %194 = arith.mulf %193, %192 : vector<64x64xf32>
    %195 = math.tanh %194 : vector<64x64xf32>
    %cst_84 = arith.constant 1.000000e+00 : f32
    %196 = vector.broadcast %cst_84 : f32 to vector<64x64xf32>
    %197 = arith.addf %196, %195 : vector<64x64xf32>
    %198 = arith.mulf %187, %197 : vector<64x64xf32>
    %c0_85 = arith.constant 0 : index
    %c0_86 = arith.constant 0 : index
    %199 = vector.load %arg21[%c0_85, %c0_86] : memref<64x32xf32, #tpu.memory_space<vmem>>, vector<64x32xf32>
    %cst_87 = arith.constant dense<0.000000e+00> : vector<64x32xf32>
    %200 = tpu.matmul %198, %199, %cst_87 {dimension_numbers = #tpu.dot_dimension_numbers<[1], [0], [0], [1], [0, 0, 1, 1], [], []>} : vector<64x64xf32>, vector<64x32xf32>, vector<64x32xf32> -> vector<64x32xf32>
    %c0_88 = arith.constant 0 : index
    %c0_89 = arith.constant 0 : index
    %201 = vector.load %arg22[%c0_88, %c0_89] : memref<1x32xf32, #tpu.memory_space<vmem>>, vector<1x32xf32>
    %202 = vector.broadcast %201 : vector<1x32xf32> to vector<64x32xf32>
    %203 = arith.addf %200, %202 : vector<64x32xf32>
    %204 = arith.addf %180, %203 : vector<64x32xf32>
    %205 = arith.addf %204, %156 : vector<64x32xf32>
    %c0_90 = arith.constant 0 : index
    %c0_91 = arith.constant 0 : index
    %c0_92 = arith.constant 0 : index
    %206 = vector.load %arg23[%c0_90, %c0_91, %c0_92] : memref<1x64x32xf32, #tpu.memory_space<vmem>>, vector<1x64x32xf32>
    %207 = vector.shape_cast %206 : vector<1x64x32xf32> to vector<64x32xf32>
    %208 = vector.shape_cast %205 : vector<64x32xf32> to vector<1x64x32xf32>
    tpu.vector_store %arg23[%c0_90, %c0_91, %c0_92], %208 {strides = array<i32>} : memref<1x64x32xf32, #tpu.memory_space<vmem>>, vector<1x64x32xf32>,
    return
  }
  func.func @transform_0(%arg0: i32) -> (i32, i32, i32) {
    %c0_i32 = arith.constant 0 : i32
    %c0_i32_0 = arith.constant 0 : i32
    %c0_i32_1 = arith.constant 0 : i32
    return %arg0, %c0_i32, %c0_i32_0 : i32, i32, i32
  }
  func.func @transform_1(%arg0: i32) -> (i32, i32) {
    %c0_i32 = arith.constant 0 : i32
    %c0_i32_0 = arith.constant 0 : i32
    %c0_i32_1 = arith.constant 0 : i32
    return %c0_i32, %c0_i32_0 : i32, i32
  }
  func.func @transform_2(%arg0: i32) -> (i32, i32) {
    %c0_i32 = arith.constant 0 : i32
    %c0_i32_0 = arith.constant 0 : i32
    %c0_i32_1 = arith.constant 0 : i32
    return %c0_i32, %c0_i32_0 : i32, i32
  }
  func.func @transform_3(%arg0: i32) -> (i32, i32) {
    %c0_i32 = arith.constant 0 : i32
    %c0_i32_0 = arith.constant 0 : i32
    %c0_i32_1 = arith.constant 0 : i32
    return %c0_i32, %c0_i32_0 : i32, i32
  }
  func.func @transform_4(%arg0: i32) -> (i32, i32) {
    %c0_i32 = arith.constant 0 : i32
    %c0_i32_0 = arith.constant 0 : i32
    %c0_i32_1 = arith.constant 0 : i32
    return %c0_i32, %c0_i32_0 : i32, i32
  }
  func.func @transform_5(%arg0: i32) -> (i32, i32) {
    %c0_i32 = arith.constant 0 : i32
    %c0_i32_0 = arith.constant 0 : i32
    %c0_i32_1 = arith.constant 0 : i32
    return %c0_i32, %c0_i32_0 : i32, i32
  }
  func.func @transform_6(%arg0: i32) -> (i32, i32) {
    %c0_i32 = arith.constant 0 : i32
    %c0_i32_0 = arith.constant 0 : i32
    %c0_i32_1 = arith.constant 0 : i32
    return %c0_i32, %c0_i32_0 : i32, i32
  }
  func.func @transform_7(%arg0: i32) -> (i32, i32) {
    %c0_i32 = arith.constant 0 : i32
    %c0_i32_0 = arith.constant 0 : i32
    %c0_i32_1 = arith.constant 0 : i32
    return %c0_i32, %c0_i32_0 : i32, i32
  }
  func.func @transform_8(%arg0: i32) -> (i32, i32) {
    %c0_i32 = arith.constant 0 : i32
    %c0_i32_0 = arith.constant 0 : i32
    %c0_i32_1 = arith.constant 0 : i32
    return %c0_i32, %c0_i32_0 : i32, i32
  }
  func.func @transform_9(%arg0: i32) -> (i32, i32) {
    %c0_i32 = arith.constant 0 : i32
    %c0_i32_0 = arith.constant 0 : i32
    %c0_i32_1 = arith.constant 0 : i32
    return %c0_i32, %c0_i32_0 : i32, i32
  }
  func.func @transform_10(%arg0: i32) -> (i32, i32) {
    %c0_i32 = arith.constant 0 : i32
    %c0_i32_0 = arith.constant 0 : i32
    %c0_i32_1 = arith.constant 0 : i32
    return %c0_i32, %c0_i32_0 : i32, i32
  }
  func.func @transform_11(%arg0: i32) -> (i32, i32) {
    %c0_i32 = arith.constant 0 : i32
    %c0_i32_0 = arith.constant 0 : i32
    %c0_i32_1 = arith.constant 0 : i32
    return %c0_i32, %c0_i32_0 : i32, i32
  }
  func.func @transform_12(%arg0: i32) -> (i32, i32) {
    %c0_i32 = arith.constant 0 : i32
    %c0_i32_0 = arith.constant 0 : i32
    %c0_i32_1 = arith.constant 0 : i32
    return %c0_i32, %c0_i32_0 : i32, i32
  }
  func.func @transform_13(%arg0: i32) -> (i32, i32) {
    %c0_i32 = arith.constant 0 : i32
    %c0_i32_0 = arith.constant 0 : i32
    %c0_i32_1 = arith.constant 0 : i32
    return %c0_i32, %c0_i32_0 : i32, i32
  }
  func.func @transform_14(%arg0: i32) -> (i32, i32) {
    %c0_i32 = arith.constant 0 : i32
    %c0_i32_0 = arith.constant 0 : i32
    %c0_i32_1 = arith.constant 0 : i32
    return %c0_i32, %c0_i32_0 : i32, i32
  }
  func.func @transform_15(%arg0: i32) -> (i32, i32) {
    %c0_i32 = arith.constant 0 : i32
    %c0_i32_0 = arith.constant 0 : i32
    %c0_i32_1 = arith.constant 0 : i32
    return %c0_i32, %c0_i32_0 : i32, i32
  }
  func.func @transform_16(%arg0: i32) -> (i32, i32) {
    %c0_i32 = arith.constant 0 : i32
    %c0_i32_0 = arith.constant 0 : i32
    %c0_i32_1 = arith.constant 0 : i32
    return %c0_i32, %c0_i32_0 : i32, i32
  }
  func.func @transform_17(%arg0: i32) -> (i32, i32) {
    %c0_i32 = arith.constant 0 : i32
    %c0_i32_0 = arith.constant 0 : i32
    %c0_i32_1 = arith.constant 0 : i32
    return %c0_i32, %c0_i32_0 : i32, i32
  }
  func.func @transform_18(%arg0: i32) -> (i32, i32) {
    %c0_i32 = arith.constant 0 : i32
    %c0_i32_0 = arith.constant 0 : i32
    %c0_i32_1 = arith.constant 0 : i32
    return %c0_i32, %c0_i32_0 : i32, i32
  }
  func.func @transform_19(%arg0: i32) -> (i32, i32) {
    %c0_i32 = arith.constant 0 : i32
    %c0_i32_0 = arith.constant 0 : i32
    %c0_i32_1 = arith.constant 0 : i32
    return %c0_i32, %c0_i32_0 : i32, i32
  }
  func.func @transform_20(%arg0: i32) -> (i32, i32) {
    %c0_i32 = arith.constant 0 : i32
    %c0_i32_0 = arith.constant 0 : i32
    %c0_i32_1 = arith.constant 0 : i32
    return %c0_i32, %c0_i32_0 : i32, i32
  }
  func.func @transform_21(%arg0: i32) -> (i32, i32) {
    %c0_i32 = arith.constant 0 : i32
    %c0_i32_0 = arith.constant 0 : i32
    %c0_i32_1 = arith.constant 0 : i32
    return %c0_i32, %c0_i32_0 : i32, i32
  }
  func.func @transform_22(%arg0: i32) -> (i32, i32, i32) {
    %c0_i32 = arith.constant 0 : i32
    %c0_i32_0 = arith.constant 0 : i32
    %c0_i32_1 = arith.constant 0 : i32
    return %arg0, %c0_i32, %c0_i32_0 : i32, i32, i32
  }
}

</mosaic_0001>

<bundles_post_ra>
// kernel: transformer_encoder.1
= control target key start
LH: loop header
LB: loop body
LE: loop exit
PB: predicated region body
PF: predicated region fallthrough
CT: control target
= control target key end

     0   :  { %s7079_s0 = inlined_call_operand.vmem [shape: f32[2,64,32], index: 0, kind: input, shape index: {}]   ;;  %s7080_s1 = inlined_call_operand.vmem [shape: f32[64,64], index: 1, kind: input, shape index: {}]   ;;  %s7081_s2 = inlined_call_operand.vmem [shape: f32[64,64], index: 2, kind: input, shape index: {}]   ;;  %s7082_s3 = inlined_call_operand.vmem [shape: f32[1,32], index: 3, kind: input, shape index: {}]   ;;  %s7083_s4 = inlined_call_operand.vmem [shape: f32[1,32], index: 4, kind: input, shape index: {}]   ;;  %s7084_s5 = inlined_call_operand.vmem [shape: f32[32,96], index: 5, kind: input, shape index: {}]   ;;  %s7085_s6 = inlined_call_operand.vmem [shape: f32[32,32], index: 6, kind: input, shape index: {}]   ;;  %s7086_s7 = inlined_call_operand.vmem [shape: f32[1,32], index: 7, kind: input, shape index: {}]   ;;  %s7087_s8 = inlined_call_operand.vmem [shape: f32[1,32], index: 8, kind: input, shape index: {}]   ;;  %s7088_s9 = inlined_call_operand.vmem [shape: f32[1,32], index: 9, kind: input, shape index: {}]   ;;  %s7089_s10 = inlined_call_operand.vmem [shape: f32[32,96], index: 10, kind: input, shape index: {}]   ;;  %s7090_s11 = inlined_call_operand.vmem [shape: f32[32,32], index: 11, kind: input, shape index: {}]   ;;  %s7091_s12 = inlined_call_operand.vmem [shape: f32[1,32], index: 12, kind: input, shape index: {}]   ;;  %s7092_s13 = inlined_call_operand.vmem [shape: f32[32,32], index: 13, kind: input, shape index: {}]   ;;  %s7093_s14 = inlined_call_operand.vmem [shape: f32[32,32], index: 14, kind: input, shape index: {}]   ;;  %s7094_s15 = inlined_call_operand.vmem [shape: f32[1,32], index: 15, kind: input, shape index: {}]   ;;  %s7095_s16 = inlined_call_operand.vmem [shape: f32[1,32], index: 16, kind: input, shape index: {}]   ;;  %s7096_s17 = inlined_call_operand.vmem [shape: f32[1,32], index: 17, kind: input, shape index: {}]   ;;  %s7097_s18 = inlined_call_operand.vmem [shape: f32[32,64], index: 18, kind: input, shape index: {}]   ;;  %s7098_s19 = inlined_call_operand.vmem [shape: f32[1,64], index: 19, kind: input, shape index: {}]   ;;  %s7099_s20 = inlined_call_operand.vmem [shape: f32[64,32], index: 20, kind: input, shape index: {}]   ;;  %s7100_s21 = inlined_call_operand.vmem [shape: f32[1,32], index: 21, kind: input, shape index: {}]   ;;  %s7101_s22 = inlined_call_operand.vmem [shape: f32[2,64,32], index: 22, kind: output, shape index: {}]  }
   0x1   :  { %7111 = sst [smem:[#allocation2_spill]] %s7079_s0 }
   0x2   :  { %7112 = sst [smem:[#allocation3_spill]] %s7080_s1 }
   0x3   :  { %7113 = sst [smem:[#allocation4_spill]] %s7081_s2 }
   0x4   :  { %7114 = sst [smem:[#allocation5_spill]] %s7082_s3  ;;  %s5819_s3 = smov 0  }
   0x5   :  { %7115 = sst [smem:[#allocation6_spill]] %s7083_s4 }
   0x6   :  { %7116 = sst [smem:[#allocation7_spill]] %s7084_s5 }
   0x7   :  { %7117 = sst [smem:[#allocation8_spill]] %s7085_s6 }
   0x8   :  { %7118 = sst [smem:[#allocation9_spill]] %s7087_s8 }
   0x9   :  { %7119 = sst [smem:[#allocation10_spill]] %s7088_s9 }
   0xa LB: > { %s4210_s28 = sadd.s32 4294967295, %s5697_s3   ;;  %p4214_p0 = scmp.ge.s32.totalorder %s5697_s3, 1  ;;  %s5697_s3 = sphi %s5819_s3, %s32_s3  }
   0xb   : > { %p612_p1 = scmp.lt.s32.totalorder %s5697_s3, 3 }
   0xd   : > { %p613_p2 = pnand %p4214_p0, %p612_p1 }
   0xe   : > { %p674_p3 = scmp.lt.s32.totalorder (!%p613_p2), %s4210_s28, 1  ;;  %vm711_vm0 = vcmask (!%p613_p2), 261120   ;;  %s7120_s0 = sld [smem:[#allocation2_spill]] (!%p613_p2)  ;;  %vm1006_vm1 = vcmask (!%p613_p2), 130048   ;;  %vm1152_vm3 = vcmask (!%p613_p2), 523264  }
   0xf   : > { %616 = sbr.rel (%p613_p2) target bundleno = 4304 (0x10d0), region = 108  ;;  %s7121_s24 = sld [smem:[#allocation7_spill]] (!%p613_p2)  ;;  %vm5973_vm2 = vmpackc.low (!%p613_p2), %vm1006_vm1, %vm1006_vm1 }
  0x10   : > { %s7122_s1 = sld [smem:[#allocation5_spill]] (!%p613_p2)  ;;  %s7123_s25 = sld [smem:[#allocation6_spill]] (!%p613_p2) }
  0x11   : > { %s5699_s26 = smov (!%p613_p2), 96   ;;  %s7126_s30 = sld [smem:[#allocation3_spill]] (!%p613_p2) }
  0x12   : > { %s5700_s2 = smov (!%p613_p2), 64   ;;  %s5701_s27 = smov (!%p613_p2), 80  }
  0x13   : > { %s7109_s4 = smov (!%p613_p2), 112   ;;  %s7127_s8 = sld [smem:[#allocation9_spill]] (!%p613_p2) }
  0x14   : > { %s7128_s9 = sld [smem:[#allocation10_spill]] (!%p613_p2) }
  0x15   : > { %v694_v56 = vld [vmem:[%s7121_s24] sm:$0xff] (!%p613_p2)  ;;  %v695_v57 = vld [vmem:[%s7121_s24 + $0x8] sm:$0xff] (!%p613_p2)  ;;  %v696_v59 = vld [vmem:[%s7121_s24 + $0x10] sm:$0xff] (!%p613_p2) }
  0x16   : > { %s7135_s28 = smov (!%p674_p3, %s4210_s28), 1  ;;  %v5070_v58 = vpack.c.bf16 %v695_v57, %v694_v56  ;;  %v697_v60 = vld [vmem:[%s7121_s24 + $0x18] sm:$0xff] }
  0x17   : > { %s7106_s29 = sshll.u32 %s7135_s28, 6  ;;  %v5074_v61 = vpack.c.bf16 %v697_v60, %v696_v59 }
  0x18   : > { %s5835_s23 = scalar_lea.vmem %s7120_s0, %s7106_s29  ;;  %5071 = vmatprep.subr.bf16.mxu0 %v5070_v58  ;;  %s7130_s29 = sld [smem:[#allocation8_spill]] }
  0x19   : > { %v684_v0 = vld [vmem:[%s5835_s23] sm:$0xff]  ;;  %v686_v1 = vld [vmem:[%s5835_s23 + $0x10] sm:$0xff]  ;;  %v685_v2 = vld [vmem:[%s5835_s23 + $0x8] sm:$0xff]  ;;  %5073 = vmatpush3.bf16.msra.mxu0 %v5070_v58 }
  0x1a   : > { %v712_v3 = vsel %vm711_vm0, %v684_v0, 0.0  ;;  %v718_v4 = vsel %vm711_vm0, %v686_v1, 0.0  ;;  %v687_v5 = vld [vmem:[%s5835_s23 + $0x18] sm:$0xff]  ;;  %v715_v6 = vsel %vm711_vm0, %v685_v2, 0.0  ;;  %v688_v8 = vld [vmem:[%s5835_s23 + $0x20] sm:$0xff]  ;;  %v689_v9 = vld [vmem:[%s5835_s23 + $0x28] sm:$0xff]  ;;  %5075 = vmatprep.subr.bf16.mxu0 %v5074_v61 }
  0x1b   : > { %713 = vadd.xlane.f32.xlu0 %v712_v3  ;;  %719 = vadd.xlane.f32.xlu1 %v718_v4  ;;  %v721_v7 = vsel %vm711_vm0, %v687_v5, 0.0  ;;  %v724_v10 = vsel %vm711_vm0, %v688_v8, 0.0  ;;  %v727_v11 = vsel %vm711_vm0, %v689_v9, 0.0  ;;  %v690_v12 = vld [vmem:[%s5835_s23 + $0x30] sm:$0xff]  ;;  %v691_v13 = vld [vmem:[%s5835_s23 + $0x38] sm:$0xff] }
  0x1c   : > { %v730_v14 = vsel %vm711_vm0, %v690_v12, 0.0  ;;  %v733_v15 = vsel %vm711_vm0, %v691_v13, 0.0 }
  0x1d   : > { %5077 = vmatpush3.bf16.msra.mxu0 %v5074_v61 }
  0x1f   : > { %716 = vadd.xlane.f32.xlu0 %v715_v6  ;;  %722 = vadd.xlane.f32.xlu1 %v721_v7 }
  0x23   : > { %725 = vadd.xlane.f32.xlu0 %v724_v10  ;;  %728 = vadd.xlane.f32.xlu1 %v727_v11 }
  0x27   : > { %731 = vadd.xlane.f32.xlu0 %v730_v14  ;;  %734 = vadd.xlane.f32.xlu1 %v733_v15 }
  0xa8   : > { %v714_v16 = vpop.xlane.xlu0 %713  ;;  %v720_v17 = vpop.xlane.xlu1 %719 }
  0xa9   : > { %v737_v18 = vmul.f32 0.03125, %v714_v16  ;;  %v739_v19 = vmul.f32 0.03125, %v720_v17 }
  0xab   : > { %v5853_v20 = vsub.f32 %v684_v0, %v737_v18  ;;  %v5855_v21 = vsub.f32 %v686_v1, %v739_v19 }
  0xac   : > { %v717_v22 = vpop.xlane.xlu0 %716  ;;  %v723_v23 = vpop.xlane.xlu1 %722 }
  0xad   : > { %v738_v24 = vmul.f32 0.03125, %v717_v22  ;;  %v740_v25 = vmul.f32 0.03125, %v723_v23  ;;  %v753_v26 = vmul.f32 %v5853_v20, %v5853_v20  ;;  %v755_v27 = vmul.f32 %v5855_v21, %v5855_v21  ;;  %v4219_v22 = vld [vmem:[%s7122_s1] ss:$0 sm:$0xff] }
  0xaf   : > { %v5861_v28 = vsub.f32 %v685_v2, %v738_v24  ;;  %v5863_v29 = vsub.f32 %v687_v5, %v740_v25  ;;  %v761_v30 = vsel %vm711_vm0, %v753_v26, 0.0  ;;  %v767_v33 = vsel %vm711_vm0, %v755_v27, 0.0  ;;  %v4220_v26 = vld [vmem:[%s7123_s25] ss:$0 sm:$0xff]  ;;  %s7129_s25 = sld [smem:[#allocation4_spill]] }
  0xb0   : > { %762 = vadd.xlane.f32.xlu0 %v761_v30  ;;  %v726_v31 = vpop.xlane.xlu0 %725  ;;  %v729_v32 = vpop.xlane.xlu1 %728 }
  0xb1   : > { %v741_v34 = vmul.f32 0.03125, %v726_v31  ;;  %v742_v35 = vmul.f32 0.03125, %v729_v32  ;;  %v754_v36 = vmul.f32 %v5861_v28, %v5861_v28  ;;  %v756_v37 = vmul.f32 %v5863_v29, %v5863_v29 }
  0xb3   : > { %v5871_v38 = vsub.f32 %v688_v8, %v741_v34  ;;  %v5873_v39 = vsub.f32 %v689_v9, %v742_v35  ;;  %v764_v40 = vsel %vm711_vm0, %v754_v36, 0.0  ;;  %v770_v43 = vsel %vm711_vm0, %v756_v37, 0.0 }
  0xb4   : > { %768 = vadd.xlane.f32.xlu0 %v767_v33  ;;  %765 = vadd.xlane.f32.xlu1 %v764_v40  ;;  %v732_v41 = vpop.xlane.xlu0 %731  ;;  %v735_v42 = vpop.xlane.xlu1 %734 }
  0xb5   : > { %v743_v44 = vmul.f32 0.03125, %v732_v41  ;;  %v744_v45 = vmul.f32 0.03125, %v735_v42  ;;  %v757_v46 = vmul.f32 %v5871_v38, %v5871_v38  ;;  %v758_v47 = vmul.f32 %v5873_v39, %v5873_v39 }
  0xb7   : > { %v5881_v48 = vsub.f32 %v690_v12, %v743_v44  ;;  %v5883_v49 = vsub.f32 %v691_v13, %v744_v45  ;;  %v773_v50 = vsel %vm711_vm0, %v757_v46, 0.0  ;;  %v776_v51 = vsel %vm711_vm0, %v758_v47, 0.0 }
  0xb8   : > { %771 = vadd.xlane.f32.xlu1 %v770_v43  ;;  %774 = vadd.xlane.f32.xlu0 %v773_v50 }
  0xb9   : > { %v759_v52 = vmul.f32 %v5881_v48, %v5881_v48  ;;  %v760_v53 = vmul.f32 %v5883_v49, %v5883_v49 }
  0xbb   : > { %v779_v54 = vsel %vm711_vm0, %v759_v52, 0.0  ;;  %v782_v55 = vsel %vm711_vm0, %v760_v53, 0.0 }
  0xbc   : > { %777 = vadd.xlane.f32.xlu1 %v776_v51  ;;  %780 = vadd.xlane.f32.xlu0 %v779_v54 }
  0xc0   : > { %783 = vadd.xlane.f32.xlu1 %v782_v55 }
 0x13d   : > { %v763_v62 = vpop.xlane.xlu0 %762 }
 0x13e   : > { %v785_v63 = vmul.f32 0.03125, %v763_v62 }
 0x140   : > { %v793_v0 = vadd.f32 1e-05, %v785_v63 }
 0x141   : > { %v766_v1 = vpop.xlane.xlu1 %765  ;;  %v769_v2 = vpop.xlane.xlu0 %768 }
 0x142   : > { %5507 = vrsqrt.f32 %v793_v0  ;;  %v786_v3 = vmul.f32 0.03125, %v766_v1  ;;  %v787_v4 = vmul.f32 0.03125, %v769_v2 }
 0x144   : > { %v794_v5 = vadd.f32 1e-05, %v786_v3  ;;  %v795_v6 = vadd.f32 1e-05, %v787_v4 }
 0x145   : > { %v772_v7 = vpop.xlane.xlu1 %771  ;;  %v775_v8 = vpop.xlane.xlu0 %774 }
 0x146   : > { %5509 = vrsqrt.f32 %v794_v5  ;;  %v788_v9 = vmul.f32 0.03125, %v772_v7  ;;  %v789_v10 = vmul.f32 0.03125, %v775_v8 }
 0x147   : > { %5511 = vrsqrt.f32 %v795_v6 }
 0x148   : > { %v796_v11 = vadd.f32 1e-05, %v788_v9  ;;  %v797_v12 = vadd.f32 1e-05, %v789_v10 }
 0x149   : > { %v778_v13 = vpop.xlane.xlu1 %777  ;;  %v781_v14 = vpop.xlane.xlu0 %780 }
 0x14a   : > { %5513 = vrsqrt.f32 %v796_v11  ;;  %v790_v15 = vmul.f32 0.03125, %v778_v13  ;;  %v791_v16 = vmul.f32 0.03125, %v781_v14 }
 0x14b   : > { %5515 = vrsqrt.f32 %v797_v12 }
 0x14c   : > { %v5508_v17 = vpop.eup %5507  ;;  %v798_v18 = vadd.f32 1e-05, %v790_v15  ;;  %v799_v19 = vadd.f32 1e-05, %v791_v16 }
 0x14d   : > { %v784_v23 = vpop.xlane.xlu1 %783  ;;  %v5909_v24 = vmul.f32 %v5508_v17, %v5853_v20 }
 0x14e   : > { %5517 = vrsqrt.f32 %v798_v18  ;;  %v792_v25 = vmul.f32 0.03125, %v784_v23 }
 0x14f   : > { %5519 = vrsqrt.f32 %v799_v19  ;;  %v823_v27 = vmul.f32 %v4219_v22, %v5909_v24 }
 0x150   : > { %v5510_v30 = vpop.eup %5509  ;;  %v800_v31 = vadd.f32 1e-05, %v792_v25 }
 0x151   : > { %v5512_v32 = vpop.eup %5511  ;;  %v837_v33 = vadd.f32 %v4220_v26, %v823_v27  ;;  %v5916_v34 = vmul.f32 %v5510_v30, %v5861_v28 }
 0x152   : > { %5521 = vrsqrt.f32 %v800_v31  ;;  %v5919_v20 = vmul.f32 %v5512_v32, %v5855_v21 }
 0x153   : > { %4662 = vmatprep.mubr.msk.f32.mxu0 %vm711_vm0, %v837_v33  ;;  %v824_v35 = vmul.f32 %v4219_v22, %v5916_v34 }
 0x154   : > { %v5514_v36 = vpop.eup %5513  ;;  %v825_v37 = vmul.f32 %v4219_v22, %v5919_v20 }
 0x155   : > { %v5516_v40 = vpop.eup %5515  ;;  %v838_v41 = vadd.f32 %v4220_v26, %v824_v35  ;;  %v5925_v42 = vmul.f32 %v5514_v36, %v5863_v29  ;;  %v6024_v35 = vld [vmem:[%s7126_s30 + $0x8] sm:$0xff]  ;;  %v6029_v36 = vld [vmem:[%s7126_s30] sm:$0xff] }
 0x156   : > { %v839_v43 = vadd.f32 %v4220_v26, %v825_v37  ;;  %v5928_v28 = vmul.f32 %v5516_v40, %v5871_v38 }
 0x157   : > { %4663 = vmatmul.mubr.msk.f32.vlgmr.msra.gmra.mrb[0].mxu0 %vm711_vm0, %v838_v41  ;;  %v826_v21 = vmul.f32 %v4219_v22, %v5925_v42 }
 0x158   : > { %v5518_v44 = vpop.eup %5517  ;;  %4665 = vmatprep.mubr.msk.f32.mxu0 %vm711_vm0, %v839_v43  ;;  %v827_v45 = vmul.f32 %v4219_v22, %v5928_v28 }
 0x159   : > { %v5520_v46 = vpop.eup %5519  ;;  %v840_v47 = vadd.f32 %v4220_v26, %v826_v21  ;;  %v5935_v50 = vmul.f32 %v5518_v44, %v5873_v39  ;;  %v6036_v21 = vld [vmem:[%s7126_s30 + $0x18] sm:$0xff] }
 0x15a   : > { %v841_v29 = vadd.f32 %v4220_v26, %v827_v45  ;;  %v5938_v51 = vmul.f32 %v5520_v46, %v5881_v48 }
 0x15b   : > { %4666 = vmatmul.mubr.msk.f32.gmra.mrb[2].mxu0 %vm711_vm0, %v840_v47  ;;  %v828_v38 = vmul.f32 %v4219_v22, %v5935_v50 }
 0x15c   : > { %v5522_v52 = vpop.eup %5521  ;;  %4668 = vmatprep.mubr.msk.f32.mxu0 %vm711_vm0, %v841_v29  ;;  %v829_v53 = vmul.f32 %v4219_v22, %v5938_v51 }
 0x15d   : > { %v842_v54 = vadd.f32 %v4220_v26, %v828_v38  ;;  %v5945_v55 = vmul.f32 %v5522_v52, %v5883_v49  ;;  %v6044_v38 = vld [vmem:[%s7126_s30 + $0x10] sm:$0xff]  ;;  %v6049_v52 = vld [vmem:[%s7126_s30 + $0x28] sm:$0xff] }
 0x15e   : > { %v843_v56 = vadd.f32 %v4220_v26, %v829_v53 }
 0x15f   : > { %4669 = vmatmul.mubr.msk.f32.gmra.mrb[4].mxu0 %vm711_vm0, %v842_v54  ;;  %v830_v39 = vmul.f32 %v4219_v22, %v5945_v55 }
 0x160   : > { %4671 = vmatprep.mubr.msk.f32.mxu0 %vm711_vm0, %v843_v56 }
 0x161   : > { %v844_v48 = vadd.f32 %v4220_v26, %v830_v39 }
 0x163   : > { %4672 = vmatmul.mubr.msk.f32.gmra.mrb[6].mxu0 %vm711_vm0, %v844_v48 }
 0x22a   : > { %v4664_v57 = vpop.f32.mrb[0].mxu0 }
 0x22b   : > { %v935_v58 = vpop.f32.mrb[1].mxu0  ;;  %v5993_v25 = vmul.f32 0.25, %v4664_v57 }
 0x22c   : > { %v5951_v59 = vpack.i.bf16 %v4664_v57, %v935_v58  ;;  %v5953_v60 = vmul.f32 0.25, %v935_v58  ;;  %v6057_v57 = vld [vmem:[%s7126_s30 + $0x20] sm:$0xff]  ;;  %v6062_v58 = vld [vmem:[%s7126_s30 + $0x38] sm:$0xff] }
 0x22e   : > { %5348 = vrot.lane.b32.xlu0 %v5951_v59, %s5699_s26  ;;  %v4667_v49 = vpop.f32.mrb[2].mxu0  ;;  %4690 = vmatprep.mubr.msk.f32.mxu1 %vm1006_vm1, %v5953_v60 }
 0x22f   : > { %v945_v61 = vpop.f32.mrb[3].mxu0  ;;  %v6001_v27 = vmul.f32 0.25, %v4667_v49 }
 0x230   : > { %v5959_v62 = vpack.i.bf16 %v4667_v49, %v945_v61  ;;  %v5995_v26 = vmul.f32 0.25, %v945_v61 }
 0x232   : > { %5353 = vrot.lane.b32.xlu1 %v5959_v62, %s5699_s26  ;;  %v4670_v63 = vpop.f32.mrb[4].mxu0 }
 0x233   : > { %v955_v0 = vpop.f32.mrb[5].mxu0  ;;  %v6009_v31 = vmul.f32 0.25, %v4670_v63 }
 0x234   : > { %v5963_v1 = vpack.i.bf16 %v4670_v63, %v955_v0  ;;  %v6003_v30 = vmul.f32 0.25, %v955_v0 }
 0x236   : > { %5358 = vrot.lane.b32.xlu1 %v5963_v1, %s5699_s26  ;;  %v4673_v2 = vpop.f32.mrb[6].mxu0 }
 0x237   : > { %v965_v3 = vpop.f32.mrb[7].mxu0  ;;  %v6017_v33 = vmul.f32 0.25, %v4673_v2 }
 0x238   : > { %v5967_v4 = vpack.i.bf16 %v4673_v2, %v965_v3  ;;  %v6011_v32 = vmul.f32 0.25, %v965_v3 }
 0x23a   : > { %5363 = vrot.lane.b32.xlu1 %v5967_v4, %s5699_s26 }
 0x2a0   : > { %v5349_v5 = vpop.permute.xlu0 %5348 }
 0x2a1   : > { %v5351_v6 = vunpack.i.h.bf16 %v5349_v5  ;;  %v5350_v7 = vunpack.i.l.bf16 %v5349_v5  ;;  %v6073_v5 = vld [vmem:[%s7126_s30 + $0x30] sm:$0xff] }
 0x2a3   : > { %v5078_v9 = vpack.c.bf16 %v5351_v6, %v5350_v7 }
 0x2a4   : > { %v5354_v10 = vpop.permute.xlu1 %5353 }
 0x2a5   : > { %v5356_v11 = vunpack.i.h.bf16 %v5354_v10  ;;  %v5355_v12 = vunpack.i.l.bf16 %v5354_v10  ;;  %5080 = vmatprep.subr.msk.bf16.mxu1 %vm5973_vm2, %v5078_v9 }
 0x2a6   : > { %5083 = vmatpush3.bf16.xpose.msk.msra.mxu1 %vm5973_vm2, %v5078_v9 }
 0x2a7   : > { %v5084_v13 = vpack.c.bf16 %v5356_v11, %v5355_v12 }
 0x2a8   : > { %v5359_v14 = vpop.permute.xlu1 %5358 }
 0x2a9   : > { %v5361_v15 = vunpack.i.h.bf16 %v5359_v14  ;;  %v5360_v16 = vunpack.i.l.bf16 %v5359_v14  ;;  %5086 = vmatprep.subr.msk.bf16.mxu1 %vm5973_vm2, %v5084_v13 }
 0x2ab   : > { %v5090_v17 = vpack.c.bf16 %v5361_v15, %v5360_v16 }
 0x2ac   : > { %v5364_v18 = vpop.permute.xlu1 %5363 }
 0x2ad   : > { %v5366_v19 = vunpack.i.h.bf16 %v5364_v18  ;;  %v5365_v22 = vunpack.i.l.bf16 %v5364_v18 }
 0x2ae   : > { %5089 = vmatpush3.bf16.xpose.msk.msra.mxu1 %vm5973_vm2, %v5084_v13 }
 0x2af   : > { %5092 = vmatprep.subr.msk.bf16.mxu1 %vm5973_vm2, %v5090_v17  ;;  %v5096_v23 = vpack.c.bf16 %v5366_v19, %v5365_v22 }
 0x2b6   : > { %5095 = vmatpush3.bf16.xpose.msk.msra.mxu1 %vm5973_vm2, %v5090_v17 }
 0x2b7   : > { %5098 = vmatprep.subr.msk.bf16.mxu1 %vm5973_vm2, %v5096_v23 }
 0x2be   : > { %5101 = vmatpush3.bf16.xpose.msk.msra.mxu1 %vm5973_vm2, %v5096_v23 }
 0x2c5   : > { %4691 = vmatmul.mubr.msk.f32.vlgmr.msra.gmra.mrb[0].mxu1 %vm1006_vm1, %v5993_v25 }
 0x2c6   : > { %4693 = vmatprep.mubr.msk.f32.mxu1 %vm1006_vm1, %v5995_v26 }
 0x2c9   : > { %4694 = vmatmul.mubr.msk.f32.gmra.mrb[2].mxu1 %vm1006_vm1, %v6001_v27 }
 0x2ca   : > { %4696 = vmatprep.mubr.msk.f32.mxu1 %vm1006_vm1, %v6003_v30 }
 0x2cd   : > { %4697 = vmatmul.mubr.msk.f32.gmra.mrb[4].mxu1 %vm1006_vm1, %v6009_v31 }
 0x2ce   : > { %4699 = vmatprep.mubr.msk.f32.mxu1 %vm1006_vm1, %v6011_v32 }
 0x2d1   : > { %4700 = vmatmul.mubr.msk.f32.gmra.mrb[6].mxu1 %vm1006_vm1, %v6017_v33 }
 0x398   : > { %v4692_v37 = vpop.f32.mrb[0].mxu1 }
 0x399   : > { %v1119_v40 = vadd.f32 %v4692_v37, %v6024_v35  ;;  %v1113_v41 = vpop.f32.mrb[1].mxu1 }
 0x39a   : > { %v1114_v43 = vadd.f32 %v1113_v41, %v6029_v36 }
 0x39b   : > { %v1156_v44 = vsel %vm1152_vm3, %v1119_v40, -inf }
 0x39c   : > { %1157 = vmax.xlane.f32.xlu1 %v1156_v44  ;;  %v4695_v45 = vpop.f32.mrb[2].mxu1  ;;  %v1153_v46 = vsel %vm1152_vm3, %v1114_v43, -inf }
 0x39d   : > { %v1129_v47 = vadd.f32 %v4695_v45, %v6036_v21  ;;  %v1123_v29 = vpop.f32.mrb[3].mxu1  ;;  %1154 = vmax.xlane.f32.xlu0 %v1153_v46 }
 0x39e   : > { %v1124_v54 = vadd.f32 %v1123_v29, %v6044_v38 }
 0x39f   : > { %v1162_v53 = vsel %vm1152_vm3, %v1129_v47, -inf }
 0x3a0   : > { %v4698_v56 = vpop.f32.mrb[4].mxu1  ;;  %v1159_v0 = vsel %vm1152_vm3, %v1124_v54, -inf }
 0x3a1   : > { %v1139_v39 = vadd.f32 %v4698_v56, %v6049_v52  ;;  %v1133_v48 = vpop.f32.mrb[5].mxu1  ;;  %1163 = vmax.xlane.f32.xlu0 %v1162_v53 }
 0x3a2   : > { %v1134_v61 = vadd.f32 %v1133_v48, %v6057_v57 }
 0x3a3   : > { %v1168_v49 = vsel %vm1152_vm3, %v1139_v39, -inf }
 0x3a4   : > { %1169 = vmax.xlane.f32.xlu1 %v1168_v49  ;;  %v4701_v63 = vpop.f32.mrb[6].mxu1  ;;  %v1165_v9 = vsel %vm1152_vm3, %v1134_v61, -inf }
 0x3a5   : > { %v6068_v2 = vadd.f32 %v4701_v63, %v6062_v58  ;;  %v1143_v3 = vpop.f32.mrb[7].mxu1  ;;  %1160 = vmax.xlane.f32.xlu0 %v1159_v0 }
 0x3a6   : > { %v6078_v7 = vadd.f32 %v1143_v3, %v6073_v5 }
 0x3a7   : > { %v1174_v6 = vsel %vm1152_vm3, %v6068_v2, -inf }
 0x3a8   : > { %1175 = vmax.xlane.f32.xlu1 %v1174_v6  ;;  %v1171_v10 = vsel %vm1152_vm3, %v6078_v7, -inf }
 0x3a9   : > { %1166 = vmax.xlane.f32.xlu0 %v1165_v9 }
 0x3ad   : > { %1172 = vmax.xlane.f32.xlu0 %v1171_v10 }
 0x3b9   : > { %5373 = vrot.lane.b32.xlu1 %v5959_v62, %s5700_s2 }
 0x3bd   : > { %5378 = vrot.lane.b32.xlu1 %v5963_v1, %s5700_s2 }
 0x3c1   : > { %5383 = vrot.lane.b32.xlu1 %v5967_v4, %s5700_s2 }
 0x3c3   : > { %5368 = vrot.lane.b32.xlu0 %v5951_v59, %s5700_s2 }
 0x3c5   : > { %5393 = vrot.lane.b32.xlu1 %v5959_v62, %s5701_s27 }
 0x3c7   : > { %5388 = vrot.lane.b32.xlu0 %v5951_v59, %s5701_s27 }
 0x429   : > { %v1158_v11 = vpop.xlane.xlu1 %1157 }
 0x42a   : > { %v1178_v12 = vsub.f32 %v1119_v40, %v1158_v11  ;;  %v1155_v13 = vpop.xlane.xlu0 %1154 }
 0x42b   : > { %v1177_v14 = vsub.f32 %v1114_v43, %v1155_v13 }
 0x42c   : > { %v1187_v15 = vmul.f32 1.442695, %v1178_v12 }
 0x42d   : > { %v1185_v16 = vmul.f32 1.442695, %v1177_v14 }
 0x42e   : > { %5523 = vpow2.f32 %v1187_v15  ;;  %v1164_v17 = vpop.xlane.xlu0 %1163 }
 0x42f   : > { %5525 = vpow2.f32 %v1185_v16  ;;  %v1180_v18 = vsub.f32 %v1129_v47, %v1164_v17 }
 0x431   : > { %v1191_v19 = vmul.f32 1.442695, %v1180_v18  ;;  %v1170_v22 = vpop.xlane.xlu1 %1169 }
 0x432   : > { %v1182_v23 = vsub.f32 %v1139_v39, %v1170_v22  ;;  %v1161_v37 = vpop.xlane.xlu0 %1160 }
 0x433   : > { %5527 = vpow2.f32 %v1191_v19  ;;  %v1179_v41 = vsub.f32 %v1124_v54, %v1161_v37 }
 0x434   : > { %v1195_v44 = vmul.f32 1.442695, %v1182_v23 }
 0x435   : > { %v1189_v45 = vmul.f32 1.442695, %v1179_v41  ;;  %v1176_v46 = vpop.xlane.xlu1 %1175 }
 0x436   : > { %v1167_v29 = vpop.xlane.xlu0 %1166 }
 0x437   : > { %5529 = vpow2.f32 %v1189_v45  ;;  %v1181_v40 = vsub.f32 %v1134_v61, %v1167_v29 }
 0x438   : > { %v6095_v53 = vpop.eup %5523  ;;  %5531 = vpow2.f32 %v1195_v44 }
 0x439   : > { %v6097_v43 = vpop.eup %5525  ;;  %v1193_v56 = vmul.f32 1.442695, %v1181_v40  ;;  %v5374_v48 = vpop.permute.xlu1 %5373  ;;  %v1204_v47 = vsel %vm1152_vm3, %v6095_v53, 0.0 }
 0x43a   : > { %1205 = vadd.xlane.f32.xlu1 %v1204_v47  ;;  %v1173_v39 = vpop.xlane.xlu0 %1172  ;;  %v1201_v54 = vsel %vm1152_vm3, %v6097_v43, 0.0  ;;  %v5376_v3 = vunpack.i.h.bf16 %v5374_v48  ;;  %v5375_v6 = vunpack.i.l.bf16 %v5374_v48  ;;  %v1184_v47 = vsub.f32 %v6068_v2, %v1176_v46 }
 0x43b   : > { %1202 = vadd.xlane.f32.xlu0 %v1201_v54  ;;  %5533 = vpow2.f32 %v1193_v56 }
 0x43c   : > { %v5106_v17 = vpack.c.bf16 %v5376_v3, %v5375_v6  ;;  %v1199_v54 = vmul.f32 1.442695, %v1184_v47 }
 0x43d   : > { %v6103_v49 = vpop.eup %5527  ;;  %v5379_v61 = vpop.permute.xlu1 %5378 }
 0x43e   : > { %v5369_v63 = vpop.permute.xlu0 %5368  ;;  %v1210_v0 = vsel %vm1152_vm3, %v6103_v49, 0.0  ;;  %v5381_v15 = vunpack.i.h.bf16 %v5379_v61  ;;  %v5380_v16 = vunpack.i.l.bf16 %v5379_v61  ;;  %v1183_v61 = vsub.f32 %v6078_v7, %v1173_v39 }
 0x43f   : > { %v5371_v9 = vunpack.i.h.bf16 %v5369_v63  ;;  %v5370_v10 = vunpack.i.l.bf16 %v5369_v63  ;;  %1211 = vadd.xlane.f32.xlu1 %v1210_v0  ;;  %5535 = vpow2.f32 %v1199_v54 }
 0x440   : > { %v5110_v41 = vpack.c.bf16 %v5381_v15, %v5380_v16  ;;  %v1197_v63 = vmul.f32 1.442695, %v1183_v61 }
 0x441   : > { %v6107_v11 = vpop.eup %5529  ;;  %v5102_v12 = vpack.c.bf16 %v5371_v9, %v5370_v10  ;;  %v5384_v18 = vpop.permute.xlu1 %5383 }
 0x442   : > { %v1207_v13 = vsel %vm1152_vm3, %v6107_v11, 0.0  ;;  %v6111_v14 = vpop.eup %5531  ;;  %v5386_v23 = vunpack.i.h.bf16 %v5384_v18  ;;  %v5385_v37 = vunpack.i.l.bf16 %v5384_v18  ;;  %v5389_v44 = vpop.permute.xlu0 %5388  ;;  %5537 = vpow2.f32 %v1197_v63 }
 0x443   : > { %1208 = vadd.xlane.f32.xlu0 %v1207_v13  ;;  %5103 = vmatprep.subr.bf16.mxu0 %v5102_v12  ;;  %v1216_v19 = vsel %vm1152_vm3, %v6111_v14, 0.0  ;;  %v5391_v29 = vunpack.i.h.bf16 %v5389_v44  ;;  %v5390_v40 = vunpack.i.l.bf16 %v5389_v44 }
 0x444   : > { %5105 = vmatpush3.bf16.msra.mxu0 %v5102_v12  ;;  %v5114_v56 = vpack.c.bf16 %v5386_v23, %v5385_v37 }
 0x445   : > { %5107 = vmatprep.subr.bf16.mxu0 %v5106_v17  ;;  %v6115_v22 = vpop.eup %5533  ;;  %v5118_v48 = vpack.c.bf16 %v5391_v29, %v5390_v40  ;;  %v2078_v40 = vld [vmem:[%s7089_s10] sm:$0xff] }
 0x446   : > { %v1213_v45 = vsel %vm1152_vm3, %v6115_v22, 0.0 }
 0x447   : > { %1217 = vadd.xlane.f32.xlu0 %v1216_v19 }
 0x448   : > { %5109 = vmatpush3.bf16.msra.mxu0 %v5106_v17 }
 0x449   : > { %5111 = vmatprep.subr.bf16.mxu0 %v5110_v41 }
 0x44b   : > { %1214 = vadd.xlane.f32.xlu0 %v1213_v45 }
 0x44c   : > { %5113 = vmatpush3.bf16.msra.mxu0 %v5110_v41 }
 0x44d   : > { %5115 = vmatprep.subr.bf16.mxu0 %v5114_v56 }
 0x450   : > { %5403 = vrot.lane.b32.xlu1 %v5967_v4, %s5701_s27  ;;  %5117 = vmatpush3.bf16.msra.mxu0 %v5114_v56 }
 0x451   : > { %5120 = vmatprep.subr.msk.bf16.mxu0 %vm5973_vm2, %v5118_v48 }
 0x454   : > { %1396 = vrot.lane.b32.xlu1 %v5993_v25, %s7109_s4  ;;  %v6137_v25 = vpop.eup %5535 }
 0x455   : > { %v6141_v2 = vpop.eup %5537 }
 0x461   : > { %5398 = vrot.lane.b32.xlu0 %v5963_v1, %s5701_s27 }
 0x465   : > { %1394 = vrot.lane.b32.xlu0 %v5953_v60, %s7109_s4  ;;  %v1222_v60 = vsel %vm1152_vm3, %v6137_v25, 0.0 }
 0x469   : > { %1398 = vrot.lane.b32.xlu0 %v5995_v26, %s7109_s4  ;;  %v1219_v26 = vsel %vm1152_vm3, %v6141_v2, 0.0 }
 0x46d   : > { %1402 = vrot.lane.b32.xlu0 %v6003_v30, %s7109_s4  ;;  %v5394_v30 = vpop.permute.xlu1 %5393 }
 0x46e   : > { %v5396_v6 = vunpack.i.h.bf16 %v5394_v30  ;;  %v5395_v9 = vunpack.i.l.bf16 %v5394_v30  ;;  %v2080_v30 = vld [vmem:[%s7089_s10 + $0x10] sm:$0xff] }
 0x471   : > { %1406 = vrot.lane.b32.xlu0 %v6011_v32, %s7109_s4 }
 0x478   : > { %1223 = vadd.xlane.f32.xlu1 %v1222_v60 }
 0x47c   : > { %1220 = vadd.xlane.f32.xlu1 %v1219_v26 }
 0x48d   : > { %1400 = vrot.lane.b32.xlu1 %v6001_v27, %s7109_s4 }
 0x491   : > { %1404 = vrot.lane.b32.xlu1 %v6009_v31, %s7109_s4 }
 0x495   : > { %1408 = vrot.lane.b32.xlu1 %v6017_v33, %s7109_s4  ;;  %v5124_v33 = vpack.c.bf16 %v5396_v6, %v5395_v9  ;;  %v4295_v6 = vld [vmem:[%s7128_s9] ss:$0 sm:$0xff] }
 0x4c7   : > { %v1206_v32 = vpop.xlane.xlu1 %1205 }
 0x4c8   : > { %5539 = vrcp.f32 %v1206_v32  ;;  %v1203_v7 = vpop.xlane.xlu0 %1202  ;;  %v2081_v32 = vld [vmem:[%s7089_s10 + $0x18] sm:$0xff] }
 0x4c9   : > { %5541 = vrcp.f32 %v1203_v7 }
 0x4cc   : > { %v1212_v46 = vpop.xlane.xlu1 %1211 }
 0x4cd   : > { %5543 = vrcp.f32 %v1212_v46  ;;  %v5170_v46 = vpack.c.bf16 %v2081_v32, %v2080_v30 }
 0x4d0   : > { %v1209_v39 = vpop.xlane.xlu0 %1208  ;;  %v5404_v23 = vpop.permute.xlu1 %5403 }
 0x4d1   : > { %5545 = vrcp.f32 %v1209_v39  ;;  %v5406_v44 = vunpack.i.h.bf16 %v5404_v23 }
 0x4d2   : > { %v5540_v0 = vpop.eup %5539 }
 0x4d3   : > { %v5542_v3 = vpop.eup %5541  ;;  %v1234_v31 = vmul.f32 %v5540_v0, %v6095_v53 }
 0x4d4   : > { %v1218_v27 = vpop.xlane.xlu0 %1217  ;;  %v1233_v10 = vmul.f32 %v5542_v3, %v6097_v43  ;;  %v1397_v56 = vpop.permute.xlu1 %1396 }
 0x4d5   : > { %5547 = vrcp.f32 %v1218_v27 }
 0x4d6   : > { %4718 = vmatprep.mubr.msk.f32.mxu0 %vm1152_vm3, %v1233_v10 }
 0x4d7   : > { %4719 = vmatmul.mubr.msk.f32.vlgmr.msra.gmra.mrb[8].mxu0 %vm1152_vm3, %v1234_v31  ;;  %v5544_v13 = vpop.eup %5543 }
 0x4d8   : > { %5123 = vmatpush3.bf16.xpose.msk.msra.mxu0 %vm5973_vm2, %v5118_v48  ;;  %v1215_v12 = vpop.xlane.xlu0 %1214  ;;  %v1236_v18 = vmul.f32 %v5544_v13, %v6103_v49 }
 0x4d9   : > { %5549 = vrcp.f32 %v1215_v12  ;;  %5126 = vmatprep.subr.msk.bf16.mxu0 %vm5973_vm2, %v5124_v33 }
 0x4db   : > { %v5546_v15 = vpop.eup %5545 }
 0x4dc   : > { %v5399_v16 = vpop.permute.xlu0 %5398  ;;  %v1235_v43 = vmul.f32 %v5546_v15, %v6107_v11  ;;  %v5405_v11 = vunpack.i.l.bf16 %v5404_v23 }
 0x4dd   : > { %v5401_v53 = vunpack.i.h.bf16 %v5399_v16  ;;  %v5400_v17 = vunpack.i.l.bf16 %v5399_v16 }
 0x4de   : > { %4721 = vmatprep.mubr.msk.f32.mxu0 %vm1152_vm3, %v1235_v43  ;;  %v5136_v29 = vpack.c.bf16 %v5406_v44, %v5405_v11 }
 0x4df   : > { %v5130_v19 = vpack.c.bf16 %v5401_v53, %v5400_v17  ;;  %4722 = vmatmul.mubr.msk.f32.gmra.mrb[10].mxu0 %vm1152_vm3, %v1236_v18  ;;  %v5548_v37 = vpop.eup %5547 }
 0x4e0   : > { %5129 = vmatpush3.bf16.xpose.msk.msra.mxu0 %vm5973_vm2, %v5124_v33  ;;  %v1238_v49 = vmul.f32 %v5548_v37, %v6111_v14  ;;  %v1395_v54 = vpop.permute.xlu0 %1394 }
 0x4e1   : > { %5132 = vmatprep.subr.msk.bf16.mxu0 %vm5973_vm2, %v5130_v19 }
 0x4e3   : > { %v5550_v41 = vpop.eup %5549 }
 0x4e4   : > { %v1237_v45 = vmul.f32 %v5550_v41, %v6115_v22  ;;  %v2079_v22 = vld [vmem:[%s7089_s10 + $0x8] sm:$0xff]  ;;  %v1399_v7 = vpop.permute.xlu0 %1398 }
 0x4e5   : > { %v5166_v14 = vpack.c.bf16 %v2079_v22, %v2078_v40 }
 0x4e6   : > { %4724 = vmatprep.mubr.msk.f32.mxu0 %vm1152_vm3, %v1237_v45 }
 0x4e7   : > { %4725 = vmatmul.mubr.msk.f32.gmra.mrb[12].mxu0 %vm1152_vm3, %v1238_v49 }
 0x4e8   : > { %5135 = vmatpush3.bf16.xpose.msk.msra.mxu0 %vm5973_vm2, %v5130_v19 }
 0x4e9   : > { %5138 = vmatprep.subr.msk.bf16.mxu0 %vm5973_vm2, %v5136_v29 }
 0x4f0   : > { %5141 = vmatpush3.bf16.xpose.msk.msra.mxu0 %vm5973_vm2, %v5136_v29 }
 0x4f1   : > { %5167 = vmatprep.subr.bf16.mxu0 %v5166_v14 }
 0x505   : > { %v1224_v48 = vpop.xlane.xlu1 %1223 }
 0x506   : > { %5551 = vrcp.f32 %v1224_v48 }
 0x509   : > { %v1221_v47 = vpop.xlane.xlu1 %1220 }
 0x50a   : > { %5553 = vrcp.f32 %v1221_v47 }
 0x50d   : > { %v1401_v39 = vpop.permute.xlu1 %1400 }
 0x510   : > { %v5552_v61 = vpop.eup %5551 }
 0x511   : > { %v1240_v26 = vmul.f32 %v5552_v61, %v6137_v25  ;;  %v1403_v25 = vpop.permute.xlu0 %1402  ;;  %v1405_v0 = vpop.permute.xlu1 %1404 }
 0x514   : > { %v5554_v63 = vpop.eup %5553 }
 0x515   : > { %v1239_v60 = vmul.f32 %v5554_v63, %v6141_v2  ;;  %v4294_v2 = vld [vmem:[%s7127_s8] ss:$0 sm:$0xff]  ;;  %v1407_v9 = vpop.permute.xlu0 %1406  ;;  %v1409_v10 = vpop.permute.xlu1 %1408  ;;  %s7131_s8 = smov 112  }
 0x516   : > { %v2101_v3 = vmul.f32 %v4294_v2, %v5909_v24  ;;  %v2102_v27 = vmul.f32 %v4294_v2, %v5916_v34  ;;  %v2103_v33 = vmul.f32 %v4294_v2, %v5919_v20  ;;  %v2104_v12 = vmul.f32 %v4294_v2, %v5925_v42 }
 0x517   : > { %4727 = vmatprep.mubr.msk.f32.mxu0 %vm1152_vm3, %v1239_v60  ;;  %v2105_v15 = vmul.f32 %v4294_v2, %v5928_v28  ;;  %v2106_v34 = vmul.f32 %v4294_v2, %v5935_v50  ;;  %v2107_v20 = vmul.f32 %v4294_v2, %v5938_v51  ;;  %v2108_v42 = vmul.f32 %v4294_v2, %v5945_v55 }
 0x518   : > { %4728 = vmatmul.mubr.msk.f32.gmra.mrb[14].mxu0 %vm1152_vm3, %v1240_v26  ;;  %v2115_v31 = vadd.f32 %v4295_v6, %v2101_v3  ;;  %v2116_v24 = vadd.f32 %v4295_v6, %v2102_v27  ;;  %v2117_v13 = vadd.f32 %v4295_v6, %v2103_v33  ;;  %v2118_v16 = vadd.f32 %v4295_v6, %v2104_v12 }
 0x519   : > { %4746 = vmatprep.mubr.msk.f32.mxu0 %vm1006_vm1, %v1395_v54  ;;  %v2119_v43 = vadd.f32 %v4295_v6, %v2105_v15  ;;  %v2120_v53 = vadd.f32 %v4295_v6, %v2106_v34  ;;  %v2121_v17 = vadd.f32 %v4295_v6, %v2107_v20  ;;  %v2122_v28 = vadd.f32 %v4295_v6, %v2108_v42 }
 0x51c   : > { %4747 = vmatmul.mubr.msk.f32.vlgmr.msra.gmra.mrb[16].mxu0 %vm1006_vm1, %v1397_v56 }
 0x51d   : > { %4749 = vmatprep.mubr.msk.f32.mxu0 %vm1006_vm1, %v1399_v7  ;;  %5169 = vmatpush3.bf16.msra.mxu0 %v5166_v14 }
 0x51e   : > { %5171 = vmatprep.subr.bf16.mxu0 %v5170_v46 }
 0x520   : > { %4750 = vmatmul.mubr.msk.f32.gmra.mrb[18].mxu0 %vm1006_vm1, %v1401_v39 }
 0x521   : > { %4752 = vmatprep.mubr.msk.f32.mxu0 %vm1006_vm1, %v1403_v25  ;;  %5173 = vmatpush3.bf16.msra.mxu0 %v5170_v46 }
 0x524   : > { %4753 = vmatmul.mubr.msk.f32.gmra.mrb[20].mxu0 %vm1006_vm1, %v1405_v0 }
 0x525   : > { %4755 = vmatprep.mubr.msk.f32.mxu0 %vm1006_vm1, %v1407_v9 }
 0x528   : > { %4756 = vmatmul.mubr.msk.f32.gmra.mrb[22].mxu0 %vm1006_vm1, %v1409_v10 }
 0x529   : > { %4826 = vmatprep.mubr.msk.f32.mxu0 %vm711_vm0, %v2115_v31 }
 0x52c   : > { %4827 = vmatmul.mubr.msk.f32.vlgmr.msra.gmra.mrb[24].mxu0 %vm711_vm0, %v2116_v24 }
 0x52d   : > { %4829 = vmatprep.mubr.msk.f32.mxu0 %vm711_vm0, %v2117_v13 }
 0x530   : > { %4830 = vmatmul.mubr.msk.f32.gmra.mrb[26].mxu0 %vm711_vm0, %v2118_v16 }
 0x531   : > { %4832 = vmatprep.mubr.msk.f32.mxu0 %vm711_vm0, %v2119_v43 }
 0x534   : > { %4833 = vmatmul.mubr.msk.f32.gmra.mrb[28].mxu0 %vm711_vm0, %v2120_v53 }
 0x535   : > { %4835 = vmatprep.mubr.msk.f32.mxu0 %vm711_vm0, %v2121_v17 }
 0x538   : > { %4836 = vmatmul.mubr.msk.f32.gmra.mrb[30].mxu0 %vm711_vm0, %v2122_v28 }
 0x5aa   : > { %v6223_v18 = vpop.f32.mrb[8].mxu0 }
 0x5ab   : > { %v6225_v50 = vpop.f32.mrb[9].mxu0 }
 0x5b2   : > { %v6227_v51 = vpop.f32.mrb[10].mxu0 }
 0x5b3   : > { %v6229_v19 = vpop.f32.mrb[11].mxu0 }
 0x5ba   : > { %v6231_v23 = vpop.f32.mrb[12].mxu0 }
 0x5bb   : > { %v6233_v37 = vpop.f32.mrb[13].mxu0 }
 0x5eb   : > { %v6235_v55 = vpop.f32.mrb[14].mxu0 }
 0x5ec   : > { %v6237_v41 = vpop.f32.mrb[15].mxu0 }
 0x5ef   : > { %v4748_v44 = vpop.f32.mrb[16].mxu0 }
 0x5f0   : > { %v1524_v11 = vpop.f32.mrb[17].mxu0  ;;  %v6285_v9 = vadd.f32 %v4748_v44, %v6024_v35 }
 0x5f1   : > { %v6272_v25 = vadd.f32 %v1524_v11, %v6029_v36 }
 0x5f3   : > { %v4751_v45 = vpop.f32.mrb[18].mxu0  ;;  %v1563_v0 = vsel %vm1152_vm3, %v6272_v25, -inf }
 0x5f4   : > { %v1534_v49 = vpop.f32.mrb[19].mxu0  ;;  %v6280_v3 = vadd.f32 %v4751_v45, %v6036_v21  ;;  %v1566_v21 = vsel %vm1152_vm3, %v6285_v9, -inf }
 0x5f5   : > { %v6275_v2 = vadd.f32 %v1534_v49, %v6044_v38 }
 0x5f6   : > { %v1572_v38 = vsel %vm1152_vm3, %v6280_v3, -inf }
 0x5f7   : > { %v4754_v29 = vpop.f32.mrb[20].mxu0  ;;  %v1569_v6 = vsel %vm1152_vm3, %v6275_v2, -inf }
 0x5f8   : > { %v1544_v40 = vpop.f32.mrb[21].mxu0  ;;  %v6293_v27 = vadd.f32 %v4754_v29, %v6049_v52 }
 0x5f9   : > { %v6288_v36 = vadd.f32 %v1544_v40, %v6057_v57 }
 0x5fa   : > { %v1578_v31 = vsel %vm1152_vm3, %v6293_v27, -inf }
 0x5fb   : > { %v4757_v22 = vpop.f32.mrb[22].mxu0  ;;  %v1575_v35 = vsel %vm1152_vm3, %v6288_v36, -inf }
 0x5fc   : > { %v1554_v14 = vpop.f32.mrb[23].mxu0  ;;  %v6303_v57 = vadd.f32 %v4757_v22, %v6062_v58 }
 0x5fd   : > { %v6298_v10 = vadd.f32 %v1554_v14, %v6073_v5 }
 0x5fe   : > { %v1584_v33 = vsel %vm1152_vm3, %v6303_v57, -inf }
 0x5ff   : > { %v6239_v56 = vpop.f32.mrb[24].mxu0  ;;  %v1581_v52 = vsel %vm1152_vm3, %v6298_v10, -inf }
 0x600   : > { %v2213_v48 = vpop.f32.mrb[25].mxu0  ;;  %v6332_v44 = vmul.f32 0.25, %v6239_v56 }
 0x601   : > { %v6242_v47 = vpack.i.bf16 %v6239_v56, %v2213_v48  ;;  %v6244_v54 = vmul.f32 0.25, %v2213_v48 }
 0x603   : > { %5408 = vrot.lane.b32.xlu0 %v6242_v47, %s5699_s26  ;;  %v6248_v61 = vpop.f32.mrb[26].mxu0  ;;  %4854 = vmatprep.mubr.msk.f32.mxu0 %vm1006_vm1, %v6244_v54 }
 0x604   : > { %v2223_v63 = vpop.f32.mrb[27].mxu0  ;;  %v6341_v45 = vmul.f32 0.25, %v6248_v61 }
 0x605   : > { %v6253_v60 = vpack.i.bf16 %v6248_v61, %v2223_v63  ;;  %v6334_v11 = vmul.f32 0.25, %v2223_v63 }
 0x607   : > { %5413 = vrot.lane.b32.xlu1 %v6253_v60, %s5699_s26  ;;  %v6257_v26 = vpop.f32.mrb[28].mxu0 }
 0x608   : > { %v2233_v30 = vpop.f32.mrb[29].mxu0  ;;  %v6350_v29 = vmul.f32 0.25, %v6257_v26 }
 0x609   : > { %v6260_v32 = vpack.i.bf16 %v6257_v26, %v2233_v30  ;;  %v6343_v49 = vmul.f32 0.25, %v2233_v30 }
 0x60b   : > { %5418 = vrot.lane.b32.xlu0 %v6260_v32, %s5699_s26  ;;  %v6264_v7 = vpop.f32.mrb[30].mxu0 }
 0x60c   : > { %v2243_v46 = vpop.f32.mrb[31].mxu0  ;;  %v6359_v22 = vmul.f32 0.25, %v6264_v7 }
 0x60d   : > { %v6267_v39 = vpack.i.bf16 %v6264_v7, %v2243_v46  ;;  %v6352_v40 = vmul.f32 0.25, %v2243_v46 }
 0x60f   : > { %5423 = vrot.lane.b32.xlu1 %v6267_v39, %s5699_s26  ;;  %s7107_s26 = smov 48  }
 0x62a   : > { %1564 = vmax.xlane.f32.xlu0 %v1563_v0 }
 0x62e   : > { %1570 = vmax.xlane.f32.xlu0 %v1569_v6 }
 0x632   : > { %1573 = vmax.xlane.f32.xlu0 %v1572_v38 }
 0x633   : > { %1567 = vmax.xlane.f32.xlu1 %v1566_v21 }
 0x636   : > { %1576 = vmax.xlane.f32.xlu0 %v1575_v35 }
 0x637   : > { %1579 = vmax.xlane.f32.xlu1 %v1578_v31 }
 0x63a   : > { %1582 = vmax.xlane.f32.xlu0 %v1581_v52 }
 0x63b   : > { %1585 = vmax.xlane.f32.xlu1 %v1584_v33 }
 0x64c   : > { %5433 = vrot.lane.b32.xlu1 %v5959_v62, %s7107_s26 }
 0x650   : > { %5428 = vrot.lane.b32.xlu0 %v5951_v59, %s7107_s26 }
 0x675   : > { %v5409_v58 = vpop.permute.xlu0 %5408 }
 0x676   : > { %v5411_v5 = vunpack.i.h.bf16 %v5409_v58  ;;  %v5410_v24 = vunpack.i.l.bf16 %v5409_v58 }
 0x678   : > { %v5174_v12 = vpack.c.bf16 %v5411_v5, %v5410_v24 }
 0x679   : > { %v5414_v13 = vpop.permute.xlu1 %5413 }
 0x67a   : > { %v5416_v15 = vunpack.i.h.bf16 %v5414_v13  ;;  %v5415_v16 = vunpack.i.l.bf16 %v5414_v13  ;;  %5176 = vmatprep.subr.msk.bf16.mxu0 %vm5973_vm2, %v5174_v12 }
 0x67b   : > { %5179 = vmatpush3.bf16.xpose.msk.msra.mxu0 %vm5973_vm2, %v5174_v12 }
 0x67c   : > { %v5180_v34 = vpack.c.bf16 %v5416_v15, %v5415_v16 }
 0x67d   : > { %v5419_v43 = vpop.permute.xlu0 %5418 }
 0x67e   : > { %v5421_v20 = vunpack.i.h.bf16 %v5419_v43  ;;  %v5420_v62 = vunpack.i.l.bf16 %v5419_v43  ;;  %5182 = vmatprep.subr.msk.bf16.mxu0 %vm5973_vm2, %v5180_v34 }
 0x680   : > { %v5186_v59 = vpack.c.bf16 %v5421_v20, %v5420_v62 }
 0x681   : > { %v5424_v53 = vpop.permute.xlu1 %5423 }
 0x682   : > { %v5426_v42 = vunpack.i.h.bf16 %v5424_v53  ;;  %v5425_v17 = vunpack.i.l.bf16 %v5424_v53 }
 0x683   : > { %5185 = vmatpush3.bf16.xpose.msk.msra.mxu0 %vm5973_vm2, %v5180_v34 }
 0x684   : > { %5188 = vmatprep.subr.msk.bf16.mxu0 %vm5973_vm2, %v5186_v59  ;;  %v5192_v28 = vpack.c.bf16 %v5426_v42, %v5425_v17 }
 0x68b   : > { %5191 = vmatpush3.bf16.xpose.msk.msra.mxu0 %vm5973_vm2, %v5186_v59 }
 0x68c   : > { %5194 = vmatprep.subr.msk.bf16.mxu0 %vm5973_vm2, %v5192_v28 }
 0x693   : > { %5197 = vmatpush3.bf16.xpose.msk.msra.mxu0 %vm5973_vm2, %v5192_v28 }
 0x69a   : > { %4855 = vmatmul.mubr.msk.f32.vlgmr.msra.gmra.mrb[32].mxu0 %vm1006_vm1, %v6332_v44 }
 0x69b   : > { %4857 = vmatprep.mubr.msk.f32.mxu0 %vm1006_vm1, %v6334_v11 }
 0x69e   : > { %4858 = vmatmul.mubr.msk.f32.gmra.mrb[34].mxu0 %vm1006_vm1, %v6341_v45 }
 0x69f   : > { %4860 = vmatprep.mubr.msk.f32.mxu0 %vm1006_vm1, %v6343_v49 }
 0x6a2   : > { %4861 = vmatmul.mubr.msk.f32.gmra.mrb[36].mxu0 %vm1006_vm1, %v6350_v29 }
 0x6a3   : > { %4863 = vmatprep.mubr.msk.f32.mxu0 %vm1006_vm1, %v6352_v40 }
 0x6a6   : > { %4864 = vmatmul.mubr.msk.f32.gmra.mrb[38].mxu0 %vm1006_vm1, %v6359_v22 }
 0x6b7   : > { %v1565_v14 = vpop.xlane.xlu0 %1564 }
 0x6b8   : > { %v1587_v56 = vsub.f32 %v6272_v25, %v1565_v14 }
 0x6ba   : > { %v1595_v48 = vmul.f32 1.442695, %v1587_v56 }
 0x6bb   : > { %v1571_v61 = vpop.xlane.xlu0 %1570 }
 0x6bc   : > { %5555 = vpow2.f32 %v1595_v48  ;;  %v1589_v63 = vsub.f32 %v6275_v2, %v1571_v61 }
 0x6be   : > { %v1599_v26 = vmul.f32 1.442695, %v1589_v63 }
 0x6bf   : > { %v1574_v30 = vpop.xlane.xlu0 %1573 }
 0x6c0   : > { %5557 = vpow2.f32 %v1599_v26  ;;  %v1590_v46 = vsub.f32 %v6280_v3, %v1574_v30  ;;  %v1568_v0 = vpop.xlane.xlu1 %1567 }
 0x6c1   : > { %v1588_v7 = vsub.f32 %v6285_v9, %v1568_v0 }
 0x6c2   : > { %v1601_v6 = vmul.f32 1.442695, %v1590_v46 }
 0x6c3   : > { %v1597_v38 = vmul.f32 1.442695, %v1588_v7  ;;  %v1577_v21 = vpop.xlane.xlu0 %1576 }
 0x6c4   : > { %v1591_v35 = vsub.f32 %v6288_v36, %v1577_v21  ;;  %v1580_v31 = vpop.xlane.xlu1 %1579 }
 0x6c5   : > { %5559 = vpow2.f32 %v1597_v38  ;;  %v1592_v25 = vsub.f32 %v6293_v27, %v1580_v31 }
 0x6c6   : > { %v5556_v52 = vpop.eup %5555  ;;  %v1603_v33 = vmul.f32 1.442695, %v1591_v35  ;;  %5561 = vpow2.f32 %v1601_v6 }
 0x6c7   : > { %v1605_v2 = vmul.f32 1.442695, %v1592_v25  ;;  %v1583_v58 = vpop.xlane.xlu0 %1582  ;;  %v1611_v5 = vsel %vm1152_vm3, %v5556_v52, 0.0 }
 0x6c8   : > { %5563 = vpow2.f32 %v1603_v33  ;;  %v1586_v3 = vpop.xlane.xlu1 %1585  ;;  %1612 = vadd.xlane.f32.xlu0 %v1611_v5  ;;  %v1593_v36 = vsub.f32 %v6298_v10, %v1583_v58 }
 0x6c9   : > { %v1594_v9 = vsub.f32 %v6303_v57, %v1586_v3  ;;  %5565 = vpow2.f32 %v1605_v2 }
 0x6ca   : > { %v6371_v24 = vpop.eup %5557  ;;  %v1607_v57 = vmul.f32 1.442695, %v1593_v36 }
 0x6cb   : > { %v1609_v12 = vmul.f32 1.442695, %v1594_v9  ;;  %v5429_v13 = vpop.permute.xlu0 %5428  ;;  %v1617_v27 = vsel %vm1152_vm3, %v6371_v24, 0.0 }
 0x6cc   : > { %v5431_v15 = vunpack.i.h.bf16 %v5429_v13  ;;  %v5430_v16 = vunpack.i.l.bf16 %v5429_v13  ;;  %v5434_v34 = vpop.permute.xlu1 %5433  ;;  %1618 = vadd.xlane.f32.xlu0 %v1617_v27  ;;  %v6424_v13 = vld [vmem:[%s7129_s25 + $0x18] sm:$0xff] }
 0x6cd   : > { %v5436_v43 = vunpack.i.h.bf16 %v5434_v34  ;;  %v5435_v20 = vunpack.i.l.bf16 %v5434_v34  ;;  %5567 = vpow2.f32 %v1609_v12 }
 0x6ce   : > { %v5142_v62 = vpack.c.bf16 %v5431_v15, %v5430_v16  ;;  %5569 = vpow2.f32 %v1607_v57 }
 0x6cf   : > { %v6376_v59 = vpop.eup %5559  ;;  %v5146_v53 = vpack.c.bf16 %v5436_v43, %v5435_v20  ;;  %v6436_v20 = vld [vmem:[%s7129_s25 + $0x10] sm:$0xff] }
 0x6d0   : > { %5143 = vmatprep.subr.bf16.mxu1 %v5142_v62  ;;  %v1614_v10 = vsel %vm1152_vm3, %v6376_v59, 0.0  ;;  %v6380_v42 = vpop.eup %5561 }
 0x6d1   : > { %1615 = vadd.xlane.f32.xlu1 %v1614_v10  ;;  %5145 = vmatpush3.bf16.msra.mxu1 %v5142_v62  ;;  %v1620_v14 = vsel %vm1152_vm3, %v6380_v42, 0.0  ;;  %v6441_v10 = vld [vmem:[%s7129_s25 + $0x28] sm:$0xff] }
 0x6d2   : > { %v6382_v17 = vpop.eup %5563  ;;  %5147 = vmatprep.subr.bf16.mxu1 %v5146_v53 }
 0x6d3   : > { %v1623_v28 = vsel %vm1152_vm3, %v6382_v17, 0.0  ;;  %v6388_v56 = vpop.eup %5565 }
 0x6d4   : > { %1624 = vadd.xlane.f32.xlu0 %v1623_v28  ;;  %v1626_v48 = vsel %vm1152_vm3, %v6388_v56, 0.0 }
 0x6d5   : > { %1621 = vadd.xlane.f32.xlu1 %v1620_v14  ;;  %5149 = vmatpush3.bf16.msra.mxu1 %v5146_v53 }
 0x6d7   : > { %v6392_v61 = vpop.eup %5567 }
 0x6d8   : > { %v1632_v63 = vsel %vm1152_vm3, %v6392_v61, 0.0  ;;  %v6396_v26 = vpop.eup %5569 }
 0x6d9   : > { %1627 = vadd.xlane.f32.xlu1 %v1626_v48  ;;  %v1629_v30 = vsel %vm1152_vm3, %v6396_v26, 0.0 }
 0x6dd   : > { %1633 = vadd.xlane.f32.xlu1 %v1632_v63 }
 0x6e1   : > { %1630 = vadd.xlane.f32.xlu1 %v1629_v30 }
 0x6ea   : > { %5438 = vrot.lane.b32.xlu0 %v5963_v1, %s7107_s26  ;;  %v6408_v1 = vld [vmem:[%s7129_s25 + $0x8] sm:$0xff] }
 0x6f2   : > { %5443 = vrot.lane.b32.xlu1 %v5967_v4, %s7107_s26  ;;  %v6413_v4 = vld [vmem:[%s7129_s25] sm:$0xff] }
 0x755   : > { %v1613_v46 = vpop.xlane.xlu0 %1612 }
 0x756   : > { %5571 = vrcp.f32 %v1613_v46 }
 0x759   : > { %v1619_v0 = vpop.xlane.xlu0 %1618 }
 0x75e   : > { %v1616_v7 = vpop.xlane.xlu1 %1615 }
 0x75f   : > { %5573 = vrcp.f32 %v1616_v7  ;;  %v6454_v7 = vld [vmem:[%s7129_s25 + $0x20] sm:$0xff] }
 0x760   : > { %v5572_v6 = vpop.eup %5571  ;;  %5575 = vrcp.f32 %v1619_v0 }
 0x761   : > { %v1625_v38 = vpop.xlane.xlu0 %1624  ;;  %v1643_v21 = vmul.f32 %v5572_v6, %v5556_v52 }
 0x762   : > { %v1622_v35 = vpop.xlane.xlu1 %1621 }
 0x763   : > { %4774 = vmatprep.mubr.msk.f32.mxu1 %vm1152_vm3, %v1643_v21  ;;  %5577 = vrcp.f32 %v1622_v35 }
 0x764   : > { %5579 = vrcp.f32 %v1625_v38  ;;  %v6459_v38 = vld [vmem:[%s7129_s25 + $0x38] sm:$0xff] }
 0x765   : > { %v5439_v31 = vpop.permute.xlu0 %5438 }
 0x766   : > { %v5441_v25 = vunpack.i.h.bf16 %v5439_v31  ;;  %v5440_v33 = vunpack.i.l.bf16 %v5439_v31  ;;  %v1628_v2 = vpop.xlane.xlu1 %1627 }
 0x767   : > { %5581 = vrcp.f32 %v1628_v2 }
 0x768   : > { %v5150_v58 = vpack.c.bf16 %v5441_v25, %v5440_v33 }
 0x769   : > { %v5574_v30 = vpop.eup %5573 }
 0x76a   : > { %v1634_v5 = vpop.xlane.xlu1 %1633  ;;  %5151 = vmatprep.subr.bf16.mxu1 %v5150_v58  ;;  %v5576_v6 = vpop.eup %5575  ;;  %v1644_v35 = vmul.f32 %v5574_v30, %v6376_v59 }
 0x76b   : > { %5153 = vmatpush3.bf16.msra.mxu1 %v5150_v58  ;;  %v1645_v59 = vmul.f32 %v5576_v6, %v6371_v24 }
 0x76d   : > { %v4856_v52 = vpop.f32.mrb[32].mxu0  ;;  %v5578_v2 = vpop.eup %5577 }
 0x76e   : > { %v6416_v3 = vadd.f32 %v4856_v52, %v6408_v1  ;;  %v2390_v9 = vpop.f32.mrb[33].mxu0  ;;  %v1631_v36 = vpop.xlane.xlu1 %1630 }
 0x76f   : > { %v6419_v12 = vadd.f32 %v2390_v9, %v6413_v4  ;;  %5583 = vrcp.f32 %v1631_v36  ;;  %v5580_v9 = vpop.eup %5579 }
 0x770   : > { %v2432_v27 = vsel %vm1152_vm3, %v6416_v3, -inf  ;;  %5585 = vrcp.f32 %v1634_v5  ;;  %v6475_v5 = vld [vmem:[%s7129_s25 + $0x30] sm:$0xff]  ;;  %v1647_v24 = vmul.f32 %v5580_v9, %v6382_v17 }
 0x771   : > { %v4859_v15 = vpop.f32.mrb[34].mxu0  ;;  %2433 = vmax.xlane.f32.xlu1 %v2432_v27  ;;  %v2429_v16 = vsel %vm1152_vm3, %v6419_v12, -inf  ;;  %v700_v17 = vld [vmem:[%s7130_s29 + $0x10] sm:$0xff] }
 0x772   : > { %v6431_v34 = vadd.f32 %v4859_v15, %v6424_v13  ;;  %v2400_v43 = vpop.f32.mrb[35].mxu0  ;;  %2430 = vmax.xlane.f32.xlu0 %v2429_v16  ;;  %v5444_v62 = vpop.permute.xlu1 %5443  ;;  %v1646_v16 = vmul.f32 %v5578_v2, %v6380_v42 }
 0x773   : > { %v5446_v57 = vunpack.i.h.bf16 %v5444_v62  ;;  %v5445_v53 = vunpack.i.l.bf16 %v5444_v62  ;;  %v6446_v14 = vadd.f32 %v2400_v43, %v6436_v20  ;;  %v5582_v43 = vpop.eup %5581 }
 0x774   : > { %v2438_v28 = vsel %vm1152_vm3, %v6431_v34, -inf }
 0x775   : > { %v5154_v48 = vpack.c.bf16 %v5446_v57, %v5445_v53  ;;  %v4862_v63 = vpop.f32.mrb[36].mxu0  ;;  %v2435_v33 = vsel %vm1152_vm3, %v6446_v14, -inf  ;;  %v1648_v53 = vmul.f32 %v5582_v43, %v6388_v56  ;;  %v701_v56 = vld [vmem:[%s7130_s29 + $0x18] sm:$0xff] }
 0x776   : > { %v6449_v46 = vadd.f32 %v4862_v63, %v6441_v10  ;;  %v2410_v0 = vpop.f32.mrb[37].mxu0  ;;  %2439 = vmax.xlane.f32.xlu0 %v2438_v28  ;;  %v699_v63 = vld [vmem:[%s7130_s29 + $0x8] sm:$0xff] }
 0x777   : > { %5155 = vmatprep.subr.bf16.mxu1 %v5154_v48  ;;  %v6465_v31 = vadd.f32 %v2410_v0, %v6454_v7 }
 0x778   : > { %5157 = vmatpush3.bf16.msra.mxu1 %v5154_v48  ;;  %v2444_v21 = vsel %vm1152_vm3, %v6449_v46, -inf }
 0x779   : > { %v4865_v25 = vpop.f32.mrb[38].mxu0  ;;  %2445 = vmax.xlane.f32.xlu1 %v2444_v21  ;;  %v2441_v15 = vsel %vm1152_vm3, %v6465_v31, -inf  ;;  %v5584_v62 = vpop.eup %5583 }
 0x77a   : > { %v6470_v58 = vadd.f32 %v4865_v25, %v6459_v38  ;;  %v2420_v52 = vpop.f32.mrb[39].mxu0  ;;  %2436 = vmax.xlane.f32.xlu0 %v2435_v33  ;;  %v5586_v28 = vpop.eup %5585  ;;  %v1649_v48 = vmul.f32 %v5584_v62, %v6396_v26  ;;  %v698_v26 = vld [vmem:[%s7130_s29] sm:$0xff] }
 0x77b   : > { %4775 = vmatmul.mubr.msk.f32.vlgmr.msra.gmra.mrb[8].mxu1 %vm1152_vm3, %v1644_v35  ;;  %v6483_v27 = vadd.f32 %v2420_v52, %v6475_v5  ;;  %v1650_v42 = vmul.f32 %v5586_v28, %v6392_v61  ;;  %v5158_v61 = vpack.c.bf16 %v701_v56, %v700_v17  ;;  %v6523_v30 = vpack.c.bf16 %v699_v63, %v698_v26 }
 0x77c   : > { %4777 = vmatprep.mubr.msk.f32.mxu1 %vm1152_vm3, %v1645_v59  ;;  %v2450_v36 = vsel %vm1152_vm3, %v6470_v58, -inf }
 0x77d   : > { %2451 = vmax.xlane.f32.xlu1 %v2450_v36  ;;  %v2447_v57 = vsel %vm1152_vm3, %v6483_v27, -inf  ;;  %5159 = vmatprep.subr.bf16.mxu1 %v5158_v61 }
 0x77e   : > { %2442 = vmax.xlane.f32.xlu0 %v2441_v15  ;;  %5161 = vmatpush3.bf16.msra.mxu1 %v5158_v61 }
 0x77f   : > { %4778 = vmatmul.mubr.msk.f32.gmra.mrb[10].mxu1 %vm1152_vm3, %v1646_v16  ;;  %5163 = vmatprep.subr.bf16.mxu1 %v6523_v30 }
 0x780   : > { %4780 = vmatprep.mubr.msk.f32.mxu1 %vm1152_vm3, %v1647_v24 }
 0x782   : > { %2448 = vmax.xlane.f32.xlu0 %v2447_v57 }
 0x783   : > { %4781 = vmatmul.mubr.msk.f32.gmra.mrb[12].mxu1 %vm1152_vm3, %v1648_v53 }
 0x784   : > { %4783 = vmatprep.mubr.msk.f32.mxu1 %vm1152_vm3, %v1649_v48 }
 0x787   : > { %4784 = vmatmul.mubr.msk.f32.gmra.mrb[14].mxu1 %vm1152_vm3, %v1650_v42 }
 0x78e   : > { %5453 = vrot.lane.b32.xlu1 %v6253_v60, %s5700_s2 }
 0x792   : > { %5458 = vrot.lane.b32.xlu1 %v6260_v32, %s5700_s2 }
 0x796   : > { %5463 = vrot.lane.b32.xlu1 %v6267_v39, %s5700_s2 }
 0x798   : > { %5448 = vrot.lane.b32.xlu0 %v6242_v47, %s5700_s2 }
 0x79a   : > { %5473 = vrot.lane.b32.xlu1 %v6253_v60, %s5701_s27 }
 0x79c   : > { %5468 = vrot.lane.b32.xlu0 %v6242_v47, %s5701_s27 }
 0x7fe   : > { %v2434_v0 = vpop.xlane.xlu1 %2433 }
 0x7ff   : > { %v2454_v6 = vsub.f32 %v6416_v3, %v2434_v0  ;;  %v2431_v21 = vpop.xlane.xlu0 %2430 }
 0x800   : > { %v2453_v35 = vsub.f32 %v6419_v12, %v2431_v21 }
 0x801   : > { %v2463_v25 = vmul.f32 1.442695, %v2454_v6 }
 0x802   : > { %v2461_v33 = vmul.f32 1.442695, %v2453_v35 }
 0x803   : > { %5587 = vpow2.f32 %v2463_v25  ;;  %v2440_v2 = vpop.xlane.xlu0 %2439 }
 0x804   : > { %5589 = vpow2.f32 %v2461_v33  ;;  %v2456_v52 = vsub.f32 %v6431_v34, %v2440_v2 }
 0x806   : > { %v2467_v59 = vmul.f32 1.442695, %v2456_v52  ;;  %v2446_v9 = vpop.xlane.xlu1 %2445 }
 0x807   : > { %v2458_v36 = vsub.f32 %v6449_v46, %v2446_v9  ;;  %v2437_v15 = vpop.xlane.xlu0 %2436 }
 0x808   : > { %5591 = vpow2.f32 %v2467_v59  ;;  %v2455_v16 = vsub.f32 %v6446_v14, %v2437_v15 }
 0x809   : > { %v2471_v43 = vmul.f32 1.442695, %v2458_v36 }
 0x80a   : > { %v2465_v3 = vmul.f32 1.442695, %v2455_v16  ;;  %v2452_v26 = vpop.xlane.xlu1 %2451 }
 0x80b   : > { %v2443_v24 = vpop.xlane.xlu0 %2442  ;;  %v2460_v63 = vsub.f32 %v6470_v58, %v2452_v26 }
 0x80c   : > { %5593 = vpow2.f32 %v2465_v3  ;;  %v2457_v12 = vsub.f32 %v6465_v31, %v2443_v24 }
 0x80d   : > { %v6532_v62 = vpop.eup %5587  ;;  %5595 = vpow2.f32 %v2471_v43  ;;  %v2475_v6 = vmul.f32 1.442695, %v2460_v63 }
 0x80e   : > { %v6534_v57 = vpop.eup %5589  ;;  %v2469_v34 = vmul.f32 1.442695, %v2457_v12  ;;  %v2480_v53 = vsel %vm1152_vm3, %v6532_v62, 0.0  ;;  %v5454_v9 = vpop.permute.xlu1 %5453 }
 0x80f   : > { %2481 = vadd.xlane.f32.xlu1 %v2480_v53  ;;  %v2477_v46 = vsel %vm1152_vm3, %v6534_v57, 0.0  ;;  %v2449_v0 = vpop.xlane.xlu0 %2448  ;;  %v5455_v24 = vunpack.i.l.bf16 %v5454_v9 }
 0x810   : > { %2478 = vadd.xlane.f32.xlu0 %v2477_v46  ;;  %5597 = vpow2.f32 %v2469_v34  ;;  %v2459_v21 = vsub.f32 %v6483_v27, %v2449_v0 }
 0x811   : > { %5599 = vpow2.f32 %v2475_v6 }
 0x812   : > { %v6540_v14 = vpop.eup %5591  ;;  %v2473_v35 = vmul.f32 1.442695, %v2459_v21  ;;  %v5459_v3 = vpop.permute.xlu1 %5458 }
 0x813   : > { %v2486_v31 = vsel %vm1152_vm3, %v6540_v14, 0.0  ;;  %v5449_v58 = vpop.permute.xlu0 %5448  ;;  %v5461_v34 = vunpack.i.h.bf16 %v5459_v3  ;;  %v5460_v53 = vunpack.i.l.bf16 %v5459_v3 }
 0x814   : > { %2487 = vadd.xlane.f32.xlu1 %v2486_v31  ;;  %5601 = vpow2.f32 %v2473_v35  ;;  %v5451_v27 = vunpack.i.h.bf16 %v5449_v58  ;;  %v5450_v33 = vunpack.i.l.bf16 %v5449_v58 }
 0x815   : > { %v5206_v31 = vpack.c.bf16 %v5461_v34, %v5460_v53 }
 0x816   : > { %v6544_v28 = vpop.eup %5593  ;;  %v5198_v52 = vpack.c.bf16 %v5451_v27, %v5450_v33  ;;  %v5464_v46 = vpop.permute.xlu1 %5463 }
 0x817   : > { %v2483_v48 = vsel %vm1152_vm3, %v6544_v28, 0.0  ;;  %v6548_v42 = vpop.eup %5595 }
 0x818   : > { %2484 = vadd.xlane.f32.xlu0 %v2483_v48  ;;  %v2492_v17 = vsel %vm1152_vm3, %v6548_v42, 0.0  ;;  %v5466_v48 = vunpack.i.h.bf16 %v5464_v46 }
 0x81a   : > { %v6552_v56 = vpop.eup %5597 }
 0x81b   : > { %v2489_v61 = vsel %vm1152_vm3, %v6552_v56, 0.0 }
 0x81c   : > { %2493 = vadd.xlane.f32.xlu0 %v2492_v17  ;;  %v5465_v17 = vunpack.i.l.bf16 %v5464_v46 }
 0x820   : > { %2490 = vadd.xlane.f32.xlu0 %v2489_v61 }
 0x825   : > { %5483 = vrot.lane.b32.xlu1 %v6267_v39, %s5701_s27 }
 0x829   : > { %2672 = vrot.lane.b32.xlu1 %v6332_v44, %s7131_s8  ;;  %v6572_v44 = vpop.eup %5599 }
 0x82a   : > { %v6576_v25 = vpop.eup %5601 }
 0x836   : > { %5478 = vrot.lane.b32.xlu0 %v6260_v32, %s5701_s27  ;;  %s7132_s27 = smov 48  }
 0x83a   : > { %2670 = vrot.lane.b32.xlu0 %v6244_v54, %s7131_s8  ;;  %v2498_v54 = vsel %vm1152_vm3, %v6572_v44, 0.0 }
 0x83e   : > { %2674 = vrot.lane.b32.xlu0 %v6334_v11, %s7131_s8 }
 0x842   : > { %2678 = vrot.lane.b32.xlu0 %v6343_v49, %s7131_s8  ;;  %v2495_v49 = vsel %vm1152_vm3, %v6576_v25, 0.0 }
 0x846   : > { %2682 = vrot.lane.b32.xlu0 %v6352_v40, %s7131_s8 }
 0x84d   : > { %2499 = vadd.xlane.f32.xlu1 %v2498_v54 }
 0x84e   : > { %v4776_v11 = vpop.f32.mrb[8].mxu1 }
 0x84f   : > { %v1765_v2 = vpop.f32.mrb[9].mxu1 }
 0x850   : > { %4790 = vmatprep.mubr.msk.f32.mxu1 %vm1006_vm1, %v1765_v2 }
 0x851   : > { %2496 = vadd.xlane.f32.xlu1 %v2495_v49  ;;  %4791 = vmatmul.mubr.msk.f32.vlgmr.msra.gmra.mrb[16].mxu1 %vm1006_vm1, %v4776_v11 }
 0x852   : > { %5165 = vmatpush3.bf16.msra.mxu1 %v6523_v30  ;;  %v4779_v40 = vpop.f32.mrb[10].mxu1  ;;  %v5456_v30 = vunpack.i.h.bf16 %v5454_v9 }
 0x853   : > { %5199 = vmatprep.subr.bf16.mxu1 %v5198_v52  ;;  %v1775_v59 = vpop.f32.mrb[11].mxu1 }
 0x854   : > { %4793 = vmatprep.mubr.msk.f32.mxu1 %vm1006_vm1, %v1775_v59  ;;  %v5202_v12 = vpack.c.bf16 %v5456_v30, %v5455_v24 }
 0x855   : > { %4794 = vmatmul.mubr.msk.f32.gmra.mrb[18].mxu1 %vm1006_vm1, %v4779_v40 }
 0x856   : > { %v4782_v36 = vpop.f32.mrb[12].mxu1 }
 0x857   : > { %v1785_v15 = vpop.f32.mrb[13].mxu1 }
 0x858   : > { %4796 = vmatprep.mubr.msk.f32.mxu1 %vm1006_vm1, %v1785_v15 }
 0x859   : > { %4797 = vmatmul.mubr.msk.f32.gmra.mrb[20].mxu1 %vm1006_vm1, %v4782_v36 }
 0x85a   : > { %v4785_v16 = vpop.f32.mrb[14].mxu1 }
 0x85b   : > { %v1795_v43 = vpop.f32.mrb[15].mxu1 }
 0x85c   : > { %4799 = vmatprep.mubr.msk.f32.mxu1 %vm1006_vm1, %v1795_v43 }
 0x85d   : > { %4800 = vmatmul.mubr.msk.f32.gmra.mrb[22].mxu1 %vm1006_vm1, %v4785_v16 }
 0x85e   : > { %4806 = vmatprep.mubr.msk.f32.mxu1 %vm1006_vm1, %v6225_v50  ;;  %v5469_v50 = vpop.permute.xlu0 %5468 }
 0x85f   : > { %v5470_v61 = vunpack.i.l.bf16 %v5469_v50 }
 0x861   : > { %4807 = vmatmul.mubr.msk.f32.vlgmr.msra.gmra.mrb[16].mxu1 %vm1006_vm1, %v6223_v18  ;;  %v5210_v18 = vpack.c.bf16 %v5466_v48, %v5465_v17 }
 0x862   : > { %5201 = vmatpush3.bf16.msra.mxu1 %v5198_v52  ;;  %2676 = vrot.lane.b32.xlu1 %v6341_v45, %s7131_s8  ;;  %v5471_v45 = vunpack.i.h.bf16 %v5469_v50 }
 0x863   : > { %4809 = vmatprep.mubr.msk.f32.mxu1 %vm1006_vm1, %v6229_v19  ;;  %5203 = vmatprep.subr.bf16.mxu1 %v5202_v12  ;;  %v5474_v19 = vpop.permute.xlu1 %5473 }
 0x864   : > { %v5476_v63 = vunpack.i.h.bf16 %v5474_v19  ;;  %v5475_v0 = vunpack.i.l.bf16 %v5474_v19 }
 0x865   : > { %4810 = vmatmul.mubr.msk.f32.gmra.mrb[18].mxu1 %vm1006_vm1, %v6227_v51  ;;  %v5214_v51 = vpack.c.bf16 %v5471_v45, %v5470_v61 }
 0x866   : > { %5205 = vmatpush3.bf16.msra.mxu1 %v5202_v12  ;;  %2680 = vrot.lane.b32.xlu1 %v6350_v29, %s7131_s8  ;;  %v5220_v35 = vpack.c.bf16 %v5476_v63, %v5475_v0 }
 0x867   : > { %4812 = vmatprep.mubr.msk.f32.mxu1 %vm1006_vm1, %v6233_v37  ;;  %5207 = vmatprep.subr.bf16.mxu1 %v5206_v31 }
 0x869   : > { %4813 = vmatmul.mubr.msk.f32.gmra.mrb[20].mxu1 %vm1006_vm1, %v6231_v23 }
 0x86a   : > { %5209 = vmatpush3.bf16.msra.mxu1 %v5206_v31  ;;  %2684 = vrot.lane.b32.xlu1 %v6359_v22, %s7131_s8 }
 0x86b   : > { %4815 = vmatprep.mubr.msk.f32.mxu1 %vm1006_vm1, %v6237_v41  ;;  %5211 = vmatprep.subr.bf16.mxu1 %v5210_v18 }
 0x86d   : > { %4816 = vmatmul.mubr.msk.f32.gmra.mrb[22].mxu1 %vm1006_vm1, %v6235_v55 }
 0x86e   : > { %5213 = vmatpush3.bf16.msra.mxu1 %v5210_v18 }
 0x86f   : > { %5216 = vmatprep.subr.msk.bf16.mxu1 %vm5973_vm2, %v5214_v51 }
 0x89c   : > { %v2482_v37 = vpop.xlane.xlu1 %2481 }
 0x89d   : > { %5603 = vrcp.f32 %v2482_v37  ;;  %v2479_v23 = vpop.xlane.xlu0 %2478 }
 0x89e   : > { %5605 = vrcp.f32 %v2479_v23 }
 0x8a1   : > { %v2488_v29 = vpop.xlane.xlu1 %2487 }
 0x8a2   : > { %5607 = vrcp.f32 %v2488_v29 }
 0x8a5   : > { %v2485_v22 = vpop.xlane.xlu0 %2484  ;;  %v5484_v52 = vpop.permute.xlu1 %5483 }
 0x8a6   : > { %5609 = vrcp.f32 %v2485_v22  ;;  %v5486_v9 = vunpack.i.h.bf16 %v5484_v52 }
 0x8a7   : > { %v5604_v26 = vpop.eup %5603 }
 0x8a8   : > { %v5606_v41 = vpop.eup %5605  ;;  %v2510_v21 = vmul.f32 %v5604_v26, %v6532_v62 }
 0x8a9   : > { %v2494_v6 = vpop.xlane.xlu0 %2493  ;;  %v2509_v55 = vmul.f32 %v5606_v41, %v6534_v57  ;;  %v2673_v16 = vpop.permute.xlu1 %2672 }
 0x8aa   : > { %5611 = vrcp.f32 %v2494_v6 }
 0x8ab   : > { %4882 = vmatprep.mubr.msk.f32.mxu1 %vm1152_vm3, %v2509_v55 }
 0x8ac   : > { %4883 = vmatmul.mubr.msk.f32.vlgmr.msra.gmra.mrb[24].mxu1 %vm1152_vm3, %v2510_v21  ;;  %v5608_v54 = vpop.eup %5607 }
 0x8ad   : > { %5219 = vmatpush3.bf16.xpose.msk.msra.mxu1 %vm5973_vm2, %v5214_v51  ;;  %v2491_v58 = vpop.xlane.xlu0 %2490  ;;  %v2512_v2 = vmul.f32 %v5608_v54, %v6540_v14 }
 0x8ae   : > { %5613 = vrcp.f32 %v2491_v58  ;;  %5222 = vmatprep.subr.msk.bf16.mxu1 %vm5973_vm2, %v5220_v35 }
 0x8b0   : > { %v5610_v27 = vpop.eup %5609 }
 0x8b1   : > { %v5479_v33 = vpop.permute.xlu0 %5478  ;;  %v2511_v57 = vmul.f32 %v5610_v27, %v6544_v28  ;;  %v5485_v28 = vunpack.i.l.bf16 %v5484_v52 }
 0x8b2   : > { %v5481_v62 = vunpack.i.h.bf16 %v5479_v33  ;;  %v5480_v11 = vunpack.i.l.bf16 %v5479_v33 }
 0x8b3   : > { %4885 = vmatprep.mubr.msk.f32.mxu1 %vm1152_vm3, %v2511_v57  ;;  %v5232_v15 = vpack.c.bf16 %v5486_v9, %v5485_v28 }
 0x8b4   : > { %v5226_v49 = vpack.c.bf16 %v5481_v62, %v5480_v11  ;;  %4886 = vmatmul.mubr.msk.f32.gmra.mrb[26].mxu1 %vm1152_vm3, %v2512_v2  ;;  %v5612_v40 = vpop.eup %5611 }
 0x8b5   : > { %5225 = vmatpush3.bf16.xpose.msk.msra.mxu1 %vm5973_vm2, %v5220_v35  ;;  %v2514_v14 = vmul.f32 %v5612_v40, %v6548_v42  ;;  %v2671_v42 = vpop.permute.xlu0 %2670 }
 0x8b6   : > { %5228 = vmatprep.subr.msk.bf16.mxu1 %vm5973_vm2, %v5226_v49 }
 0x8b8   : > { %v5614_v59 = vpop.eup %5613 }
 0x8b9   : > { %v2513_v36 = vmul.f32 %v5614_v59, %v6552_v56  ;;  %v2675_v34 = vpop.permute.xlu0 %2674 }
 0x8bb   : > { %4888 = vmatprep.mubr.msk.f32.mxu1 %vm1152_vm3, %v2513_v36 }
 0x8bc   : > { %4889 = vmatmul.mubr.msk.f32.gmra.mrb[28].mxu1 %vm1152_vm3, %v2514_v14 }
 0x8bd   : > { %5231 = vmatpush3.bf16.xpose.msk.msra.mxu1 %vm5973_vm2, %v5226_v49  ;;  %v2679_v53 = vpop.permute.xlu0 %2678 }
 0x8be   : > { %5234 = vmatprep.subr.msk.bf16.mxu1 %vm5973_vm2, %v5232_v15 }
 0x8c5   : > { %5237 = vmatpush3.bf16.xpose.msk.msra.mxu1 %vm5973_vm2, %v5232_v15 }
 0x8da   : > { %v2500_v43 = vpop.xlane.xlu1 %2499 }
 0x8db   : > { %5615 = vrcp.f32 %v2500_v43 }
 0x8de   : > { %v2497_v56 = vpop.xlane.xlu1 %2496 }
 0x8df   : > { %5617 = vrcp.f32 %v2497_v56 }
 0x8e2   : > { %v2677_v8 = vpop.permute.xlu1 %2676 }
 0x8e5   : > { %v5616_v3 = vpop.eup %5615 }
 0x8e6   : > { %v2516_v12 = vmul.f32 %v5616_v3, %v6572_v44  ;;  %v2681_v46 = vpop.permute.xlu1 %2680 }
 0x8e9   : > { %v5618_v30 = vpop.eup %5617 }
 0x8ea   : > { %v2515_v24 = vmul.f32 %v5618_v30, %v6576_v25  ;;  %v2683_v25 = vpop.permute.xlu0 %2682  ;;  %v2685_v44 = vpop.permute.xlu1 %2684 }
 0x8ec   : > { %4891 = vmatprep.mubr.msk.f32.mxu1 %vm1152_vm3, %v2515_v24 }
 0x8ed   : > { %4892 = vmatmul.mubr.msk.f32.gmra.mrb[30].mxu1 %vm1152_vm3, %v2516_v12 }
 0x8ee   : > { %4910 = vmatprep.mubr.msk.f32.mxu1 %vm1006_vm1, %v2671_v42 }
 0x8f1   : > { %4911 = vmatmul.mubr.msk.f32.vlgmr.msra.gmra.mrb[32].mxu1 %vm1006_vm1, %v2673_v16 }
 0x8f2   : > { %4913 = vmatprep.mubr.msk.f32.mxu1 %vm1006_vm1, %v2675_v34 }
 0x8f5   : > { %4914 = vmatmul.mubr.msk.f32.gmra.mrb[34].mxu1 %vm1006_vm1, %v2677_v8 }
 0x8f6   : > { %4916 = vmatprep.mubr.msk.f32.mxu1 %vm1006_vm1, %v2679_v53 }
 0x8f9   : > { %4917 = vmatmul.mubr.msk.f32.gmra.mrb[36].mxu1 %vm1006_vm1, %v2681_v46 }
 0x8fa   : > { %4919 = vmatprep.mubr.msk.f32.mxu1 %vm1006_vm1, %v2683_v25 }
 0x8fd   : > { %4920 = vmatmul.mubr.msk.f32.gmra.mrb[38].mxu1 %vm1006_vm1, %v2685_v44 }
 0x934   : > { %v6651_v31 = vpop.f32.mrb[16].mxu1 }
 0x935   : > { %v6653_v48 = vpop.f32.mrb[17].mxu1 }
 0x938   : > { %v6655_v17 = vpop.f32.mrb[18].mxu1 }
 0x939   : > { %v6657_v50 = vpop.f32.mrb[19].mxu1 }
 0x93c   : > { %v6659_v18 = vpop.f32.mrb[20].mxu1 }
 0x93d   : > { %v6661_v45 = vpop.f32.mrb[21].mxu1 }
 0x940   : > { %v6663_v61 = vpop.f32.mrb[22].mxu1 }
 0x941   : > { %v6665_v51 = vpop.f32.mrb[23].mxu1 }
 0x97f   : > { %v6667_v19 = vpop.f32.mrb[24].mxu1 }
 0x980   : > { %v6669_v37 = vpop.f32.mrb[25].mxu1 }
 0x987   : > { %v6671_v23 = vpop.f32.mrb[26].mxu1 }
 0x988   : > { %v6673_v29 = vpop.f32.mrb[27].mxu1 }
 0x98f   : > { %v6675_v22 = vpop.f32.mrb[28].mxu1 }
 0x990   : > { %v6677_v26 = vpop.f32.mrb[29].mxu1 }
 0x9c0   : > { %v6679_v41 = vpop.f32.mrb[30].mxu1 }
 0x9c1   : > { %v6681_v63 = vpop.f32.mrb[31].mxu1 }
 0x9c4   : > { %v4912_v0 = vpop.f32.mrb[32].mxu1 }
 0x9c5   : > { %v2806_v6 = vadd.f32 %v4912_v0, %v6408_v1  ;;  %v2800_v55 = vpop.f32.mrb[33].mxu1 }
 0x9c6   : > { %v2801_v21 = vadd.f32 %v2800_v55, %v6413_v4 }
 0x9c7   : > { %v2842_v35 = vsel %vm1152_vm3, %v2806_v6, -inf }
 0x9c8   : > { %2843 = vmax.xlane.f32.xlu1 %v2842_v35  ;;  %v4915_v58 = vpop.f32.mrb[34].mxu1  ;;  %v2839_v54 = vsel %vm1152_vm3, %v2801_v21, -inf }
 0x9c9   : > { %v2816_v27 = vadd.f32 %v4915_v58, %v6424_v13  ;;  %v2810_v33 = vpop.f32.mrb[35].mxu1  ;;  %2840 = vmax.xlane.f32.xlu0 %v2839_v54 }
 0x9ca   : > { %v2811_v62 = vadd.f32 %v2810_v33, %v6436_v20 }
 0x9cb   : > { %v2848_v57 = vsel %vm1152_vm3, %v2816_v27, -inf }
 0x9cc   : > { %v4918_v11 = vpop.f32.mrb[36].mxu1  ;;  %v2845_v40 = vsel %vm1152_vm3, %v2811_v62, -inf }
 0x9cd   : > { %v2826_v1 = vadd.f32 %v4918_v11, %v6441_v10  ;;  %v2820_v2 = vpop.f32.mrb[37].mxu1  ;;  %2849 = vmax.xlane.f32.xlu0 %v2848_v57 }
 0x9ce   : > { %v2821_v49 = vadd.f32 %v2820_v2, %v6454_v7 }
 0x9cf   : > { %v2854_v4 = vsel %vm1152_vm3, %v2826_v1, -inf }
 0x9d0   : > { %2855 = vmax.xlane.f32.xlu1 %v2854_v4  ;;  %v4921_v52 = vpop.f32.mrb[38].mxu1  ;;  %v2851_v10 = vsel %vm1152_vm3, %v2821_v49, -inf }
 0x9d1   : > { %v2836_v13 = vadd.f32 %v4921_v52, %v6459_v38  ;;  %v2830_v59 = vpop.f32.mrb[39].mxu1  ;;  %2846 = vmax.xlane.f32.xlu0 %v2845_v40 }
 0x9d2   : > { %v2831_v20 = vadd.f32 %v2830_v59, %v6475_v5 }
 0x9d3   : > { %v2860_v9 = vsel %vm1152_vm3, %v2836_v13, -inf }
 0x9d4   : > { %2861 = vmax.xlane.f32.xlu1 %v2860_v9  ;;  %v2857_v28 = vsel %vm1152_vm3, %v2831_v20, -inf }
 0x9d5   : > { %2852 = vmax.xlane.f32.xlu0 %v2851_v10 }
 0x9d9   : > { %2858 = vmax.xlane.f32.xlu0 %v2857_v28 }
 0x9e5   : > { %5493 = vrot.lane.b32.xlu1 %v6253_v60, %s7132_s27 }
 0x9ef   : > { %5488 = vrot.lane.b32.xlu0 %v6242_v47, %s7132_s27 }
 0xa55   : > { %v2844_v7 = vpop.xlane.xlu1 %2843 }
 0xa56   : > { %v2864_v38 = vsub.f32 %v2806_v6, %v2844_v7  ;;  %v2841_v36 = vpop.xlane.xlu0 %2840 }
 0xa57   : > { %v2863_v14 = vsub.f32 %v2801_v21, %v2841_v36 }
 0xa58   : > { %v2873_v15 = vmul.f32 1.442695, %v2864_v38 }
 0xa59   : > { %v2871_v16 = vmul.f32 1.442695, %v2863_v14 }
 0xa5a   : > { %5619 = vpow2.f32 %v2873_v15  ;;  %v2850_v5 = vpop.xlane.xlu0 %2849 }
 0xa5b   : > { %5621 = vpow2.f32 %v2871_v16  ;;  %v2866_v43 = vsub.f32 %v2816_v27, %v2850_v5 }
 0xa5d   : > { %v2877_v56 = vmul.f32 1.442695, %v2866_v43  ;;  %v2856_v42 = vpop.xlane.xlu1 %2855 }
 0xa5e   : > { %v2868_v3 = vsub.f32 %v2826_v1, %v2856_v42  ;;  %v2847_v30 = vpop.xlane.xlu0 %2846 }
 0xa5f   : > { %5623 = vpow2.f32 %v2877_v56  ;;  %v2865_v24 = vsub.f32 %v2811_v62, %v2847_v30 }
 0xa60   : > { %v2881_v60 = vmul.f32 1.442695, %v2868_v3 }
 0xa61   : > { %v2875_v12 = vmul.f32 1.442695, %v2865_v24  ;;  %v2862_v34 = vpop.xlane.xlu1 %2861 }
 0xa62   : > { %5625 = vpow2.f32 %v2881_v60  ;;  %v2870_v47 = vsub.f32 %v2836_v13, %v2862_v34  ;;  %v2853_v8 = vpop.xlane.xlu0 %2852  ;;  %v2084_v34 = vld [vmem:[%s7090_s11 + $0x10] sm:$0xff] }
 0xa63   : > { %5627 = vpow2.f32 %v2875_v12  ;;  %v2867_v53 = vsub.f32 %v2821_v49, %v2853_v8 }
 0xa64   : > { %v6703_v46 = vpop.eup %5619  ;;  %v2885_v25 = vmul.f32 1.442695, %v2870_v47  ;;  %v2085_v47 = vld [vmem:[%s7090_s11 + $0x18] sm:$0xff] }
 0xa65   : > { %v5622_v44 = vpop.eup %5621  ;;  %v2879_v0 = vmul.f32 1.442695, %v2867_v53  ;;  %v2890_v6 = vsel %vm1152_vm3, %v6703_v46, 0.0  ;;  %v5494_v54 = vpop.permute.xlu1 %5493 }
 0xa66   : > { %5629 = vpow2.f32 %v2885_v25  ;;  %2891 = vadd.xlane.f32.xlu1 %v2890_v6  ;;  %v2859_v55 = vpop.xlane.xlu0 %2858  ;;  %v2887_v21 = vsel %vm1152_vm3, %v5622_v44, 0.0  ;;  %v5496_v2 = vunpack.i.h.bf16 %v5494_v54  ;;  %v5495_v4 = vunpack.i.l.bf16 %v5494_v54 }
 0xa67   : > { %5631 = vpow2.f32 %v2879_v0  ;;  %v2869_v35 = vsub.f32 %v2831_v20, %v2859_v55  ;;  %2888 = vadd.xlane.f32.xlu0 %v2887_v21 }
 0xa68   : > { %v5242_v9 = vpack.c.bf16 %v5496_v2, %v5495_v4 }
 0xa69   : > { %v6708_v58 = vpop.eup %5623  ;;  %v2883_v27 = vmul.f32 1.442695, %v2869_v35 }
 0xa6a   : > { %v5489_v33 = vpop.permute.xlu0 %5488  ;;  %v2896_v57 = vsel %vm1152_vm3, %v6708_v58, 0.0 }
 0xa6b   : > { %5633 = vpow2.f32 %v2883_v27  ;;  %v5491_v62 = vunpack.i.h.bf16 %v5489_v33  ;;  %v5490_v11 = vunpack.i.l.bf16 %v5489_v33  ;;  %2897 = vadd.xlane.f32.xlu1 %v2896_v57 }
 0xa6c   : > { %v6712_v1 = vpop.eup %5625 }
 0xa6d   : > { %v5628_v49 = vpop.eup %5627  ;;  %v5238_v52 = vpack.c.bf16 %v5491_v62, %v5490_v11  ;;  %v2902_v40 = vsel %vm1152_vm3, %v6712_v1, 0.0 }
 0xa6e   : > { %v2893_v13 = vsel %vm1152_vm3, %v5628_v49, 0.0 }
 0xa6f   : > { %2903 = vadd.xlane.f32.xlu1 %v2902_v40  ;;  %2894 = vadd.xlane.f32.xlu0 %v2893_v13  ;;  %v3357_v40 = vld [vmem:[%s7093_s14 + $0x8] sm:$0xff]  ;;  %v3358_v13 = vld [vmem:[%s7093_s14 + $0x10] sm:$0xff] }
 0xa70   : > { %v6717_v59 = vpop.eup %5629  ;;  %5239 = vmatprep.subr.bf16.mxu0 %v5238_v52 }
 0xa71   : > { %v5632_v20 = vpop.eup %5631  ;;  %5241 = vmatpush3.bf16.msra.mxu0 %v5238_v52  ;;  %v2908_v10 = vsel %vm1152_vm3, %v6717_v59, 0.0 }
 0xa72   : > { %5243 = vmatprep.subr.bf16.mxu0 %v5242_v9  ;;  %v2899_v28 = vsel %vm1152_vm3, %v5632_v20, 0.0 }
 0xa73   : > { %2909 = vadd.xlane.f32.xlu1 %v2908_v10  ;;  %2900 = vadd.xlane.f32.xlu0 %v2899_v28 }
 0xa75   : > { %v5634_v7 = vpop.eup %5633  ;;  %5245 = vmatpush3.bf16.msra.mxu0 %v5242_v9  ;;  %v3359_v9 = vld [vmem:[%s7093_s14 + $0x18] sm:$0xff] }
 0xa76   : > { %v2905_v38 = vsel %vm1152_vm3, %v5634_v7, 0.0 }
 0xa77   : > { %2906 = vadd.xlane.f32.xlu1 %v2905_v38 }
 0xa88   : > { %5503 = vrot.lane.b32.xlu1 %v6267_v39, %s7132_s27 }
 0xa89   : > { %5498 = vrot.lane.b32.xlu0 %v6260_v32, %s7132_s27  ;;  %s7133_s27 = sshll.u32 %s7135_s28, 6 }
 0xa8a   : > { %s7043_s26 = scalar_lea.vmem %s7101_s22, %s7133_s27 }
 0xaf3   : > { %v2892_v36 = vpop.xlane.xlu1 %2891 }
 0xaf4   : > { %v2889_v14 = vpop.xlane.xlu0 %2888 }
 0xaf5   : > { %5635 = vrcp.f32 %v2889_v14 }
 0xaf6   : > { %5637 = vrcp.f32 %v2892_v36 }
 0xaf8   : > { %v2898_v15 = vpop.xlane.xlu1 %2897 }
 0xafc   : > { %v2904_v16 = vpop.xlane.xlu1 %2903  ;;  %v2895_v5 = vpop.xlane.xlu0 %2894 }
 0xafd   : > { %5639 = vrcp.f32 %v2895_v5 }
 0xafe   : > { %5641 = vrcp.f32 %v2898_v15 }
 0xaff   : > { %v5636_v43 = vpop.eup %5635 }
 0xb00   : > { %v2910_v56 = vpop.xlane.xlu1 %2909  ;;  %v2901_v42 = vpop.xlane.xlu0 %2900  ;;  %v2919_v3 = vmul.f32 %v5636_v43, %v5622_v44  ;;  %v5254_v44 = vpack.c.bf16 %v2085_v47, %v2084_v34  ;;  %v4293_v47 = vld [vmem:[%s7086_s7] ss:$0 sm:$0xff] }
 0xb01   : > { %5643 = vrcp.f32 %v2901_v42  ;;  %v5638_v0 = vpop.eup %5637 }
 0xb02   : > { %4938 = vmatprep.mubr.msk.f32.mxu0 %vm1152_vm3, %v2919_v3  ;;  %5645 = vrcp.f32 %v2904_v16  ;;  %v2920_v55 = vmul.f32 %v5638_v0, %v6703_v46  ;;  %v2069_v0 = vadd.f32 %v6651_v31, %v4293_v47  ;;  %v2074_v31 = vadd.f32 %v4293_v47, %v6665_v51  ;;  %v5684_v51 = vld [vmem:[%s5835_s23] sm:$0xff] }
 0xb04   : > { %v2907_v30 = vpop.xlane.xlu1 %2906  ;;  %v5499_v24 = vpop.permute.xlu0 %5498 }
 0xb05   : > { %v5501_v39 = vunpack.i.h.bf16 %v5499_v24  ;;  %v5500_v60 = vunpack.i.l.bf16 %v5499_v24  ;;  %5647 = vrcp.f32 %v2907_v30 }
 0xb06   : > { %5649 = vrcp.f32 %v2910_v56 }
 0xb07   : > { %v5246_v32 = vpack.c.bf16 %v5501_v39, %v5500_v60  ;;  %v5640_v6 = vpop.eup %5639 }
 0xb08   : > { %v5504_v12 = vpop.permute.xlu1 %5503  ;;  %v5642_v21 = vpop.eup %5641  ;;  %v2921_v35 = vmul.f32 %v5640_v6, %v5628_v49  ;;  %v2083_v49 = vld [vmem:[%s7090_s11 + $0x8] sm:$0xff]  ;;  %v2070_v6 = vadd.f32 %v4293_v47, %v6657_v50  ;;  %v2075_v50 = vadd.f32 %v6663_v61, %v4293_v47 }
 0xb09   : > { %v5506_v8 = vunpack.i.h.bf16 %v5504_v12  ;;  %v5505_v53 = vunpack.i.l.bf16 %v5504_v12  ;;  %5247 = vmatprep.subr.bf16.mxu0 %v5246_v32  ;;  %v2922_v27 = vmul.f32 %v5642_v21, %v6708_v58  ;;  %v2082_v58 = vld [vmem:[%s7090_s11] sm:$0xff]  ;;  %v2072_v21 = vadd.f32 %v4293_v47, %v6661_v45 }
 0xb0a   : > { %5249 = vmatpush3.bf16.msra.mxu0 %v5246_v32  ;;  %v5258_v52 = vpack.c.bf16 %v2083_v49, %v2082_v58  ;;  %v5685_v58 = vld [vmem:[%s5835_s23 + $0x18] sm:$0xff] }
 0xb0b   : > { %v5250_v25 = vpack.c.bf16 %v5506_v8, %v5505_v53  ;;  %v5644_v54 = vpop.eup %5643 }
 0xb0c   : > { %v5646_v33 = vpop.eup %5645  ;;  %v2923_v57 = vmul.f32 %v5644_v54, %v5632_v20  ;;  %v5266_v20 = vpack.c.bf16 %v3359_v9, %v3358_v13 }
 0xb0d   : > { %5251 = vmatprep.subr.bf16.mxu0 %v5250_v25  ;;  %v2924_v46 = vmul.f32 %v5646_v33, %v6712_v1  ;;  %v3356_v1 = vld [vmem:[%s7093_s14] sm:$0xff] }
 0xb0e   : > { %5253 = vmatpush3.bf16.msra.mxu0 %v5250_v25 }
 0xb0f   : > { %5255 = vmatprep.subr.bf16.mxu0 %v5254_v44  ;;  %v5648_v62 = vpop.eup %5647 }
 0xb10   : > { %v5650_v11 = vpop.eup %5649  ;;  %v2925_v2 = vmul.f32 %v5648_v62, %v5634_v7 }
 0xb11   : > { %4939 = vmatmul.mubr.msk.f32.vlgmr.msra.gmra.mrb[40].mxu0 %vm1152_vm3, %v2920_v55  ;;  %v2926_v4 = vmul.f32 %v5650_v11, %v6717_v59  ;;  %v5262_v59 = vpack.c.bf16 %v3357_v40, %v3356_v1  ;;  %v2071_v55 = vadd.f32 %v6655_v17, %v4293_v47  ;;  %v4385_v17 = vld [vmem:[%s7094_s15] ss:$0 sm:$0xff] }
 0xb12   : > { %4941 = vmatprep.mubr.msk.f32.mxu0 %vm1152_vm3, %v2921_v35  ;;  %5257 = vmatpush3.bf16.msra.mxu0 %v5254_v44  ;;  %v2068_v44 = vadd.f32 %v4293_v47, %v6653_v48  ;;  %v2073_v48 = vadd.f32 %v6659_v18, %v4293_v47  ;;  %v5683_v18 = vld [vmem:[%s5835_s23 + $0x8] sm:$0xff] }
 0xb13   : > { %5259 = vmatprep.subr.bf16.mxu0 %v5258_v52  ;;  %5263 = vmatprep.subr.bf16.mxu1 %v5262_v59 }
 0xb14   : > { %5265 = vmatpush3.bf16.msra.mxu1 %v5262_v59  ;;  %v5686_v59 = vld [vmem:[%s5835_s23 + $0x10] sm:$0xff] }
 0xb15   : > { %4942 = vmatmul.mubr.msk.f32.gmra.mrb[42].mxu0 %vm1152_vm3, %v2922_v27  ;;  %5267 = vmatprep.subr.bf16.mxu1 %v5266_v20 }
 0xb16   : > { %4944 = vmatprep.mubr.msk.f32.mxu0 %vm1152_vm3, %v2923_v57 }
 0xb18   : > { %5269 = vmatpush3.bf16.msra.mxu1 %v5266_v20 }
 0xb19   : > { %4945 = vmatmul.mubr.msk.f32.gmra.mrb[44].mxu0 %vm1152_vm3, %v2924_v46 }
 0xb1a   : > { %4947 = vmatprep.mubr.msk.f32.mxu0 %vm1152_vm3, %v2925_v2 }
 0xb1d   : > { %4948 = vmatmul.mubr.msk.f32.gmra.mrb[46].mxu0 %vm1152_vm3, %v2926_v4 }
 0xbe4   : > { %v4940_v10 = vpop.f32.mrb[40].mxu0 }
 0xbe5   : > { %v3041_v28 = vpop.f32.mrb[41].mxu0 }
 0xbe6   : > { %4954 = vmatprep.mubr.msk.f32.mxu0 %vm1006_vm1, %v3041_v28 }
 0xbe7   : > { %4955 = vmatmul.mubr.msk.f32.vlgmr.msra.gmra.mrb[48].mxu0 %vm1006_vm1, %v4940_v10  ;;  %v5687_v10 = vld [vmem:[%s5835_s23 + $0x28] sm:$0xff] }
 0xbe8   : > { %v4943_v7 = vpop.f32.mrb[42].mxu0  ;;  %5261 = vmatpush3.bf16.msra.mxu0 %v5258_v52 }
 0xbe9   : > { %v3051_v38 = vpop.f32.mrb[43].mxu0 }
 0xbea   : > { %4957 = vmatprep.mubr.msk.f32.mxu0 %vm1006_vm1, %v3051_v38 }
 0xbeb   : > { %4958 = vmatmul.mubr.msk.f32.gmra.mrb[50].mxu0 %vm1006_vm1, %v4943_v7 }
 0xbec   : > { %v4946_v36 = vpop.f32.mrb[44].mxu0 }
 0xbed   : > { %v3061_v14 = vpop.f32.mrb[45].mxu0 }
 0xbee   : > { %4960 = vmatprep.mubr.msk.f32.mxu0 %vm1006_vm1, %v3061_v14 }
 0xbef   : > { %4961 = vmatmul.mubr.msk.f32.gmra.mrb[52].mxu0 %vm1006_vm1, %v4946_v36 }
 0xbf0   : > { %v4949_v15 = vpop.f32.mrb[46].mxu0 }
 0xbf1   : > { %v3071_v16 = vpop.f32.mrb[47].mxu0 }
 0xbf2   : > { %4963 = vmatprep.mubr.msk.f32.mxu0 %vm1006_vm1, %v3071_v16 }
 0xbf3   : > { %4964 = vmatmul.mubr.msk.f32.gmra.mrb[54].mxu0 %vm1006_vm1, %v4949_v15  ;;  %v5688_v15 = vld [vmem:[%s5835_s23 + $0x20] sm:$0xff] }
 0xbf4   : > { %4970 = vmatprep.mubr.msk.f32.mxu0 %vm1006_vm1, %v6669_v37  ;;  %v3353_v37 = vld [vmem:[%s7092_s13 + $0x8] sm:$0xff] }
 0xbf7   : > { %4971 = vmatmul.mubr.msk.f32.vlgmr.msra.gmra.mrb[48].mxu0 %vm1006_vm1, %v6667_v19  ;;  %v3352_v19 = vld [vmem:[%s7092_s13] sm:$0xff] }
 0xbf8   : > { %4973 = vmatprep.mubr.msk.f32.mxu0 %vm1006_vm1, %v6673_v29  ;;  %v4368_v29 = vld [vmem:[%s7091_s12] ss:$0 sm:$0xff] }
 0xbfb   : > { %4974 = vmatmul.mubr.msk.f32.gmra.mrb[50].mxu0 %vm1006_vm1, %v6671_v23  ;;  %v5270_v23 = vpack.c.bf16 %v3353_v37, %v3352_v19 }
 0xbfc   : > { %4976 = vmatprep.mubr.msk.f32.mxu0 %vm1006_vm1, %v6677_v26  ;;  %v3354_v26 = vld [vmem:[%s7092_s13 + $0x10] sm:$0xff] }
 0xbfd   : > { %5271 = vmatprep.subr.bf16.mxu1 %v5270_v23 }
 0xbff   : > { %4977 = vmatmul.mubr.msk.f32.gmra.mrb[52].mxu0 %vm1006_vm1, %v6675_v22 }
 0xc00   : > { %4979 = vmatprep.mubr.msk.f32.mxu0 %vm1006_vm1, %v6681_v63 }
 0xc03   : > { %4980 = vmatmul.mubr.msk.f32.gmra.mrb[54].mxu0 %vm1006_vm1, %v6679_v41  ;;  %v3355_v41 = vld [vmem:[%s7092_s13 + $0x18] sm:$0xff] }
 0xc04   : > { %v5274_v56 = vpack.c.bf16 %v3355_v41, %v3354_v26  ;;  %v5690_v26 = vld [vmem:[%s5835_s23 + $0x30] sm:$0xff] }
 0xcca   : > { %v4972_v22 = vpop.f32.mrb[48].mxu0 }
 0xccb   : > { %v3299_v63 = vpop.f32.mrb[49].mxu0  ;;  %v3345_v43 = vadd.f32 %v4972_v22, %v4368_v29 }
 0xccc   : > { %v3344_v5 = vadd.f32 %v4368_v29, %v3299_v63 }
 0xcce   : > { %v4975_v42 = vpop.f32.mrb[50].mxu0  ;;  %4990 = vmatprep.mubr.msk.f32.mxu1 %vm711_vm0, %v3344_v5 }
 0xccf   : > { %v3309_v3 = vpop.f32.mrb[51].mxu0  ;;  %4991 = vmatmul.mubr.msk.f32.vlgmr.msra.gmra.mrb[40].mxu1 %vm711_vm0, %v3345_v43  ;;  %v3347_v24 = vadd.f32 %v4975_v42, %v4368_v29 }
 0xcd0   : > { %v3346_v30 = vadd.f32 %v4368_v29, %v3309_v3  ;;  %5273 = vmatpush3.bf16.msra.mxu1 %v5270_v23  ;;  %v5689_v23 = vld [vmem:[%s5835_s23 + $0x38] sm:$0xff] }
 0xcd1   : > { %5275 = vmatprep.subr.bf16.mxu1 %v5274_v56 }
 0xcd2   : > { %v4978_v39 = vpop.f32.mrb[52].mxu0  ;;  %4993 = vmatprep.mubr.msk.f32.mxu1 %vm711_vm0, %v3346_v30 }
 0xcd3   : > { %v3319_v60 = vpop.f32.mrb[53].mxu0  ;;  %4994 = vmatmul.mubr.msk.f32.gmra.mrb[42].mxu1 %vm711_vm0, %v3347_v24  ;;  %v3349_v12 = vadd.f32 %v4978_v39, %v4368_v29 }
 0xcd4   : > { %v3348_v32 = vadd.f32 %v4368_v29, %v3319_v60  ;;  %5277 = vmatpush3.bf16.msra.mxu1 %v5274_v56 }
 0xcd6   : > { %v4981_v34 = vpop.f32.mrb[54].mxu0  ;;  %4996 = vmatprep.mubr.msk.f32.mxu1 %vm711_vm0, %v3348_v32 }
 0xcd7   : > { %v3329_v8 = vpop.f32.mrb[55].mxu0  ;;  %4997 = vmatmul.mubr.msk.f32.gmra.mrb[44].mxu1 %vm711_vm0, %v3349_v12  ;;  %v3351_v25 = vadd.f32 %v4981_v34, %v4368_v29 }
 0xcd8   : > { %v3350_v53 = vadd.f32 %v4368_v29, %v3329_v8 }
 0xcda   : > { %4999 = vmatprep.mubr.msk.f32.mxu1 %vm711_vm0, %v3350_v53 }
 0xcdb   : > { %5000 = vmatmul.mubr.msk.f32.gmra.mrb[46].mxu1 %vm711_vm0, %v3351_v25 }
 0xcdc   : > { %5010 = vmatprep.mubr.msk.f32.mxu1 %vm711_vm0, %v2068_v44 }
 0xcdf   : > { %5011 = vmatmul.mubr.msk.f32.vlgmr.msra.gmra.mrb[40].mxu1 %vm711_vm0, %v2069_v0 }
 0xce0   : > { %5013 = vmatprep.mubr.msk.f32.mxu1 %vm711_vm0, %v2070_v6 }
 0xce3   : > { %5014 = vmatmul.mubr.msk.f32.gmra.mrb[42].mxu1 %vm711_vm0, %v2071_v55 }
 0xce4   : > { %5016 = vmatprep.mubr.msk.f32.mxu1 %vm711_vm0, %v2072_v21 }
 0xce7   : > { %5017 = vmatmul.mubr.msk.f32.gmra.mrb[44].mxu1 %vm711_vm0, %v2073_v48 }
 0xce8   : > { %5019 = vmatprep.mubr.msk.f32.mxu1 %vm711_vm0, %v2074_v31 }
 0xceb   : > { %5020 = vmatmul.mubr.msk.f32.gmra.mrb[46].mxu1 %vm711_vm0, %v2075_v50 }
 0xdb2   : > { %v5012_v45 = vpop.f32.mrb[40].mxu1 }
 0xdb3   : > { %v3626_v35 = vadd.f32 %v5012_v45, %v4385_v17  ;;  %v3579_v54 = vpop.f32.mrb[41].mxu1 }
 0xdb4   : > { %v3625_v27 = vadd.f32 %v4385_v17, %v3579_v54 }
 0xdb5   : > { %v6833_v33 = vadd.f32 %v5683_v18, %v3626_v35 }
 0xdb6   : > { %v6836_v57 = vadd.f32 %v5684_v51, %v3625_v27  ;;  %v5015_v62 = vpop.f32.mrb[42].mxu1 }
 0xdb7   : > { %v3628_v61 = vadd.f32 %v5015_v62, %v4385_v17  ;;  %v3589_v46 = vpop.f32.mrb[43].mxu1  ;;  %v3646_v11 = vsel %vm711_vm0, %v6833_v33, 0.0 }
 0xdb8   : > { %v3627_v2 = vadd.f32 %v4385_v17, %v3589_v46  ;;  %3647 = vadd.xlane.f32.xlu1 %v3646_v11  ;;  %v3643_v4 = vsel %vm711_vm0, %v6836_v57, 0.0 }
 0xdb9   : > { %v6843_v49 = vadd.f32 %v5685_v58, %v3628_v61  ;;  %3644 = vadd.xlane.f32.xlu0 %v3643_v4 }
 0xdba   : > { %v5018_v52 = vpop.f32.mrb[44].mxu1  ;;  %v6848_v9 = vadd.f32 %v5686_v59, %v3627_v2  ;;  %v3776_v59 = vld [vmem:[%s7097_s18 + $0x8] sm:$0xff] }
 0xdbb   : > { %v3630_v1 = vadd.f32 %v5018_v52, %v4385_v17  ;;  %v3599_v40 = vpop.f32.mrb[45].mxu1  ;;  %v3652_v13 = vsel %vm711_vm0, %v6843_v49, 0.0 }
 0xdbc   : > { %v3629_v20 = vadd.f32 %v4385_v17, %v3599_v40  ;;  %v3649_v37 = vsel %vm711_vm0, %v6848_v9, 0.0 }
 0xdbd   : > { %v6851_v28 = vadd.f32 %v5687_v10, %v3630_v1  ;;  %3653 = vadd.xlane.f32.xlu0 %v3652_v13  ;;  %v3775_v13 = vld [vmem:[%s7097_s18] sm:$0xff]  ;;  %v3777_v10 = vld [vmem:[%s7097_s18 + $0x10] sm:$0xff] }
 0xdbe   : > { %v5021_v7 = vpop.f32.mrb[46].mxu1  ;;  %v6856_v16 = vadd.f32 %v5688_v15, %v3629_v20  ;;  %v5278_v20 = vpack.c.bf16 %v3776_v59, %v3775_v13 }
 0xdbf   : > { %v3632_v38 = vadd.f32 %v5021_v7, %v4385_v17  ;;  %v3609_v36 = vpop.f32.mrb[47].mxu1  ;;  %v3658_v14 = vsel %vm711_vm0, %v6851_v28, 0.0  ;;  %v3778_v7 = vld [vmem:[%s7097_s18 + $0x18] sm:$0xff] }
 0xdc0   : > { %v3631_v19 = vadd.f32 %v4385_v17, %v3609_v36  ;;  %3659 = vadd.xlane.f32.xlu1 %v3658_v14  ;;  %v3655_v63 = vsel %vm711_vm0, %v6856_v16, 0.0  ;;  %5279 = vmatprep.subr.bf16.mxu0 %v5278_v20 }
 0xdc1   : > { %v6861_v29 = vadd.f32 %v5689_v23, %v3632_v38  ;;  %3650 = vadd.xlane.f32.xlu0 %v3649_v37  ;;  %5281 = vmatpush3.bf16.msra.mxu0 %v5278_v20  ;;  %v5282_v38 = vpack.c.bf16 %v3778_v7, %v3777_v10 }
 0xdc2   : > { %v6866_v41 = vadd.f32 %v5690_v26, %v3631_v19 }
 0xdc3   : > { %v3664_v22 = vsel %vm711_vm0, %v6861_v29, 0.0  ;;  %5283 = vmatprep.subr.bf16.mxu0 %v5282_v38 }
 0xdc4   : > { %3665 = vadd.xlane.f32.xlu1 %v3664_v22  ;;  %v3661_v5 = vsel %vm711_vm0, %v6866_v41, 0.0 }
 0xdc5   : > { %3656 = vadd.xlane.f32.xlu0 %v3655_v63  ;;  %5285 = vmatpush3.bf16.msra.mxu0 %v5282_v38 }
 0xdc9   : > { %3662 = vadd.xlane.f32.xlu0 %v3661_v5 }
 0xe45   : > { %v3648_v43 = vpop.xlane.xlu1 %3647 }
 0xe46   : > { %v3668_v56 = vmul.f32 0.03125, %v3648_v43  ;;  %v3645_v42 = vpop.xlane.xlu0 %3644 }
 0xe47   : > { %v3667_v3 = vmul.f32 0.03125, %v3645_v42 }
 0xe48   : > { %v6873_v30 = vsub.f32 %v6833_v33, %v3668_v56 }
 0xe49   : > { %v6876_v24 = vsub.f32 %v6836_v57, %v3667_v3 }
 0xe4a   : > { %v3654_v39 = vpop.xlane.xlu0 %3653  ;;  %v3684_v60 = vmul.f32 %v6873_v30, %v6873_v30 }
 0xe4b   : > { %v3670_v32 = vmul.f32 0.03125, %v3654_v39  ;;  %v3683_v12 = vmul.f32 %v6876_v24, %v6876_v24 }
 0xe4c   : > { %v3694_v34 = vsel %vm711_vm0, %v3684_v60, 0.0 }
 0xe4d   : > { %v6884_v47 = vsub.f32 %v6843_v49, %v3670_v32  ;;  %v3660_v8 = vpop.xlane.xlu1 %3659  ;;  %3695 = vadd.xlane.f32.xlu1 %v3694_v34  ;;  %v3691_v53 = vsel %vm711_vm0, %v3683_v12, 0.0 }
 0xe4e   : > { %v3672_v25 = vmul.f32 0.03125, %v3660_v8  ;;  %v3651_v44 = vpop.xlane.xlu0 %3650  ;;  %3692 = vadd.xlane.f32.xlu0 %v3691_v53  ;;  %v4386_v53 = vld [vmem:[%s7095_s16] ss:$0 sm:$0xff] }
 0xe4f   : > { %v3669_v0 = vmul.f32 0.03125, %v3651_v44  ;;  %v3686_v6 = vmul.f32 %v6884_v47, %v6884_v47 }
 0xe50   : > { %v6890_v55 = vsub.f32 %v6851_v28, %v3672_v25 }
 0xe51   : > { %v6893_v21 = vsub.f32 %v6848_v9, %v3669_v0  ;;  %v3666_v48 = vpop.xlane.xlu1 %3665  ;;  %v3700_v31 = vsel %vm711_vm0, %v3686_v6, 0.0 }
 0xe52   : > { %v3674_v50 = vmul.f32 0.03125, %v3666_v48  ;;  %v3657_v17 = vpop.xlane.xlu0 %3656  ;;  %3701 = vadd.xlane.f32.xlu1 %v3700_v31  ;;  %v3688_v45 = vmul.f32 %v6890_v55, %v6890_v55 }
 0xe53   : > { %v3671_v35 = vmul.f32 0.03125, %v3657_v17  ;;  %v3685_v54 = vmul.f32 %v6893_v21, %v6893_v21 }
 0xe54   : > { %v6901_v27 = vsub.f32 %v6861_v29, %v3674_v50  ;;  %v3706_v18 = vsel %vm711_vm0, %v3688_v45, 0.0  ;;  %v4387_v50 = vld [vmem:[%s7096_s17] ss:$0 sm:$0xff] }
 0xe55   : > { %v6905_v51 = vsub.f32 %v6856_v16, %v3671_v35  ;;  %v3697_v62 = vsel %vm711_vm0, %v3685_v54, 0.0 }
 0xe56   : > { %3707 = vadd.xlane.f32.xlu1 %v3706_v18  ;;  %3698 = vadd.xlane.f32.xlu0 %v3697_v62  ;;  %v3663_v61 = vpop.xlane.xlu0 %3662  ;;  %v3690_v46 = vmul.f32 %v6901_v27, %v6901_v27 }
 0xe57   : > { %v3673_v11 = vmul.f32 0.03125, %v3663_v61  ;;  %v3687_v2 = vmul.f32 %v6905_v51, %v6905_v51 }
 0xe58   : > { %v3712_v4 = vsel %vm711_vm0, %v3690_v46, 0.0 }
 0xe59   : > { %v6914_v58 = vsub.f32 %v6866_v41, %v3673_v11  ;;  %v3703_v52 = vsel %vm711_vm0, %v3687_v2, 0.0 }
 0xe5a   : > { %3713 = vadd.xlane.f32.xlu1 %v3712_v4  ;;  %3704 = vadd.xlane.f32.xlu0 %v3703_v52 }
 0xe5b   : > { %v3689_v1 = vmul.f32 %v6914_v58, %v6914_v58 }
 0xe5d   : > { %v3709_v40 = vsel %vm711_vm0, %v3689_v1, 0.0 }
 0xe5e   : > { %3710 = vadd.xlane.f32.xlu0 %v3709_v40 }
 0xeda   : > { %v3696_v36 = vpop.xlane.xlu1 %3695 }
 0xedb   : > { %v3716_v14 = vmul.f32 0.03125, %v3696_v36  ;;  %v3693_v15 = vpop.xlane.xlu0 %3692 }
 0xedc   : > { %v3715_v19 = vmul.f32 0.03125, %v3693_v15 }
 0xedd   : > { %v3724_v37 = vadd.f32 1e-05, %v3716_v14 }
 0xede   : > { %v3723_v23 = vadd.f32 1e-05, %v3715_v19  ;;  %v3988_v19 = vld [vmem:[%s7099_s20 + $0x8] sm:$0xff] }
 0xedf   : > { %5651 = vrsqrt.f32 %v3724_v37  ;;  %v3702_v22 = vpop.xlane.xlu1 %3701 }
 0xee0   : > { %5653 = vrsqrt.f32 %v3723_v23  ;;  %v3718_v26 = vmul.f32 0.03125, %v3702_v22  ;;  %v3989_v23 = vld [vmem:[%s7099_s20 + $0x10] sm:$0xff]  ;;  %v3990_v22 = vld [vmem:[%s7099_s20 + $0x18] sm:$0xff] }
 0xee2   : > { %v3726_v63 = vadd.f32 1e-05, %v3718_v26  ;;  %v5290_v26 = vpack.c.bf16 %v3990_v22, %v3989_v23 }
 0xee3   : > { %v3708_v5 = vpop.xlane.xlu1 %3707  ;;  %v3699_v43 = vpop.xlane.xlu0 %3698 }
 0xee4   : > { %5655 = vrsqrt.f32 %v3726_v63  ;;  %v3720_v56 = vmul.f32 0.03125, %v3708_v5  ;;  %v3717_v42 = vmul.f32 0.03125, %v3699_v43  ;;  %v3991_v63 = vld [vmem:[%s7099_s20 + $0x20] sm:$0xff]  ;;  %v3992_v5 = vld [vmem:[%s7099_s20 + $0x28] sm:$0xff] }
 0xee5   : > { %v5294_v43 = vpack.c.bf16 %v3992_v5, %v3991_v63 }
 0xee6   : > { %v3728_v3 = vadd.f32 1e-05, %v3720_v56  ;;  %v3725_v39 = vadd.f32 1e-05, %v3717_v42  ;;  %v3993_v56 = vld [vmem:[%s7099_s20 + $0x30] sm:$0xff]  ;;  %v3994_v42 = vld [vmem:[%s7099_s20 + $0x38] sm:$0xff] }
 0xee7   : > { %v3714_v60 = vpop.xlane.xlu1 %3713  ;;  %v3705_v32 = vpop.xlane.xlu0 %3704 }
 0xee8   : > { %5657 = vrsqrt.f32 %v3728_v3  ;;  %v3722_v12 = vmul.f32 0.03125, %v3714_v60  ;;  %v3719_v34 = vmul.f32 0.03125, %v3705_v32  ;;  %v5298_v3 = vpack.c.bf16 %v3994_v42, %v3993_v56 }
 0xee9   : > { %v5652_v8 = vpop.eup %5651  ;;  %5659 = vrsqrt.f32 %v3725_v39  ;;  %v4388_v39 = vld [vmem:[%s7098_s19] ss:$0 sm:$0xff] }
 0xeea   : > { %v5654_v25 = vpop.eup %5653  ;;  %v3740_v44 = vmul.f32 %v5652_v8, %v6873_v30  ;;  %v3730_v0 = vadd.f32 1e-05, %v3722_v12  ;;  %v3727_v6 = vadd.f32 1e-05, %v3719_v34 }
 0xeeb   : > { %v3711_v48 = vpop.xlane.xlu0 %3710  ;;  %v3739_v31 = vmul.f32 %v5654_v25, %v6876_v24 }
 0xeec   : > { %v3754_v17 = vmul.f32 %v4386_v53, %v3740_v44  ;;  %5661 = vrsqrt.f32 %v3730_v0  ;;  %v3721_v45 = vmul.f32 0.03125, %v3711_v48 }
 0xeed   : > { %5663 = vrsqrt.f32 %v3727_v6  ;;  %v3753_v35 = vmul.f32 %v4386_v53, %v3739_v31 }
 0xeee   : > { %v5656_v54 = vpop.eup %5655  ;;  %v3729_v18 = vadd.f32 1e-05, %v3721_v45  ;;  %v6942_v61 = vadd.f32 %v4387_v50, %v3754_v17 }
 0xeef   : > { %v6940_v62 = vadd.f32 %v4387_v50, %v3753_v35  ;;  %v3742_v30 = vmul.f32 %v5656_v54, %v6884_v47 }
 0xef0   : > { %5665 = vrsqrt.f32 %v3729_v18 }
 0xef1   : > { %5030 = vmatprep.mubr.msk.f32.mxu0 %vm711_vm0, %v6940_v62  ;;  %v3756_v2 = vmul.f32 %v4386_v53, %v3742_v30 }
 0xef2   : > { %v5658_v24 = vpop.eup %5657  ;;  %5031 = vmatmul.mubr.msk.f32.vlgmr.msra.gmra.mrb[56].mxu0 %vm711_vm0, %v6942_v61 }
 0xef3   : > { %v5660_v46 = vpop.eup %5659  ;;  %v3744_v4 = vmul.f32 %v5658_v24, %v6890_v55  ;;  %v6954_v20 = vadd.f32 %v4387_v50, %v3756_v2 }
 0xef4   : > { %v3741_v11 = vmul.f32 %v5660_v46, %v6893_v21 }
 0xef5   : > { %v3758_v47 = vmul.f32 %v4386_v53, %v3744_v4 }
 0xef6   : > { %v5662_v52 = vpop.eup %5661  ;;  %v3755_v1 = vmul.f32 %v4386_v53, %v3741_v11 }
 0xef7   : > { %v5664_v40 = vpop.eup %5663  ;;  %v3746_v10 = vmul.f32 %v5662_v52, %v6901_v27  ;;  %v6964_v36 = vadd.f32 %v4387_v50, %v3758_v47 }
 0xef8   : > { %v6951_v13 = vadd.f32 %v4387_v50, %v3755_v1  ;;  %v3743_v59 = vmul.f32 %v5664_v40, %v6905_v51 }
 0xef9   : > { %v3760_v14 = vmul.f32 %v4386_v53, %v3746_v10 }
 0xefa   : > { %v5666_v7 = vpop.eup %5665  ;;  %5033 = vmatprep.mubr.msk.f32.mxu0 %vm711_vm0, %v6951_v13  ;;  %v3757_v21 = vmul.f32 %v4386_v53, %v3743_v59 }
 0xefb   : > { %5034 = vmatmul.mubr.msk.f32.gmra.mrb[58].mxu0 %vm711_vm0, %v6954_v20  ;;  %v3745_v55 = vmul.f32 %v5666_v7, %v6914_v58  ;;  %v6974_v15 = vadd.f32 %v4387_v50, %v3760_v14  ;;  %v3987_v58 = vld [vmem:[%s7099_s20] sm:$0xff] }
 0xefc   : > { %v6962_v38 = vadd.f32 %v4387_v50, %v3757_v21  ;;  %v5286_v37 = vpack.c.bf16 %v3988_v19, %v3987_v58 }
 0xefd   : > { %v3759_v51 = vmul.f32 %v4386_v53, %v3745_v55 }
 0xefe   : > { %5036 = vmatprep.mubr.msk.f32.mxu0 %vm711_vm0, %v6962_v38  ;;  %5287 = vmatprep.subr.bf16.mxu0 %v5286_v37 }
 0xeff   : > { %5037 = vmatmul.mubr.msk.f32.gmra.mrb[60].mxu0 %vm711_vm0, %v6964_v36  ;;  %v6970_v27 = vadd.f32 %v4387_v50, %v3759_v51  ;;  %5302 = vmatprep.subr.bf16.mxu1 %v5286_v37 }
 0xf00   : > { %5289 = vmatpush3.bf16.msra.mxu0 %v5286_v37  ;;  %5306 = vmatpush3.bf16.msra.mxu1 %v5286_v37 }
 0xf01   : > { %5039 = vmatprep.mubr.msk.f32.mxu0 %vm711_vm0, %v6970_v27  ;;  %5291 = vmatprep.subr.bf16.mxu0 %v5290_v26 }
 0xf02   : > { %5303 = vmatprep.subr.bf16.mxu1 %v5290_v26 }
 0xf03   : > { %5040 = vmatmul.mubr.msk.f32.gmra.mrb[62].mxu0 %vm711_vm0, %v6974_v15 }
 0xf04   : > { %5293 = vmatpush3.bf16.msra.mxu0 %v5290_v26  ;;  %5307 = vmatpush3.bf16.msra.mxu1 %v5290_v26 }
 0xf05   : > { %5295 = vmatprep.subr.bf16.mxu0 %v5294_v43  ;;  %5304 = vmatprep.subr.bf16.mxu1 %v5294_v43 }
 0xf08   : > { %5297 = vmatpush3.bf16.msra.mxu0 %v5294_v43  ;;  %5308 = vmatpush3.bf16.msra.mxu1 %v5294_v43 }
 0xf09   : > { %5299 = vmatprep.subr.bf16.mxu0 %v5298_v3  ;;  %5305 = vmatprep.subr.bf16.mxu1 %v5298_v3 }
 0xf0c   : > { %5301 = vmatpush3.bf16.msra.mxu0 %v5298_v3  ;;  %5309 = vmatpush3.bf16.msra.mxu1 %v5298_v3 }
 0xfc5   : > { %v5032_v60 = vpop.f32.mrb[56].mxu0 }
 0xfc6   : > { %v3882_v32 = vadd.f32 %v5032_v60, %v4388_v39  ;;  %v3876_v12 = vpop.f32.mrb[57].mxu0 }
 0xfc7   : > { %v3877_v34 = vadd.f32 %v4388_v39, %v3876_v12 }
 0xfc8   : > { %v3924_v8 = vmul.f32 0.044715, %v3882_v32 }
 0xfc9   : > { %v3923_v53 = vmul.f32 0.044715, %v3877_v34 }
 0xfca   : > { %v3932_v25 = vmul.f32 %v3924_v8, %v3882_v32 }
 0xfcb   : > { %v3931_v44 = vmul.f32 %v3923_v53, %v3877_v34 }
 0xfcc   : > { %v3940_v0 = vmul.f32 %v3932_v25, %v3882_v32 }
 0xfcd   : > { %v3939_v6 = vmul.f32 %v3931_v44, %v3877_v34 }
 0xfce   : > { %v3948_v48 = vadd.f32 %v3940_v0, %v3882_v32  ;;  %v5035_v31 = vpop.f32.mrb[58].mxu0  ;;  %v3915_v0 = vmul.f32 0.5, %v3877_v34 }
 0xfcf   : > { %v3947_v50 = vadd.f32 %v3939_v6, %v3877_v34  ;;  %v7005_v17 = vadd.f32 %v5035_v31, %v4388_v39  ;;  %v3886_v45 = vpop.f32.mrb[59].mxu0  ;;  %v3916_v31 = vmul.f32 0.5, %v3882_v32 }
 0xfd0   : > { %v3956_v35 = vmul.f32 0.7978846, %v3948_v48  ;;  %v3887_v54 = vadd.f32 %v4388_v39, %v3886_v45 }
 0xfd1   : > { %v3926_v18 = vmul.f32 0.044715, %v7005_v17  ;;  %v3955_v30 = vmul.f32 0.7978846, %v3947_v50 }
 0xfd2   : > { %5667 = vtanh.f32 %v3956_v35  ;;  %v3925_v24 = vmul.f32 0.044715, %v3887_v54  ;;  %v5038_v46 = vpop.f32.mrb[60].mxu0 }
 0xfd3   : > { %v3934_v11 = vmul.f32 %v3926_v18, %v7005_v17  ;;  %v7009_v2 = vadd.f32 %v5038_v46, %v4388_v39  ;;  %v3896_v4 = vpop.f32.mrb[61].mxu0  ;;  %5669 = vtanh.f32 %v3955_v30 }
 0xfd4   : > { %v3933_v52 = vmul.f32 %v3925_v24, %v3887_v54  ;;  %v3897_v1 = vadd.f32 %v4388_v39, %v3896_v4  ;;  %v3917_v4 = vmul.f32 0.5, %v3887_v54 }
 0xfd5   : > { %v3942_v40 = vmul.f32 %v3934_v11, %v7005_v17  ;;  %v3928_v59 = vmul.f32 0.044715, %v7009_v2 }
 0xfd6   : > { %v3941_v47 = vmul.f32 %v3933_v52, %v3887_v54  ;;  %v3927_v10 = vmul.f32 0.044715, %v3897_v1  ;;  %v5041_v7 = vpop.f32.mrb[62].mxu0  ;;  %v3918_v52 = vmul.f32 0.5, %v7005_v17 }
 0xfd7   : > { %v3950_v21 = vadd.f32 %v3942_v40, %v7005_v17  ;;  %v3936_v55 = vmul.f32 %v3928_v59, %v7009_v2  ;;  %v7015_v51 = vadd.f32 %v5041_v7, %v4388_v39  ;;  %v3906_v14 = vpop.f32.mrb[63].mxu0 }
 0xfd8   : > { %v3949_v58 = vadd.f32 %v3941_v47, %v3887_v54  ;;  %v3935_v19 = vmul.f32 %v3927_v10, %v3897_v1  ;;  %v3907_v37 = vadd.f32 %v4388_v39, %v3906_v14  ;;  %v3920_v14 = vmul.f32 0.5, %v7009_v2 }
 0xfd9   : > { %v3958_v23 = vmul.f32 0.7978846, %v3950_v21  ;;  %v3944_v22 = vmul.f32 %v3936_v55, %v7009_v2  ;;  %v3930_v26 = vmul.f32 0.044715, %v7015_v51  ;;  %v3919_v21 = vmul.f32 0.5, %v3897_v1 }
 0xfda   : > { %v3943_v63 = vmul.f32 %v3935_v19, %v3897_v1  ;;  %v3929_v5 = vmul.f32 0.044715, %v3907_v37  ;;  %v3957_v43 = vmul.f32 0.7978846, %v3949_v58  ;;  %v3921_v17 = vmul.f32 0.5, %v3907_v37 }
 0xfdb   : > { %5671 = vtanh.f32 %v3958_v23  ;;  %v3952_v56 = vadd.f32 %v3944_v22, %v7009_v2  ;;  %v3938_v42 = vmul.f32 %v3930_v26, %v7015_v51  ;;  %v4397_v2 = vld [vmem:[%s7100_s21] ss:$0 sm:$0xff] }
 0xfdc   : > { %v5668_v3 = vpop.eup %5667  ;;  %v3951_v60 = vadd.f32 %v3943_v63, %v3897_v1  ;;  %v3937_v12 = vmul.f32 %v3929_v5, %v3907_v37  ;;  %5673 = vtanh.f32 %v3957_v43  ;;  %v3922_v63 = vmul.f32 0.5, %v7015_v51 }
 0xfdd   : > { %v5670_v8 = vpop.eup %5669  ;;  %v3972_v53 = vadd.f32 1.0, %v5668_v3  ;;  %v3946_v39 = vmul.f32 %v3938_v42, %v7015_v51  ;;  %v3960_v25 = vmul.f32 0.7978846, %v3952_v56 }
 0xfde   : > { %v3945_v44 = vmul.f32 %v3937_v12, %v3907_v37  ;;  %v3971_v6 = vadd.f32 1.0, %v5670_v8  ;;  %v3959_v48 = vmul.f32 0.7978846, %v3951_v60 }
 0xfdf   : > { %v3954_v50 = vadd.f32 %v3946_v39, %v7015_v51  ;;  %5675 = vtanh.f32 %v3960_v25  ;;  %v3980_v18 = vmul.f32 %v3972_v53, %v3916_v31 }
 0xfe0   : > { %v3953_v45 = vadd.f32 %v3945_v44, %v3907_v37  ;;  %v3979_v35 = vmul.f32 %v3971_v6, %v3915_v0  ;;  %5677 = vtanh.f32 %v3959_v48 }
 0xfe1   : > { %v3962_v30 = vmul.f32 0.7978846, %v3954_v50 }
 0xfe2   : > { %5058 = vmatprep.mubr.msk.f32.mxu0 %vm1152_vm3, %v3979_v35  ;;  %v3961_v24 = vmul.f32 0.7978846, %v3953_v45 }
 0xfe3   : > { %5059 = vmatmul.mubr.msk.f32.vlgmr.msra.gmra.mrb[64].mxu0 %vm1152_vm3, %v3980_v18  ;;  %5679 = vtanh.f32 %v3962_v30 }
 0xfe4   : > { %5681 = vtanh.f32 %v3961_v24 }
 0xfe5   : > { %v5672_v46 = vpop.eup %5671 }
 0xfe6   : > { %v5674_v34 = vpop.eup %5673  ;;  %v3974_v11 = vadd.f32 1.0, %v5672_v46 }
 0xfe7   : > { %v3973_v32 = vadd.f32 1.0, %v5674_v34 }
 0xfe8   : > { %v3982_v10 = vmul.f32 %v3974_v11, %v3918_v52 }
 0xfe9   : > { %v5676_v40 = vpop.eup %5675  ;;  %v3981_v59 = vmul.f32 %v3973_v32, %v3917_v4 }
 0xfea   : > { %v5678_v47 = vpop.eup %5677  ;;  %v3976_v7 = vadd.f32 1.0, %v5676_v40 }
 0xfeb   : > { %5061 = vmatprep.mubr.msk.f32.mxu1 %vm1152_vm3, %v3981_v59  ;;  %v3975_v55 = vadd.f32 1.0, %v5678_v47 }
 0xfec   : > { %5062 = vmatmul.mubr.msk.f32.vlgmr.msra.gmra.mrb[48].mxu1 %vm1152_vm3, %v3982_v10  ;;  %v3984_v54 = vmul.f32 %v3976_v7, %v3920_v14 }
 0xfed   : > { %v5680_v58 = vpop.eup %5679  ;;  %v3983_v19 = vmul.f32 %v3975_v55, %v3919_v21 }
 0xfee   : > { %v5682_v23 = vpop.eup %5681  ;;  %v3978_v22 = vadd.f32 1.0, %v5680_v58 }
 0xfef   : > { %5064 = vmatprep.mubr.msk.f32.mxu1 %vm1152_vm3, %v3983_v19  ;;  %v3977_v26 = vadd.f32 1.0, %v5682_v23 }
 0xff0   : > { %5065 = vmatmul.mubr.msk.f32.gmra.mrb[50].mxu1 %vm1152_vm3, %v3984_v54  ;;  %v3986_v5 = vmul.f32 %v3978_v22, %v3922_v63 }
 0xff1   : > { %v3985_v1 = vmul.f32 %v3977_v26, %v3921_v17 }
 0xff3   : > { %5067 = vmatprep.mubr.msk.f32.mxu1 %vm1152_vm3, %v3985_v1 }
 0xff4   : > { %5068 = vmatmul.mubr.msk.f32.gmra.mrb[52].mxu1 %vm1152_vm3, %v3986_v5 }
0x10b6   : > { %v5060_v43 = vpop.f32.mrb[64].mxu0 }
0x10b7   : > { %v4098_v56 = vadd.f32 %v5060_v43, %v4397_v2  ;;  %v4092_v42 = vpop.f32.mrb[65].mxu0 }
0x10b8   : > { %v4093_v3 = vadd.f32 %v4397_v2, %v4092_v42 }
0x10b9   : > { %v4132_v37 = vadd.f32 %v4098_v56, %v6942_v61 }
0x10ba   : > { %v4131_v51 = vadd.f32 %v4093_v3, %v6940_v62 }
0x10bb   : > { %v4140_v60 = vadd.f32 %v4132_v37, %v6833_v33 }
0x10bc   : > { %v4139_v12 = vadd.f32 %v4131_v51, %v6836_v57 }
0x10bd   : > { %4148 = vst.msk [vmem:[%s7043_s26 + $0x8] sm:$0xff] %vm711_vm0, %v4140_v60 }
0x10be   : > { %4147 = vst.msk [vmem:[%s7043_s26] sm:$0xff] %vm711_vm0, %v4139_v12 }
0x10bf   : > { %v5063_v61 = vpop.f32.mrb[48].mxu1 }
0x10c0   : > { %v4108_v8 = vadd.f32 %v5063_v61, %v4397_v2  ;;  %v4102_v53 = vpop.f32.mrb[49].mxu1 }
0x10c1   : > { %v4103_v39 = vadd.f32 %v4397_v2, %v4102_v53 }
0x10c2   : > { %v4134_v25 = vadd.f32 %v4108_v8, %v6954_v20 }
0x10c3   : > { %v4133_v44 = vadd.f32 %v4103_v39, %v6951_v13  ;;  %v5066_v0 = vpop.f32.mrb[50].mxu1 }
0x10c4   : > { %v4142_v33 = vadd.f32 %v4134_v25, %v6843_v49  ;;  %v4118_v62 = vadd.f32 %v5066_v0, %v4397_v2  ;;  %v4112_v57 = vpop.f32.mrb[51].mxu1 }
0x10c5   : > { %v4141_v6 = vadd.f32 %v4133_v44, %v6848_v9  ;;  %v4113_v48 = vadd.f32 %v4397_v2, %v4112_v57 }
0x10c6   : > { %4150 = vst.msk [vmem:[%s7043_s26 + $0x18] sm:$0xff] %vm711_vm0, %v4142_v33  ;;  %v4136_v31 = vadd.f32 %v4118_v62, %v6964_v36 }
0x10c7   : > { %4149 = vst.msk [vmem:[%s7043_s26 + $0x10] sm:$0xff] %vm711_vm0, %v4141_v6  ;;  %v4135_v13 = vadd.f32 %v4113_v48, %v6962_v38  ;;  %v5069_v20 = vpop.f32.mrb[52].mxu1 }
0x10c8   : > { %v4144_v50 = vadd.f32 %v4136_v31, %v6851_v28  ;;  %v4128_v49 = vadd.f32 %v5069_v20, %v4397_v2  ;;  %v4122_v45 = vpop.f32.mrb[53].mxu1 }
0x10c9   : > { %v4143_v35 = vadd.f32 %v4135_v13, %v6856_v16  ;;  %v4123_v18 = vadd.f32 %v4397_v2, %v4122_v45 }
0x10ca   : > { %4152 = vst.msk [vmem:[%s7043_s26 + $0x28] sm:$0xff] %vm711_vm0, %v4144_v50  ;;  %v4138_v9 = vadd.f32 %v4128_v49, %v6974_v15 }
0x10cb   : > { %4151 = vst.msk [vmem:[%s7043_s26 + $0x20] sm:$0xff] %vm711_vm0, %v4143_v35  ;;  %v4137_v36 = vadd.f32 %v4123_v18, %v6970_v27 }
0x10cc   : > { %v4146_v30 = vadd.f32 %v4138_v9, %v6861_v29 }
0x10cd   : > { %v4145_v38 = vadd.f32 %v4137_v36, %v6866_v41 }
0x10ce   : > { %4154 = vst.msk [vmem:[%s7043_s26 + $0x38] sm:$0xff] %vm711_vm0, %v4146_v30 }
0x10cf   : > { %4153 = vst.msk [vmem:[%s7043_s26 + $0x30] sm:$0xff] %vm711_vm0, %v4145_v38 }
0x10d0 PF: > { %s32_s3 = sadd.s32 1, %s5697_s3  }
0x10d1   : > { %p29_p4 = scmp.ge.s32.totalorder %s32_s3, 4  }
0x10d3   :  { %31 = sbr.rel (!%p29_p4) target bundleno = 10 (0xa), region = 138 }

</bundles_post_ra>
